<compile_context>
chip_gen: v7x
topology: tpu7x:2x2x1
jax: 0.10.0
libtpu: 0.0.40
codegen_flags: <defaults>
</compile_context>

<pallas_src>
import functools

import jax
import jax.numpy as jnp
from jax.experimental import pallas as pl
from jax.experimental.pallas import tpu as pltpu


LN_EPS = 1e-6
_SQRT_HALF = 0.7071067811865476


def _layernorm(x, gamma, beta, eps=LN_EPS):
    mean = jnp.mean(x, axis=-1, keepdims=True)
    xc = x - mean
    var = jnp.mean(xc * xc, axis=-1, keepdims=True)        # biased var (torch LN)
    return xc * jax.lax.rsqrt(var + eps) * gamma + beta


def _gelu_exact(x):
    return 0.5 * x * (1.0 + jax.lax.erf(x * _SQRT_HALF))


# ----------------------------------------------------------------------------
# 1. Embedding kernel: patch matmul + cls token + pos embed + pad, fused
# ----------------------------------------------------------------------------
def _embed_kernel(patches_ref, w_ref, b_ref, cls_ref, pos_ref, o_ref, *,
                  batch, n_patches, n_pad):
    y = jnp.dot(patches_ref[...].astype(jnp.bfloat16), w_ref[...],
                preferred_element_type=jnp.float32) + b_ref[...]   # [B*n_patches, D]
    cls_row = cls_ref[...] + pos_ref[0:1, :]                        # [1, D]
    pos_p = pos_ref[1:1 + n_patches, :]                             # [n_patches, D]
    d = y.shape[-1]
    n_zero = n_pad - 1 - n_patches
    rows = []
    for b in range(batch):
        rows.append(cls_row)
        rows.append(y[b * n_patches:(b + 1) * n_patches, :] + pos_p)
        if n_zero > 0:
            rows.append(jnp.zeros((n_zero, d), jnp.float32))
    o_ref[...] = jnp.concatenate(rows, axis=0).astype(o_ref.dtype)


def embed_tokens(patches, patch_w, patch_b, cls_token, pos_embed, *,
                 batch, n_patches, n_pad, embed_dim):
    bn = batch * n_pad
    cpp = patches.shape[-1]
    n_real = n_patches + 1
    return pl.pallas_call(
        functools.partial(_embed_kernel, batch=batch, n_patches=n_patches,
                          n_pad=n_pad),
        out_shape=jax.ShapeDtypeStruct((bn, embed_dim), jnp.float32),
        grid=(1,),
        in_specs=[
            pl.BlockSpec((batch * n_patches, cpp), lambda i: (0, 0)),
            pl.BlockSpec((cpp, embed_dim), lambda i: (0, 0)),
            pl.BlockSpec((1, embed_dim), lambda i: (0, 0)),
            pl.BlockSpec((1, embed_dim), lambda i: (0, 0)),
            pl.BlockSpec((n_real, embed_dim), lambda i: (0, 0)),
        ],
        out_specs=pl.BlockSpec((bn, embed_dim), lambda i: (0, 0)),
    )(patches, patch_w, patch_b, cls_token, pos_embed)


# ----------------------------------------------------------------------------
# 2. Fused 12-layer transformer stack: one pallas_call, grid=(depth,)
# ----------------------------------------------------------------------------
def _stack_kernel(x_ref, n1g_ref, n1b_ref, qkvw_ref, qkvb_ref, projw_ref,
                  projb_ref, n2g_ref, n2b_ref, fc1w_ref, fc1b_ref, fc2w_ref,
                  fc2b_ref, o_ref, *, batch, n_pad, n_real, num_heads):
    layer = pl.program_id(0)

    # Initialize the resident activation block from the embedded tokens.
    @pl.when(layer == 0)
    def _():
        o_ref[...] = x_ref[...]

    d = o_ref.shape[-1]
    hd = d // num_heads
    scale = hd ** -0.5

    x = o_ref[...]                                           # [B*Np, D] f32

    # ---------------- attention branch ----------------
    h = _layernorm(x, n1g_ref[0], n1b_ref[0])
    qkv = jnp.dot(h.astype(jnp.bfloat16), qkvw_ref[0],
                  preferred_element_type=jnp.float32) + qkvb_ref[0]   # [B*Np, 3D]

    # mask out padded key tokens (columns >= n_real)
    col = jax.lax.broadcasted_iota(jnp.int32, (n_pad, n_pad), 1)
    key_mask = col < n_real

    per_batch = []
    for b in range(batch):                                   # static unroll (tiny)
        r0 = b * n_pad
        heads = []
        for hh in range(num_heads):
            q = qkv[r0:r0 + n_pad, hh * hd:(hh + 1) * hd]
            k = qkv[r0:r0 + n_pad, d + hh * hd:d + (hh + 1) * hd]
            v = qkv[r0:r0 + n_pad, 2 * d + hh * hd:2 * d + (hh + 1) * hd]
            # contract last axis of q and k directly (no transpose materialized)
            s = jax.lax.dot_general(
                q * scale, k,
                dimension_numbers=(((1,), (1,)), ((), ())),
                preferred_element_type=jnp.float32)          # [Np, Np]
            s = jnp.where(key_mask, s, -1e30)
            m = jnp.max(s, axis=-1, keepdims=True)
            p = jnp.exp(s - m)
            p = p * pl.reciprocal(jnp.sum(p, axis=-1, keepdims=True), approx=True)
            heads.append(jnp.dot(p, v, preferred_element_type=jnp.float32))
        per_batch.append(jnp.concatenate(heads, axis=-1))    # lane-dense [Np, D]
    attn = jnp.concatenate(per_batch, axis=0)                # [B*Np, D]

    attn = jnp.dot(attn.astype(jnp.bfloat16), projw_ref[0],
                   preferred_element_type=jnp.float32) + projb_ref[0]
    x = x + attn

    # ---------------- MLP branch ----------------
    h = _layernorm(x, n2g_ref[0], n2b_ref[0])
    h = jnp.dot(h.astype(jnp.bfloat16), fc1w_ref[0],
                preferred_element_type=jnp.float32) + fc1b_ref[0]
    h = _gelu_exact(h)
    h = jnp.dot(h.astype(jnp.bfloat16), fc2w_ref[0],
                preferred_element_type=jnp.float32) + fc2b_ref[0]
    x = x + h

    o_ref[...] = x


def transformer_stack(tokens, blocks, *, batch, n_pad, n_real, num_heads):
    bn, d = tokens.shape
    depth = blocks["qkv_w"].shape[0]
    hidden = blocks["fc1_w"].shape[-1]

    def per_layer(block_shape):
        return pl.BlockSpec(block_shape, lambda l: (l, 0, 0))

    return pl.pallas_call(
        functools.partial(_stack_kernel, batch=batch, n_pad=n_pad,
                          n_real=n_real, num_heads=num_heads),
        out_shape=jax.ShapeDtypeStruct((bn, d), jnp.float32),
        grid=(depth,),
        in_specs=[
            pl.BlockSpec((bn, d), lambda l: (0, 0)),   # tokens (fetched once)
            per_layer((1, 1, d)),                      # norm1_g
            per_layer((1, 1, d)),                      # norm1_b
            per_layer((1, d, 3 * d)),                  # qkv_w
            per_layer((1, 1, 3 * d)),                  # qkv_b
            per_layer((1, d, d)),                      # proj_w
            per_layer((1, 1, d)),                      # proj_b
            per_layer((1, 1, d)),                      # norm2_g
            per_layer((1, 1, d)),                      # norm2_b
            per_layer((1, d, hidden)),                 # fc1_w
            per_layer((1, 1, hidden)),                 # fc1_b
            per_layer((1, hidden, d)),                 # fc2_w
            per_layer((1, 1, d)),                      # fc2_b
        ],
        # constant index map => output block stays resident in VMEM across the
        # whole depth loop and is written back to HBM once at the end.
        out_specs=pl.BlockSpec((bn, d), lambda l: (0, 0)),
        compiler_params=pltpu.CompilerParams(
            dimension_semantics=("arbitrary",)),
    )(tokens, blocks["norm1_g"], blocks["norm1_b"], blocks["qkv_w"],
      blocks["qkv_b"], blocks["proj_w"], blocks["proj_b"], blocks["norm2_g"],
      blocks["norm2_b"], blocks["fc1_w"], blocks["fc1_b"], blocks["fc2_w"],
      blocks["fc2_b"])


# ----------------------------------------------------------------------------
# 3. Classifier head kernel: final LayerNorm (on cls rows) + Linear, fused
# ----------------------------------------------------------------------------
def _head_kernel(x_ref, g_ref, b_ref, w_ref, hb_ref, o_ref):
    h = _layernorm(x_ref[...], g_ref[...], b_ref[...])
    o_ref[...] = (jnp.dot(h.astype(jnp.bfloat16), w_ref[...],
                          preferred_element_type=jnp.float32)
                  + hb_ref[...]).astype(o_ref.dtype)


def classifier_head(cls_x, norm_g, norm_b, head_w, head_b):
    batch, d = cls_x.shape
    n_cls = head_w.shape[-1]
    return pl.pallas_call(
        _head_kernel,
        out_shape=jax.ShapeDtypeStruct((batch, n_cls), jnp.float32),
        grid=(1,),
        in_specs=[
            pl.BlockSpec((batch, d), lambda i: (0, 0)),
            pl.BlockSpec((1, d), lambda i: (0, 0)),
            pl.BlockSpec((1, d), lambda i: (0, 0)),
            pl.BlockSpec((d, n_cls), lambda i: (0, 0)),
            pl.BlockSpec((1, n_cls), lambda i: (0, 0)),
        ],
        out_specs=pl.BlockSpec((batch, n_cls), lambda i: (0, 0)),
    )(cls_x, norm_g, norm_b, head_w, head_b)


# ----------------------------------------------------------------------------
# Forward pass (glue: only the one-time im2col reshape + cls-row slice)
# ----------------------------------------------------------------------------
def tiny_vit_forward(x, params, *, patch_size, embed_dim, num_heads,
                     n_pad_tokens):
    B, C, H, W = x.shape
    P = patch_size
    nh, nw = H // P, W // P
    n_patches = nh * nw
    n_real = n_patches + 1
    # im2col for Conv2d(C, D, kernel=P, stride=P): [B, N, C*P*P]
    patches = (x.reshape(B, C, nh, P, nw, P)
               .transpose(0, 2, 4, 1, 3, 5)
               .reshape(B * n_patches, C * P * P))

    tokens = embed_tokens(patches, params["patch_w"], params["patch_b"],
                          params["cls_token"], params["pos_embed"],
                          batch=B, n_patches=n_patches, n_pad=n_pad_tokens,
                          embed_dim=embed_dim)                    # [B*Np, D]
    tokens = transformer_stack(tokens, params["blocks"], batch=B,
                               n_pad=n_pad_tokens, n_real=n_real,
                               num_heads=num_heads)               # [B*Np, D]
    cls_rows = tokens.reshape(B, n_pad_tokens, embed_dim)[:, 0, :]  # 'token' pool
    return classifier_head(cls_rows, params["norm_g"], params["norm_b"],
                           params["head_w"], params["head_b"])


# ----------------------------------------------------------------------------
# Deterministic synthetic parameters (shapes match deit_tiny backbone),
# with per-layer weights stacked along a leading depth axis.
# ----------------------------------------------------------------------------
def init_params(key, *, num_classes, img_size, patch_size, embed_dim, depth,
                num_heads, mlp_ratio):
    del num_heads
    C, P = 3, patch_size
    n_patches = (img_size // P) ** 2
    cpp = C * P * P
    hidden = int(embed_dim * mlp_ratio)
    keys = iter(jax.random.split(key, 16))

    def nrm(shape, std=0.02):
        return std * jax.random.normal(next(keys), shape, dtype=jnp.float32)

    # conv weight [D, C, P, P] folded into matmul layout [C*P*P, D]; the flatten
    # order matches the im2col patch ordering (C-major, then P, P).
    patch_w = nrm((embed_dim, C, P, P)).reshape(embed_dim, cpp).T

    return dict(
        patch_w=patch_w.astype(jnp.bfloat16),
        patch_b=jnp.zeros((1, embed_dim), jnp.float32),
        cls_token=nrm((1, embed_dim)),
        pos_embed=nrm((n_patches + 1, embed_dim)),
        norm_g=jnp.ones((1, embed_dim), jnp.float32),
        norm_b=jnp.zeros((1, embed_dim), jnp.float32),
        head_w=nrm((embed_dim, num_classes)).astype(jnp.bfloat16),
        head_b=jnp.zeros((1, num_classes), jnp.float32),
        blocks=dict(
            norm1_g=jnp.ones((depth, 1, embed_dim), jnp.float32),
            norm1_b=jnp.zeros((depth, 1, embed_dim), jnp.float32),
            qkv_w=nrm((depth, embed_dim, 3 * embed_dim)).astype(jnp.bfloat16),
            qkv_b=jnp.zeros((depth, 1, 3 * embed_dim), jnp.float32),
            proj_w=nrm((depth, embed_dim, embed_dim)).astype(jnp.bfloat16),
            proj_b=jnp.zeros((depth, 1, embed_dim), jnp.float32),
            norm2_g=jnp.ones((depth, 1, embed_dim), jnp.float32),
            norm2_b=jnp.zeros((depth, 1, embed_dim), jnp.float32),
            fc1_w=nrm((depth, embed_dim, hidden)).astype(jnp.bfloat16),
            fc1_b=jnp.zeros((depth, 1, hidden), jnp.float32),
            fc2_w=nrm((depth, hidden, embed_dim)).astype(jnp.bfloat16),
            fc2_b=jnp.zeros((depth, 1, embed_dim), jnp.float32),
        ),
    )


# ----------------------------------------------------------------------------
if __name__ == "__main__":
    # Small config consistent with tinyViT(num_classes, img_size, patch_size):
    # deit_tiny architecture constants (embed_dim/depth/heads) + small image.
    NUM_CLASSES = 10
    IMG_SIZE = 16
    PATCH_SIZE = 8
    EMBED_DIM = 192
    DEPTH = 12
    NUM_HEADS = 3
    MLP_RATIO = 4.0
    N_PAD_TOKENS = 8        # 1 cls + 4 patches, padded up to a full f32 sublane

    key = jax.random.PRNGKey(0)
    pkey, xkey = jax.random.split(key)
    params = init_params(
        pkey, num_classes=NUM_CLASSES, img_size=IMG_SIZE, patch_size=PATCH_SIZE,
        embed_dim=EMBED_DIM, depth=DEPTH, num_heads=NUM_HEADS,
        mlp_ratio=MLP_RATIO)
    x = jax.random.normal(xkey, (2, 3, IMG_SIZE, IMG_SIZE), dtype=jnp.float32)

    fwd = jax.jit(functools.partial(
        tiny_vit_forward, patch_size=PATCH_SIZE, embed_dim=EMBED_DIM,
        num_heads=NUM_HEADS, n_pad_tokens=N_PAD_TOKENS))
    logits = jax.block_until_ready(fwd(x, params))
    assert logits.shape == (2, NUM_CLASSES), logits.shape
    assert bool(jnp.all(jnp.isfinite(logits)))
    print("KERNEL_OK")
</pallas_src>

<mosaic_0001>
module attributes {stable_mosaic.version = 11 : i64} {
  func.func @_embed_kernel(%arg0: i32, %arg1: memref<8x192xf32, #tpu.memory_space<vmem>>, %arg2: memref<192x192xbf16, #tpu.memory_space<vmem>>, %arg3: memref<1x192xf32, #tpu.memory_space<vmem>>, %arg4: memref<1x192xf32, #tpu.memory_space<vmem>>, %arg5: memref<5x192xf32, #tpu.memory_space<vmem>>, %arg6: memref<16x192xf32, #tpu.memory_space<vmem>>) attributes {dimension_semantics = [#tpu.dimension_semantics<arbitrary>], iteration_bounds = array<i64: 1>, scalar_prefetch = 0 : i64, scratch_operands = 0 : i64, tpu.core_type = #tpu.core_type<tc>, window_params = [{pipeline_mode = #tpu.pipeline_mode<synchronous>, transform_indices = @transform_0, window_bounds = array<i64: 8, 192>}, {pipeline_mode = #tpu.pipeline_mode<synchronous>, transform_indices = @transform_1, window_bounds = array<i64: 192, 192>}, {pipeline_mode = #tpu.pipeline_mode<synchronous>, transform_indices = @transform_2, window_bounds = array<i64: 1, 192>}, {pipeline_mode = #tpu.pipeline_mode<synchronous>, transform_indices = @transform_3, window_bounds = array<i64: 1, 192>}, {pipeline_mode = #tpu.pipeline_mode<synchronous>, transform_indices = @transform_4, window_bounds = array<i64: 5, 192>}, {pipeline_mode = #tpu.pipeline_mode<synchronous>, transform_indices = @transform_5, window_bounds = array<i64: 16, 192>}]} {
    %c0 = arith.constant 0 : index
    %c0_0 = arith.constant 0 : index
    %0 = vector.load %arg1[%c0, %c0_0] : memref<8x192xf32, #tpu.memory_space<vmem>>, vector<8x192xf32>
    %1 = arith.truncf %0 : vector<8x192xf32> to vector<8x192xbf16>
    %c0_1 = arith.constant 0 : index
    %c0_2 = arith.constant 0 : index
    %2 = vector.load %arg2[%c0_1, %c0_2] : memref<192x192xbf16, #tpu.memory_space<vmem>>, vector<192x192xbf16>
    %cst = arith.constant dense<0.000000e+00> : vector<8x192xf32>
    %3 = tpu.matmul %1, %2, %cst {dimension_numbers = #tpu.dot_dimension_numbers<[1], [0], [0], [1], [0, 0, 1, 1], [], []>} : vector<8x192xbf16>, vector<192x192xbf16>, vector<8x192xf32> -> vector<8x192xf32>
    %c0_3 = arith.constant 0 : index
    %c0_4 = arith.constant 0 : index
    %4 = vector.load %arg3[%c0_3, %c0_4] : memref<1x192xf32, #tpu.memory_space<vmem>>, vector<1x192xf32>
    %5 = vector.broadcast %4 : vector<1x192xf32> to vector<8x192xf32>
    %6 = arith.addf %3, %5 : vector<8x192xf32>
    %c0_5 = arith.constant 0 : index
    %c0_6 = arith.constant 0 : index
    %7 = vector.load %arg4[%c0_5, %c0_6] : memref<1x192xf32, #tpu.memory_space<vmem>>, vector<1x192xf32>
    %c0_7 = arith.constant 0 : index
    %c0_8 = arith.constant 0 : index
    %8 = vector.load %arg5[%c0_7, %c0_8] : memref<5x192xf32, #tpu.memory_space<vmem>>, vector<1x192xf32>
    %9 = arith.addf %7, %8 : vector<1x192xf32>
    %c1 = arith.constant 1 : index
    %c0_9 = arith.constant 0 : index
    %10 = vector.load %arg5[%c1, %c0_9] : memref<5x192xf32, #tpu.memory_space<vmem>>, vector<4x192xf32>
    %11 = vector.extract_strided_slice %6 {offsets = [0, 0], sizes = [4, 192], strides = [1, 1]} : vector<8x192xf32> to vector<4x192xf32>
    %12 = arith.addf %11, %10 : vector<4x192xf32>
    %cst_10 = arith.constant 0.000000e+00 : f32
    %13 = vector.broadcast %cst_10 : f32 to vector<3x192xf32>
    %14 = vector.extract_strided_slice %6 {offsets = [4, 0], sizes = [4, 192], strides = [1, 1]} : vector<8x192xf32> to vector<4x192xf32>
    %15 = arith.addf %14, %10 : vector<4x192xf32>
    %cst_11 = arith.constant 0.000000e+00 : f32
    %16 = vector.broadcast %cst_11 : f32 to vector<3x192xf32>
    %17 = tpu.concatenate %9, %12, %13, %9, %15, %16 in 0 : vector<1x192xf32>, vector<4x192xf32>, vector<3x192xf32>, vector<1x192xf32>, vector<4x192xf32>, vector<3x192xf32> -> vector<16x192xf32>
    %c0_12 = arith.constant 0 : index
    %c0_13 = arith.constant 0 : index
    %18 = vector.load %arg6[%c0_12, %c0_13] : memref<16x192xf32, #tpu.memory_space<vmem>>, vector<16x192xf32>
    tpu.vector_store %arg6[%c0_12, %c0_13], %17 {strides = array<i32>} : memref<16x192xf32, #tpu.memory_space<vmem>>, vector<16x192xf32>,
    return
  }
  func.func @transform_0(%arg0: i32) -> (i32, i32) {
    %c0_i32 = arith.constant 0 : i32
    %c0_i32_0 = arith.constant 0 : i32
    %c0_i32_1 = arith.constant 0 : i32
    return %c0_i32, %c0_i32_0 : i32, i32
  }
  func.func @transform_1(%arg0: i32) -> (i32, i32) {
    %c0_i32 = arith.constant 0 : i32
    %c0_i32_0 = arith.constant 0 : i32
    %c0_i32_1 = arith.constant 0 : i32
    return %c0_i32, %c0_i32_0 : i32, i32
  }
  func.func @transform_2(%arg0: i32) -> (i32, i32) {
    %c0_i32 = arith.constant 0 : i32
    %c0_i32_0 = arith.constant 0 : i32
    %c0_i32_1 = arith.constant 0 : i32
    return %c0_i32, %c0_i32_0 : i32, i32
  }
  func.func @transform_3(%arg0: i32) -> (i32, i32) {
    %c0_i32 = arith.constant 0 : i32
    %c0_i32_0 = arith.constant 0 : i32
    %c0_i32_1 = arith.constant 0 : i32
    return %c0_i32, %c0_i32_0 : i32, i32
  }
  func.func @transform_4(%arg0: i32) -> (i32, i32) {
    %c0_i32 = arith.constant 0 : i32
    %c0_i32_0 = arith.constant 0 : i32
    %c0_i32_1 = arith.constant 0 : i32
    return %c0_i32, %c0_i32_0 : i32, i32
  }
  func.func @transform_5(%arg0: i32) -> (i32, i32) {
    %c0_i32 = arith.constant 0 : i32
    %c0_i32_0 = arith.constant 0 : i32
    %c0_i32_1 = arith.constant 0 : i32
    return %c0_i32, %c0_i32_0 : i32, i32
  }
}

module attributes {stable_mosaic.version = 11 : i64} {
  func.func @_stack_kernel(%arg0: i32, %arg1: memref<16x192xf32, #tpu.memory_space<vmem>>, %arg2: memref<1x1x192xf32, #tpu.memory_space<vmem>>, %arg3: memref<1x1x192xf32, #tpu.memory_space<vmem>>, %arg4: memref<1x192x576xbf16, #tpu.memory_space<vmem>>, %arg5: memref<1x1x576xf32, #tpu.memory_space<vmem>>, %arg6: memref<1x192x192xbf16, #tpu.memory_space<vmem>>, %arg7: memref<1x1x192xf32, #tpu.memory_space<vmem>>, %arg8: memref<1x1x192xf32, #tpu.memory_space<vmem>>, %arg9: memref<1x1x192xf32, #tpu.memory_space<vmem>>, %arg10: memref<1x192x768xbf16, #tpu.memory_space<vmem>>, %arg11: memref<1x1x768xf32, #tpu.memory_space<vmem>>, %arg12: memref<1x768x192xbf16, #tpu.memory_space<vmem>>, %arg13: memref<1x1x192xf32, #tpu.memory_space<vmem>>, %arg14: memref<16x192xf32, #tpu.memory_space<vmem>>) attributes {dimension_semantics = [#tpu.dimension_semantics<arbitrary>], iteration_bounds = array<i64: 12>, scalar_prefetch = 0 : i64, scratch_operands = 0 : i64, tpu.core_type = #tpu.core_type<tc>, window_params = [{pipeline_mode = #tpu.pipeline_mode<synchronous>, transform_indices = @transform_0, window_bounds = array<i64: 16, 192>}, {transform_indices = @transform_1, window_bounds = array<i64: 1, 1, 192>}, {transform_indices = @transform_2, window_bounds = array<i64: 1, 1, 192>}, {transform_indices = @transform_3, window_bounds = array<i64: 1, 192, 576>}, {transform_indices = @transform_4, window_bounds = array<i64: 1, 1, 576>}, {transform_indices = @transform_5, window_bounds = array<i64: 1, 192, 192>}, {transform_indices = @transform_6, window_bounds = array<i64: 1, 1, 192>}, {transform_indices = @transform_7, window_bounds = array<i64: 1, 1, 192>}, {transform_indices = @transform_8, window_bounds = array<i64: 1, 1, 192>}, {transform_indices = @transform_9, window_bounds = array<i64: 1, 192, 768>}, {transform_indices = @transform_10, window_bounds = array<i64: 1, 1, 768>}, {transform_indices = @transform_11, window_bounds = array<i64: 1, 768, 192>}, {transform_indices = @transform_12, window_bounds = array<i64: 1, 1, 192>}, {pipeline_mode = #tpu.pipeline_mode<synchronous>, transform_indices = @transform_13, window_bounds = array<i64: 16, 192>}]} {
    %c0_i32 = arith.constant 0 : i32
    %0 = arith.cmpi eq, %arg0, %c0_i32 : i32
    %1 = arith.extui %0 : i1 to i32
    %c0_i32_0 = arith.constant 0 : i32
    %2 = arith.cmpi ne, %1, %c0_i32_0 : i32
    scf.if %2 {
      %c0_92 = arith.constant 0 : index
      %c0_93 = arith.constant 0 : index
      %215 = vector.load %arg1[%c0_92, %c0_93] : memref<16x192xf32, #tpu.memory_space<vmem>>, vector<16x192xf32>
      %c0_94 = arith.constant 0 : index
      %c0_95 = arith.constant 0 : index
      %216 = vector.load %arg14[%c0_94, %c0_95] : memref<16x192xf32, #tpu.memory_space<vmem>>, vector<16x192xf32>
      tpu.vector_store %arg14[%c0_94, %c0_95], %215 {strides = array<i32>} : memref<16x192xf32, #tpu.memory_space<vmem>>, vector<16x192xf32>,
    } else {
    }
    %c0 = arith.constant 0 : index
    %c0_1 = arith.constant 0 : index
    %3 = vector.load %arg14[%c0, %c0_1] : memref<16x192xf32, #tpu.memory_space<vmem>>, vector<16x192xf32>
    %c0_2 = arith.constant 0 : index
    %c0_3 = arith.constant 0 : index
    %c0_4 = arith.constant 0 : index
    %4 = vector.load %arg2[%c0_2, %c0_3, %c0_4] : memref<1x1x192xf32, #tpu.memory_space<vmem>>, vector<1x1x192xf32>
    %5 = vector.shape_cast %4 : vector<1x1x192xf32> to vector<1x192xf32>
    %c0_5 = arith.constant 0 : index
    %c0_6 = arith.constant 0 : index
    %c0_7 = arith.constant 0 : index
    %6 = vector.load %arg3[%c0_5, %c0_6, %c0_7] : memref<1x1x192xf32, #tpu.memory_space<vmem>>, vector<1x1x192xf32>
    %7 = vector.shape_cast %6 : vector<1x1x192xf32> to vector<1x192xf32>
    %cst = arith.constant dense<0.000000e+00> : vector<16xf32>
    %8 = vector.multi_reduction <add>, %3, %cst [1] : vector<16x192xf32> to vector<16xf32>
    %9 = vector.shape_cast %8 : vector<16xf32> to vector<16x1xf32>
    %cst_8 = arith.constant 1.920000e+02 : f32
    %10 = vector.broadcast %cst_8 : f32 to vector<16x1xf32>
    %11 = arith.divf %9, %10 : vector<16x1xf32>
    %12 = vector.broadcast %11 : vector<16x1xf32> to vector<16x192xf32>
    %13 = arith.subf %3, %12 : vector<16x192xf32>
    %14 = arith.mulf %13, %13 : vector<16x192xf32>
    %cst_9 = arith.constant dense<0.000000e+00> : vector<16xf32>
    %15 = vector.multi_reduction <add>, %14, %cst_9 [1] : vector<16x192xf32> to vector<16xf32>
    %16 = vector.shape_cast %15 : vector<16xf32> to vector<16x1xf32>
    %cst_10 = arith.constant 1.920000e+02 : f32
    %17 = vector.broadcast %cst_10 : f32 to vector<16x1xf32>
    %18 = arith.divf %16, %17 : vector<16x1xf32>
    %cst_11 = arith.constant 9.99999997E-7 : f32
    %19 = vector.broadcast %cst_11 : f32 to vector<16x1xf32>
    %20 = arith.addf %18, %19 : vector<16x1xf32>
    %21 = math.rsqrt %20 : vector<16x1xf32>
    %22 = vector.broadcast %21 : vector<16x1xf32> to vector<16x192xf32>
    %23 = arith.mulf %13, %22 : vector<16x192xf32>
    %24 = vector.broadcast %5 : vector<1x192xf32> to vector<16x192xf32>
    %25 = arith.mulf %23, %24 : vector<16x192xf32>
    %26 = vector.broadcast %7 : vector<1x192xf32> to vector<16x192xf32>
    %27 = arith.addf %25, %26 : vector<16x192xf32>
    %28 = arith.truncf %27 : vector<16x192xf32> to vector<16x192xbf16>
    %c0_12 = arith.constant 0 : index
    %c0_13 = arith.constant 0 : index
    %c0_14 = arith.constant 0 : index
    %29 = vector.load %arg4[%c0_12, %c0_13, %c0_14] : memref<1x192x576xbf16, #tpu.memory_space<vmem>>, vector<1x192x576xbf16>
    %30 = vector.shape_cast %29 : vector<1x192x576xbf16> to vector<192x576xbf16>
    %cst_15 = arith.constant dense<0.000000e+00> : vector<16x576xf32>
    %31 = tpu.matmul %28, %30, %cst_15 {dimension_numbers = #tpu.dot_dimension_numbers<[1], [0], [0], [1], [0, 0, 1, 1], [], []>} : vector<16x192xbf16>, vector<192x576xbf16>, vector<16x576xf32> -> vector<16x576xf32>
    %c0_16 = arith.constant 0 : index
    %c0_17 = arith.constant 0 : index
    %c0_18 = arith.constant 0 : index
    %32 = vector.load %arg5[%c0_16, %c0_17, %c0_18] : memref<1x1x576xf32, #tpu.memory_space<vmem>>, vector<1x1x576xf32>
    %33 = vector.shape_cast %32 : vector<1x1x576xf32> to vector<1x576xf32>
    %34 = vector.broadcast %33 : vector<1x576xf32> to vector<16x576xf32>
    %35 = arith.addf %31, %34 : vector<16x576xf32>
    %36 = tpu.iota {dimensions = array<i32: 1>} : vector<8x8xi32>
    %c5_i32 = arith.constant 5 : i32
    %37 = vector.broadcast %c5_i32 : i32 to vector<8x8xi32>
    %38 = arith.cmpi slt, %36, %37 : vector<8x8xi32>
    %39 = vector.extract_strided_slice %35 {offsets = [0, 0], sizes = [8, 64], strides = [1, 1]} : vector<16x576xf32> to vector<8x64xf32>
    %40 = vector.extract_strided_slice %35 {offsets = [0, 192], sizes = [8, 64], strides = [1, 1]} : vector<16x576xf32> to vector<8x64xf32>
    %41 = vector.extract_strided_slice %35 {offsets = [0, 384], sizes = [8, 64], strides = [1, 1]} : vector<16x576xf32> to vector<8x64xf32>
    %cst_19 = arith.constant 1.250000e-01 : f32
    %42 = vector.broadcast %cst_19 : f32 to vector<8x64xf32>
    %43 = arith.mulf %39, %42 : vector<8x64xf32>
    %cst_20 = arith.constant dense<0.000000e+00> : vector<8x8xf32>
    %44 = tpu.matmul %43, %40, %cst_20 {dimension_numbers = #tpu.dot_dimension_numbers<[1], [1], [0], [0], [0, 0, 1, 0], [], []>} : vector<8x64xf32>, vector<8x64xf32>, vector<8x8xf32> -> vector<8x8xf32>
    %cst_21 = arith.constant -1.000000e+30 : f32
    %45 = vector.broadcast %cst_21 : f32 to vector<8x8xf32>
    %46 = arith.select %38, %44, %45 : vector<8x8xi1>, vector<8x8xf32>
    %cst_22 = arith.constant dense<0xFF800000> : vector<8xf32>
    %47 = vector.multi_reduction <maximumf>, %46, %cst_22 [1] : vector<8x8xf32> to vector<8xf32>
    %48 = vector.shape_cast %47 : vector<8xf32> to vector<8x1xf32>
    %49 = vector.broadcast %48 : vector<8x1xf32> to vector<8x8xf32>
    %50 = arith.subf %46, %49 : vector<8x8xf32>
    %51 = math.exp %50 : vector<8x8xf32>
    %cst_23 = arith.constant dense<0.000000e+00> : vector<8xf32>
    %52 = vector.multi_reduction <add>, %51, %cst_23 [1] : vector<8x8xf32> to vector<8xf32>
    %53 = vector.shape_cast %52 : vector<8xf32> to vector<8x1xf32>
    %54 = tpu.reciprocal %53 {approx = true} : vector<8x1xf32> -> vector<8x1xf32>
    %55 = vector.broadcast %54 : vector<8x1xf32> to vector<8x8xf32>
    %56 = arith.mulf %51, %55 : vector<8x8xf32>
    %cst_24 = arith.constant dense<0.000000e+00> : vector<8x64xf32>
    %57 = tpu.matmul %56, %41, %cst_24 {dimension_numbers = #tpu.dot_dimension_numbers<[1], [0], [0], [1], [0, 0, 1, 1], [], []>} : vector<8x8xf32>, vector<8x64xf32>, vector<8x64xf32> -> vector<8x64xf32>
    %58 = vector.extract_strided_slice %35 {offsets = [0, 64], sizes = [8, 64], strides = [1, 1]} : vector<16x576xf32> to vector<8x64xf32>
    %59 = vector.extract_strided_slice %35 {offsets = [0, 256], sizes = [8, 64], strides = [1, 1]} : vector<16x576xf32> to vector<8x64xf32>
    %60 = vector.extract_strided_slice %35 {offsets = [0, 448], sizes = [8, 64], strides = [1, 1]} : vector<16x576xf32> to vector<8x64xf32>
    %cst_25 = arith.constant 1.250000e-01 : f32
    %61 = vector.broadcast %cst_25 : f32 to vector<8x64xf32>
    %62 = arith.mulf %58, %61 : vector<8x64xf32>
    %cst_26 = arith.constant dense<0.000000e+00> : vector<8x8xf32>
    %63 = tpu.matmul %62, %59, %cst_26 {dimension_numbers = #tpu.dot_dimension_numbers<[1], [1], [0], [0], [0, 0, 1, 0], [], []>} : vector<8x64xf32>, vector<8x64xf32>, vector<8x8xf32> -> vector<8x8xf32>
    %cst_27 = arith.constant -1.000000e+30 : f32
    %64 = vector.broadcast %cst_27 : f32 to vector<8x8xf32>
    %65 = arith.select %38, %63, %64 : vector<8x8xi1>, vector<8x8xf32>
    %cst_28 = arith.constant dense<0xFF800000> : vector<8xf32>
    %66 = vector.multi_reduction <maximumf>, %65, %cst_28 [1] : vector<8x8xf32> to vector<8xf32>
    %67 = vector.shape_cast %66 : vector<8xf32> to vector<8x1xf32>
    %68 = vector.broadcast %67 : vector<8x1xf32> to vector<8x8xf32>
    %69 = arith.subf %65, %68 : vector<8x8xf32>
    %70 = math.exp %69 : vector<8x8xf32>
    %cst_29 = arith.constant dense<0.000000e+00> : vector<8xf32>
    %71 = vector.multi_reduction <add>, %70, %cst_29 [1] : vector<8x8xf32> to vector<8xf32>
    %72 = vector.shape_cast %71 : vector<8xf32> to vector<8x1xf32>
    %73 = tpu.reciprocal %72 {approx = true} : vector<8x1xf32> -> vector<8x1xf32>
    %74 = vector.broadcast %73 : vector<8x1xf32> to vector<8x8xf32>
    %75 = arith.mulf %70, %74 : vector<8x8xf32>
    %cst_30 = arith.constant dense<0.000000e+00> : vector<8x64xf32>
    %76 = tpu.matmul %75, %60, %cst_30 {dimension_numbers = #tpu.dot_dimension_numbers<[1], [0], [0], [1], [0, 0, 1, 1], [], []>} : vector<8x8xf32>, vector<8x64xf32>, vector<8x64xf32> -> vector<8x64xf32>
    %77 = vector.extract_strided_slice %35 {offsets = [0, 128], sizes = [8, 64], strides = [1, 1]} : vector<16x576xf32> to vector<8x64xf32>
    %78 = vector.extract_strided_slice %35 {offsets = [0, 320], sizes = [8, 64], strides = [1, 1]} : vector<16x576xf32> to vector<8x64xf32>
    %79 = vector.extract_strided_slice %35 {offsets = [0, 512], sizes = [8, 64], strides = [1, 1]} : vector<16x576xf32> to vector<8x64xf32>
    %cst_31 = arith.constant 1.250000e-01 : f32
    %80 = vector.broadcast %cst_31 : f32 to vector<8x64xf32>
    %81 = arith.mulf %77, %80 : vector<8x64xf32>
    %cst_32 = arith.constant dense<0.000000e+00> : vector<8x8xf32>
    %82 = tpu.matmul %81, %78, %cst_32 {dimension_numbers = #tpu.dot_dimension_numbers<[1], [1], [0], [0], [0, 0, 1, 0], [], []>} : vector<8x64xf32>, vector<8x64xf32>, vector<8x8xf32> -> vector<8x8xf32>
    %cst_33 = arith.constant -1.000000e+30 : f32
    %83 = vector.broadcast %cst_33 : f32 to vector<8x8xf32>
    %84 = arith.select %38, %82, %83 : vector<8x8xi1>, vector<8x8xf32>
    %cst_34 = arith.constant dense<0xFF800000> : vector<8xf32>
    %85 = vector.multi_reduction <maximumf>, %84, %cst_34 [1] : vector<8x8xf32> to vector<8xf32>
    %86 = vector.shape_cast %85 : vector<8xf32> to vector<8x1xf32>
    %87 = vector.broadcast %86 : vector<8x1xf32> to vector<8x8xf32>
    %88 = arith.subf %84, %87 : vector<8x8xf32>
    %89 = math.exp %88 : vector<8x8xf32>
    %cst_35 = arith.constant dense<0.000000e+00> : vector<8xf32>
    %90 = vector.multi_reduction <add>, %89, %cst_35 [1] : vector<8x8xf32> to vector<8xf32>
    %91 = vector.shape_cast %90 : vector<8xf32> to vector<8x1xf32>
    %92 = tpu.reciprocal %91 {approx = true} : vector<8x1xf32> -> vector<8x1xf32>
    %93 = vector.broadcast %92 : vector<8x1xf32> to vector<8x8xf32>
    %94 = arith.mulf %89, %93 : vector<8x8xf32>
    %cst_36 = arith.constant dense<0.000000e+00> : vector<8x64xf32>
    %95 = tpu.matmul %94, %79, %cst_36 {dimension_numbers = #tpu.dot_dimension_numbers<[1], [0], [0], [1], [0, 0, 1, 1], [], []>} : vector<8x8xf32>, vector<8x64xf32>, vector<8x64xf32> -> vector<8x64xf32>
    %96 = tpu.concatenate %57, %76, %95 in 1 : vector<8x64xf32>, vector<8x64xf32>, vector<8x64xf32> -> vector<8x192xf32>
    %97 = vector.extract_strided_slice %35 {offsets = [8, 0], sizes = [8, 64], strides = [1, 1]} : vector<16x576xf32> to vector<8x64xf32>
    %98 = vector.extract_strided_slice %35 {offsets = [8, 192], sizes = [8, 64], strides = [1, 1]} : vector<16x576xf32> to vector<8x64xf32>
    %99 = vector.extract_strided_slice %35 {offsets = [8, 384], sizes = [8, 64], strides = [1, 1]} : vector<16x576xf32> to vector<8x64xf32>
    %cst_37 = arith.constant 1.250000e-01 : f32
    %100 = vector.broadcast %cst_37 : f32 to vector<8x64xf32>
    %101 = arith.mulf %97, %100 : vector<8x64xf32>
    %cst_38 = arith.constant dense<0.000000e+00> : vector<8x8xf32>
    %102 = tpu.matmul %101, %98, %cst_38 {dimension_numbers = #tpu.dot_dimension_numbers<[1], [1], [0], [0], [0, 0, 1, 0], [], []>} : vector<8x64xf32>, vector<8x64xf32>, vector<8x8xf32> -> vector<8x8xf32>
    %cst_39 = arith.constant -1.000000e+30 : f32
    %103 = vector.broadcast %cst_39 : f32 to vector<8x8xf32>
    %104 = arith.select %38, %102, %103 : vector<8x8xi1>, vector<8x8xf32>
    %cst_40 = arith.constant dense<0xFF800000> : vector<8xf32>
    %105 = vector.multi_reduction <maximumf>, %104, %cst_40 [1] : vector<8x8xf32> to vector<8xf32>
    %106 = vector.shape_cast %105 : vector<8xf32> to vector<8x1xf32>
    %107 = vector.broadcast %106 : vector<8x1xf32> to vector<8x8xf32>
    %108 = arith.subf %104, %107 : vector<8x8xf32>
    %109 = math.exp %108 : vector<8x8xf32>
    %cst_41 = arith.constant dense<0.000000e+00> : vector<8xf32>
    %110 = vector.multi_reduction <add>, %109, %cst_41 [1] : vector<8x8xf32> to vector<8xf32>
    %111 = vector.shape_cast %110 : vector<8xf32> to vector<8x1xf32>
    %112 = tpu.reciprocal %111 {approx = true} : vector<8x1xf32> -> vector<8x1xf32>
    %113 = vector.broadcast %112 : vector<8x1xf32> to vector<8x8xf32>
    %114 = arith.mulf %109, %113 : vector<8x8xf32>
    %cst_42 = arith.constant dense<0.000000e+00> : vector<8x64xf32>
    %115 = tpu.matmul %114, %99, %cst_42 {dimension_numbers = #tpu.dot_dimension_numbers<[1], [0], [0], [1], [0, 0, 1, 1], [], []>} : vector<8x8xf32>, vector<8x64xf32>, vector<8x64xf32> -> vector<8x64xf32>
    %116 = vector.extract_strided_slice %35 {offsets = [8, 64], sizes = [8, 64], strides = [1, 1]} : vector<16x576xf32> to vector<8x64xf32>
    %117 = vector.extract_strided_slice %35 {offsets = [8, 256], sizes = [8, 64], strides = [1, 1]} : vector<16x576xf32> to vector<8x64xf32>
    %118 = vector.extract_strided_slice %35 {offsets = [8, 448], sizes = [8, 64], strides = [1, 1]} : vector<16x576xf32> to vector<8x64xf32>
    %cst_43 = arith.constant 1.250000e-01 : f32
    %119 = vector.broadcast %cst_43 : f32 to vector<8x64xf32>
    %120 = arith.mulf %116, %119 : vector<8x64xf32>
    %cst_44 = arith.constant dense<0.000000e+00> : vector<8x8xf32>
    %121 = tpu.matmul %120, %117, %cst_44 {dimension_numbers = #tpu.dot_dimension_numbers<[1], [1], [0], [0], [0, 0, 1, 0], [], []>} : vector<8x64xf32>, vector<8x64xf32>, vector<8x8xf32> -> vector<8x8xf32>
    %cst_45 = arith.constant -1.000000e+30 : f32
    %122 = vector.broadcast %cst_45 : f32 to vector<8x8xf32>
    %123 = arith.select %38, %121, %122 : vector<8x8xi1>, vector<8x8xf32>
    %cst_46 = arith.constant dense<0xFF800000> : vector<8xf32>
    %124 = vector.multi_reduction <maximumf>, %123, %cst_46 [1] : vector<8x8xf32> to vector<8xf32>
    %125 = vector.shape_cast %124 : vector<8xf32> to vector<8x1xf32>
    %126 = vector.broadcast %125 : vector<8x1xf32> to vector<8x8xf32>
    %127 = arith.subf %123, %126 : vector<8x8xf32>
    %128 = math.exp %127 : vector<8x8xf32>
    %cst_47 = arith.constant dense<0.000000e+00> : vector<8xf32>
    %129 = vector.multi_reduction <add>, %128, %cst_47 [1] : vector<8x8xf32> to vector<8xf32>
    %130 = vector.shape_cast %129 : vector<8xf32> to vector<8x1xf32>
    %131 = tpu.reciprocal %130 {approx = true} : vector<8x1xf32> -> vector<8x1xf32>
    %132 = vector.broadcast %131 : vector<8x1xf32> to vector<8x8xf32>
    %133 = arith.mulf %128, %132 : vector<8x8xf32>
    %cst_48 = arith.constant dense<0.000000e+00> : vector<8x64xf32>
    %134 = tpu.matmul %133, %118, %cst_48 {dimension_numbers = #tpu.dot_dimension_numbers<[1], [0], [0], [1], [0, 0, 1, 1], [], []>} : vector<8x8xf32>, vector<8x64xf32>, vector<8x64xf32> -> vector<8x64xf32>
    %135 = vector.extract_strided_slice %35 {offsets = [8, 128], sizes = [8, 64], strides = [1, 1]} : vector<16x576xf32> to vector<8x64xf32>
    %136 = vector.extract_strided_slice %35 {offsets = [8, 320], sizes = [8, 64], strides = [1, 1]} : vector<16x576xf32> to vector<8x64xf32>
    %137 = vector.extract_strided_slice %35 {offsets = [8, 512], sizes = [8, 64], strides = [1, 1]} : vector<16x576xf32> to vector<8x64xf32>
    %cst_49 = arith.constant 1.250000e-01 : f32
    %138 = vector.broadcast %cst_49 : f32 to vector<8x64xf32>
    %139 = arith.mulf %135, %138 : vector<8x64xf32>
    %cst_50 = arith.constant dense<0.000000e+00> : vector<8x8xf32>
    %140 = tpu.matmul %139, %136, %cst_50 {dimension_numbers = #tpu.dot_dimension_numbers<[1], [1], [0], [0], [0, 0, 1, 0], [], []>} : vector<8x64xf32>, vector<8x64xf32>, vector<8x8xf32> -> vector<8x8xf32>
    %cst_51 = arith.constant -1.000000e+30 : f32
    %141 = vector.broadcast %cst_51 : f32 to vector<8x8xf32>
    %142 = arith.select %38, %140, %141 : vector<8x8xi1>, vector<8x8xf32>
    %cst_52 = arith.constant dense<0xFF800000> : vector<8xf32>
    %143 = vector.multi_reduction <maximumf>, %142, %cst_52 [1] : vector<8x8xf32> to vector<8xf32>
    %144 = vector.shape_cast %143 : vector<8xf32> to vector<8x1xf32>
    %145 = vector.broadcast %144 : vector<8x1xf32> to vector<8x8xf32>
    %146 = arith.subf %142, %145 : vector<8x8xf32>
    %147 = math.exp %146 : vector<8x8xf32>
    %cst_53 = arith.constant dense<0.000000e+00> : vector<8xf32>
    %148 = vector.multi_reduction <add>, %147, %cst_53 [1] : vector<8x8xf32> to vector<8xf32>
    %149 = vector.shape_cast %148 : vector<8xf32> to vector<8x1xf32>
    %150 = tpu.reciprocal %149 {approx = true} : vector<8x1xf32> -> vector<8x1xf32>
    %151 = vector.broadcast %150 : vector<8x1xf32> to vector<8x8xf32>
    %152 = arith.mulf %147, %151 : vector<8x8xf32>
    %cst_54 = arith.constant dense<0.000000e+00> : vector<8x64xf32>
    %153 = tpu.matmul %152, %137, %cst_54 {dimension_numbers = #tpu.dot_dimension_numbers<[1], [0], [0], [1], [0, 0, 1, 1], [], []>} : vector<8x8xf32>, vector<8x64xf32>, vector<8x64xf32> -> vector<8x64xf32>
    %154 = tpu.concatenate %115, %134, %153 in 1 : vector<8x64xf32>, vector<8x64xf32>, vector<8x64xf32> -> vector<8x192xf32>
    %155 = tpu.concatenate %96, %154 in 0 : vector<8x192xf32>, vector<8x192xf32> -> vector<16x192xf32>
    %156 = arith.truncf %155 : vector<16x192xf32> to vector<16x192xbf16>
    %c0_55 = arith.constant 0 : index
    %c0_56 = arith.constant 0 : index
    %c0_57 = arith.constant 0 : index
    %157 = vector.load %arg6[%c0_55, %c0_56, %c0_57] : memref<1x192x192xbf16, #tpu.memory_space<vmem>>, vector<1x192x192xbf16>
    %158 = vector.shape_cast %157 : vector<1x192x192xbf16> to vector<192x192xbf16>
    %cst_58 = arith.constant dense<0.000000e+00> : vector<16x192xf32>
    %159 = tpu.matmul %156, %158, %cst_58 {dimension_numbers = #tpu.dot_dimension_numbers<[1], [0], [0], [1], [0, 0, 1, 1], [], []>} : vector<16x192xbf16>, vector<192x192xbf16>, vector<16x192xf32> -> vector<16x192xf32>
    %c0_59 = arith.constant 0 : index
    %c0_60 = arith.constant 0 : index
    %c0_61 = arith.constant 0 : index
    %160 = vector.load %arg7[%c0_59, %c0_60, %c0_61] : memref<1x1x192xf32, #tpu.memory_space<vmem>>, vector<1x1x192xf32>
    %161 = vector.shape_cast %160 : vector<1x1x192xf32> to vector<1x192xf32>
    %162 = vector.broadcast %161 : vector<1x192xf32> to vector<16x192xf32>
    %163 = arith.addf %159, %162 : vector<16x192xf32>
    %164 = arith.addf %3, %163 : vector<16x192xf32>
    %c0_62 = arith.constant 0 : index
    %c0_63 = arith.constant 0 : index
    %c0_64 = arith.constant 0 : index
    %165 = vector.load %arg8[%c0_62, %c0_63, %c0_64] : memref<1x1x192xf32, #tpu.memory_space<vmem>>, vector<1x1x192xf32>
    %166 = vector.shape_cast %165 : vector<1x1x192xf32> to vector<1x192xf32>
    %c0_65 = arith.constant 0 : index
    %c0_66 = arith.constant 0 : index
    %c0_67 = arith.constant 0 : index
    %167 = vector.load %arg9[%c0_65, %c0_66, %c0_67] : memref<1x1x192xf32, #tpu.memory_space<vmem>>, vector<1x1x192xf32>
    %168 = vector.shape_cast %167 : vector<1x1x192xf32> to vector<1x192xf32>
    %cst_68 = arith.constant dense<0.000000e+00> : vector<16xf32>
    %169 = vector.multi_reduction <add>, %164, %cst_68 [1] : vector<16x192xf32> to vector<16xf32>
    %170 = vector.shape_cast %169 : vector<16xf32> to vector<16x1xf32>
    %cst_69 = arith.constant 1.920000e+02 : f32
    %171 = vector.broadcast %cst_69 : f32 to vector<16x1xf32>
    %172 = arith.divf %170, %171 : vector<16x1xf32>
    %173 = vector.broadcast %172 : vector<16x1xf32> to vector<16x192xf32>
    %174 = arith.subf %164, %173 : vector<16x192xf32>
    %175 = arith.mulf %174, %174 : vector<16x192xf32>
    %cst_70 = arith.constant dense<0.000000e+00> : vector<16xf32>
    %176 = vector.multi_reduction <add>, %175, %cst_70 [1] : vector<16x192xf32> to vector<16xf32>
    %177 = vector.shape_cast %176 : vector<16xf32> to vector<16x1xf32>
    %cst_71 = arith.constant 1.920000e+02 : f32
    %178 = vector.broadcast %cst_71 : f32 to vector<16x1xf32>
    %179 = arith.divf %177, %178 : vector<16x1xf32>
    %cst_72 = arith.constant 9.99999997E-7 : f32
    %180 = vector.broadcast %cst_72 : f32 to vector<16x1xf32>
    %181 = arith.addf %179, %180 : vector<16x1xf32>
    %182 = math.rsqrt %181 : vector<16x1xf32>
    %183 = vector.broadcast %182 : vector<16x1xf32> to vector<16x192xf32>
    %184 = arith.mulf %174, %183 : vector<16x192xf32>
    %185 = vector.broadcast %166 : vector<1x192xf32> to vector<16x192xf32>
    %186 = arith.mulf %184, %185 : vector<16x192xf32>
    %187 = vector.broadcast %168 : vector<1x192xf32> to vector<16x192xf32>
    %188 = arith.addf %186, %187 : vector<16x192xf32>
    %189 = arith.truncf %188 : vector<16x192xf32> to vector<16x192xbf16>
    %c0_73 = arith.constant 0 : index
    %c0_74 = arith.constant 0 : index
    %c0_75 = arith.constant 0 : index
    %190 = vector.load %arg10[%c0_73, %c0_74, %c0_75] : memref<1x192x768xbf16, #tpu.memory_space<vmem>>, vector<1x192x768xbf16>
    %191 = vector.shape_cast %190 : vector<1x192x768xbf16> to vector<192x768xbf16>
    %cst_76 = arith.constant dense<0.000000e+00> : vector<16x768xf32>
    %192 = tpu.matmul %189, %191, %cst_76 {dimension_numbers = #tpu.dot_dimension_numbers<[1], [0], [0], [1], [0, 0, 1, 1], [], []>} : vector<16x192xbf16>, vector<192x768xbf16>, vector<16x768xf32> -> vector<16x768xf32>
    %c0_77 = arith.constant 0 : index
    %c0_78 = arith.constant 0 : index
    %c0_79 = arith.constant 0 : index
    %193 = vector.load %arg11[%c0_77, %c0_78, %c0_79] : memref<1x1x768xf32, #tpu.memory_space<vmem>>, vector<1x1x768xf32>
    %194 = vector.shape_cast %193 : vector<1x1x768xf32> to vector<1x768xf32>
    %195 = vector.broadcast %194 : vector<1x768xf32> to vector<16x768xf32>
    %196 = arith.addf %192, %195 : vector<16x768xf32>
    %cst_80 = arith.constant 5.000000e-01 : f32
    %197 = vector.broadcast %cst_80 : f32 to vector<16x768xf32>
    %198 = arith.mulf %197, %196 : vector<16x768xf32>
    %cst_81 = arith.constant 0.707106769 : f32
    %199 = vector.broadcast %cst_81 : f32 to vector<16x768xf32>
    %200 = arith.mulf %196, %199 : vector<16x768xf32>
    %201 = math.erf %200 : vector<16x768xf32>
    %cst_82 = arith.constant 1.000000e+00 : f32
    %202 = vector.broadcast %cst_82 : f32 to vector<16x768xf32>
    %203 = arith.addf %202, %201 : vector<16x768xf32>
    %204 = arith.mulf %198, %203 : vector<16x768xf32>
    %205 = arith.truncf %204 : vector<16x768xf32> to vector<16x768xbf16>
    %c0_83 = arith.constant 0 : index
    %c0_84 = arith.constant 0 : index
    %c0_85 = arith.constant 0 : index
    %206 = vector.load %arg12[%c0_83, %c0_84, %c0_85] : memref<1x768x192xbf16, #tpu.memory_space<vmem>>, vector<1x768x192xbf16>
    %207 = vector.shape_cast %206 : vector<1x768x192xbf16> to vector<768x192xbf16>
    %cst_86 = arith.constant dense<0.000000e+00> : vector<16x192xf32>
    %208 = tpu.matmul %205, %207, %cst_86 {dimension_numbers = #tpu.dot_dimension_numbers<[1], [0], [0], [1], [0, 0, 1, 1], [], []>} : vector<16x768xbf16>, vector<768x192xbf16>, vector<16x192xf32> -> vector<16x192xf32>
    %c0_87 = arith.constant 0 : index
    %c0_88 = arith.constant 0 : index
    %c0_89 = arith.constant 0 : index
    %209 = vector.load %arg13[%c0_87, %c0_88, %c0_89] : memref<1x1x192xf32, #tpu.memory_space<vmem>>, vector<1x1x192xf32>
    %210 = vector.shape_cast %209 : vector<1x1x192xf32> to vector<1x192xf32>
    %211 = vector.broadcast %210 : vector<1x192xf32> to vector<16x192xf32>
    %212 = arith.addf %208, %211 : vector<16x192xf32>
    %213 = arith.addf %164, %212 : vector<16x192xf32>
    %c0_90 = arith.constant 0 : index
    %c0_91 = arith.constant 0 : index
    %214 = vector.load %arg14[%c0_90, %c0_91] : memref<16x192xf32, #tpu.memory_space<vmem>>, vector<16x192xf32>
    tpu.vector_store %arg14[%c0_90, %c0_91], %213 {strides = array<i32>} : memref<16x192xf32, #tpu.memory_space<vmem>>, vector<16x192xf32>,
    return
  }
  func.func @transform_0(%arg0: i32) -> (i32, i32) {
    %c0_i32 = arith.constant 0 : i32
    %c0_i32_0 = arith.constant 0 : i32
    %c0_i32_1 = arith.constant 0 : i32
    return %c0_i32, %c0_i32_0 : i32, i32
  }
  func.func @transform_1(%arg0: i32) -> (i32, i32, i32) {
    %c0_i32 = arith.constant 0 : i32
    %c0_i32_0 = arith.constant 0 : i32
    %c0_i32_1 = arith.constant 0 : i32
    return %arg0, %c0_i32, %c0_i32_0 : i32, i32, i32
  }
  func.func @transform_2(%arg0: i32) -> (i32, i32, i32) {
    %c0_i32 = arith.constant 0 : i32
    %c0_i32_0 = arith.constant 0 : i32
    %c0_i32_1 = arith.constant 0 : i32
    return %arg0, %c0_i32, %c0_i32_0 : i32, i32, i32
  }
  func.func @transform_3(%arg0: i32) -> (i32, i32, i32) {
    %c0_i32 = arith.constant 0 : i32
    %c0_i32_0 = arith.constant 0 : i32
    %c0_i32_1 = arith.constant 0 : i32
    return %arg0, %c0_i32, %c0_i32_0 : i32, i32, i32
  }
  func.func @transform_4(%arg0: i32) -> (i32, i32, i32) {
    %c0_i32 = arith.constant 0 : i32
    %c0_i32_0 = arith.constant 0 : i32
    %c0_i32_1 = arith.constant 0 : i32
    return %arg0, %c0_i32, %c0_i32_0 : i32, i32, i32
  }
  func.func @transform_5(%arg0: i32) -> (i32, i32, i32) {
    %c0_i32 = arith.constant 0 : i32
    %c0_i32_0 = arith.constant 0 : i32
    %c0_i32_1 = arith.constant 0 : i32
    return %arg0, %c0_i32, %c0_i32_0 : i32, i32, i32
  }
  func.func @transform_6(%arg0: i32) -> (i32, i32, i32) {
    %c0_i32 = arith.constant 0 : i32
    %c0_i32_0 = arith.constant 0 : i32
    %c0_i32_1 = arith.constant 0 : i32
    return %arg0, %c0_i32, %c0_i32_0 : i32, i32, i32
  }
  func.func @transform_7(%arg0: i32) -> (i32, i32, i32) {
    %c0_i32 = arith.constant 0 : i32
    %c0_i32_0 = arith.constant 0 : i32
    %c0_i32_1 = arith.constant 0 : i32
    return %arg0, %c0_i32, %c0_i32_0 : i32, i32, i32
  }
  func.func @transform_8(%arg0: i32) -> (i32, i32, i32) {
    %c0_i32 = arith.constant 0 : i32
    %c0_i32_0 = arith.constant 0 : i32
    %c0_i32_1 = arith.constant 0 : i32
    return %arg0, %c0_i32, %c0_i32_0 : i32, i32, i32
  }
  func.func @transform_9(%arg0: i32) -> (i32, i32, i32) {
    %c0_i32 = arith.constant 0 : i32
    %c0_i32_0 = arith.constant 0 : i32
    %c0_i32_1 = arith.constant 0 : i32
    return %arg0, %c0_i32, %c0_i32_0 : i32, i32, i32
  }
  func.func @transform_10(%arg0: i32) -> (i32, i32, i32) {
    %c0_i32 = arith.constant 0 : i32
    %c0_i32_0 = arith.constant 0 : i32
    %c0_i32_1 = arith.constant 0 : i32
    return %arg0, %c0_i32, %c0_i32_0 : i32, i32, i32
  }
  func.func @transform_11(%arg0: i32) -> (i32, i32, i32) {
    %c0_i32 = arith.constant 0 : i32
    %c0_i32_0 = arith.constant 0 : i32
    %c0_i32_1 = arith.constant 0 : i32
    return %arg0, %c0_i32, %c0_i32_0 : i32, i32, i32
  }
  func.func @transform_12(%arg0: i32) -> (i32, i32, i32) {
    %c0_i32 = arith.constant 0 : i32
    %c0_i32_0 = arith.constant 0 : i32
    %c0_i32_1 = arith.constant 0 : i32
    return %arg0, %c0_i32, %c0_i32_0 : i32, i32, i32
  }
  func.func @transform_13(%arg0: i32) -> (i32, i32) {
    %c0_i32 = arith.constant 0 : i32
    %c0_i32_0 = arith.constant 0 : i32
    %c0_i32_1 = arith.constant 0 : i32
    return %c0_i32, %c0_i32_0 : i32, i32
  }
}

module attributes {stable_mosaic.version = 11 : i64} {
  func.func @_head_kernel(%arg0: i32, %arg1: memref<2x192xf32, #tpu.memory_space<vmem>>, %arg2: memref<1x192xf32, #tpu.memory_space<vmem>>, %arg3: memref<1x192xf32, #tpu.memory_space<vmem>>, %arg4: memref<192x10xbf16, #tpu.memory_space<vmem>>, %arg5: memref<1x10xf32, #tpu.memory_space<vmem>>, %arg6: memref<2x10xf32, #tpu.memory_space<vmem>>) attributes {dimension_semantics = [#tpu.dimension_semantics<arbitrary>], iteration_bounds = array<i64: 1>, scalar_prefetch = 0 : i64, scratch_operands = 0 : i64, tpu.core_type = #tpu.core_type<tc>, window_params = [{pipeline_mode = #tpu.pipeline_mode<synchronous>, transform_indices = @transform_0, window_bounds = array<i64: 2, 192>}, {pipeline_mode = #tpu.pipeline_mode<synchronous>, transform_indices = @transform_1, window_bounds = array<i64: 1, 192>}, {pipeline_mode = #tpu.pipeline_mode<synchronous>, transform_indices = @transform_2, window_bounds = array<i64: 1, 192>}, {pipeline_mode = #tpu.pipeline_mode<synchronous>, transform_indices = @transform_3, window_bounds = array<i64: 192, 10>}, {pipeline_mode = #tpu.pipeline_mode<synchronous>, transform_indices = @transform_4, window_bounds = array<i64: 1, 10>}, {pipeline_mode = #tpu.pipeline_mode<synchronous>, transform_indices = @transform_5, window_bounds = array<i64: 2, 10>}]} {
    %c0 = arith.constant 0 : index
    %c0_0 = arith.constant 0 : index
    %0 = vector.load %arg1[%c0, %c0_0] : memref<2x192xf32, #tpu.memory_space<vmem>>, vector<2x192xf32>
    %c0_1 = arith.constant 0 : index
    %c0_2 = arith.constant 0 : index
    %1 = vector.load %arg2[%c0_1, %c0_2] : memref<1x192xf32, #tpu.memory_space<vmem>>, vector<1x192xf32>
    %c0_3 = arith.constant 0 : index
    %c0_4 = arith.constant 0 : index
    %2 = vector.load %arg3[%c0_3, %c0_4] : memref<1x192xf32, #tpu.memory_space<vmem>>, vector<1x192xf32>
    %cst = arith.constant dense<0.000000e+00> : vector<2xf32>
    %3 = vector.multi_reduction <add>, %0, %cst [1] : vector<2x192xf32> to vector<2xf32>
    %4 = vector.shape_cast %3 : vector<2xf32> to vector<2x1xf32>
    %cst_5 = arith.constant 1.920000e+02 : f32
    %5 = vector.broadcast %cst_5 : f32 to vector<2x1xf32>
    %6 = arith.divf %4, %5 : vector<2x1xf32>
    %7 = vector.broadcast %6 : vector<2x1xf32> to vector<2x192xf32>
    %8 = arith.subf %0, %7 : vector<2x192xf32>
    %9 = arith.mulf %8, %8 : vector<2x192xf32>
    %cst_6 = arith.constant dense<0.000000e+00> : vector<2xf32>
    %10 = vector.multi_reduction <add>, %9, %cst_6 [1] : vector<2x192xf32> to vector<2xf32>
    %11 = vector.shape_cast %10 : vector<2xf32> to vector<2x1xf32>
    %cst_7 = arith.constant 1.920000e+02 : f32
    %12 = vector.broadcast %cst_7 : f32 to vector<2x1xf32>
    %13 = arith.divf %11, %12 : vector<2x1xf32>
    %cst_8 = arith.constant 9.99999997E-7 : f32
    %14 = vector.broadcast %cst_8 : f32 to vector<2x1xf32>
    %15 = arith.addf %13, %14 : vector<2x1xf32>
    %16 = math.rsqrt %15 : vector<2x1xf32>
    %17 = vector.broadcast %16 : vector<2x1xf32> to vector<2x192xf32>
    %18 = arith.mulf %8, %17 : vector<2x192xf32>
    %19 = vector.broadcast %1 : vector<1x192xf32> to vector<2x192xf32>
    %20 = arith.mulf %18, %19 : vector<2x192xf32>
    %21 = vector.broadcast %2 : vector<1x192xf32> to vector<2x192xf32>
    %22 = arith.addf %20, %21 : vector<2x192xf32>
    %23 = arith.truncf %22 : vector<2x192xf32> to vector<2x192xbf16>
    %c0_9 = arith.constant 0 : index
    %c0_10 = arith.constant 0 : index
    %24 = vector.load %arg4[%c0_9, %c0_10] : memref<192x10xbf16, #tpu.memory_space<vmem>>, vector<192x10xbf16>
    %cst_11 = arith.constant dense<0.000000e+00> : vector<2x10xf32>
    %25 = tpu.matmul %23, %24, %cst_11 {dimension_numbers = #tpu.dot_dimension_numbers<[1], [0], [0], [1], [0, 0, 1, 1], [], []>} : vector<2x192xbf16>, vector<192x10xbf16>, vector<2x10xf32> -> vector<2x10xf32>
    %c0_12 = arith.constant 0 : index
    %c0_13 = arith.constant 0 : index
    %26 = vector.load %arg5[%c0_12, %c0_13] : memref<1x10xf32, #tpu.memory_space<vmem>>, vector<1x10xf32>
    %27 = vector.broadcast %26 : vector<1x10xf32> to vector<2x10xf32>
    %28 = arith.addf %25, %27 : vector<2x10xf32>
    %c0_14 = arith.constant 0 : index
    %c0_15 = arith.constant 0 : index
    %29 = vector.load %arg6[%c0_14, %c0_15] : memref<2x10xf32, #tpu.memory_space<vmem>>, vector<2x10xf32>
    tpu.vector_store %arg6[%c0_14, %c0_15], %28 {strides = array<i32>} : memref<2x10xf32, #tpu.memory_space<vmem>>, vector<2x10xf32>,
    return
  }
  func.func @transform_0(%arg0: i32) -> (i32, i32) {
    %c0_i32 = arith.constant 0 : i32
    %c0_i32_0 = arith.constant 0 : i32
    %c0_i32_1 = arith.constant 0 : i32
    return %c0_i32, %c0_i32_0 : i32, i32
  }
  func.func @transform_1(%arg0: i32) -> (i32, i32) {
    %c0_i32 = arith.constant 0 : i32
    %c0_i32_0 = arith.constant 0 : i32
    %c0_i32_1 = arith.constant 0 : i32
    return %c0_i32, %c0_i32_0 : i32, i32
  }
  func.func @transform_2(%arg0: i32) -> (i32, i32) {
    %c0_i32 = arith.constant 0 : i32
    %c0_i32_0 = arith.constant 0 : i32
    %c0_i32_1 = arith.constant 0 : i32
    return %c0_i32, %c0_i32_0 : i32, i32
  }
  func.func @transform_3(%arg0: i32) -> (i32, i32) {
    %c0_i32 = arith.constant 0 : i32
    %c0_i32_0 = arith.constant 0 : i32
    %c0_i32_1 = arith.constant 0 : i32
    return %c0_i32, %c0_i32_0 : i32, i32
  }
  func.func @transform_4(%arg0: i32) -> (i32, i32) {
    %c0_i32 = arith.constant 0 : i32
    %c0_i32_0 = arith.constant 0 : i32
    %c0_i32_1 = arith.constant 0 : i32
    return %c0_i32, %c0_i32_0 : i32, i32
  }
  func.func @transform_5(%arg0: i32) -> (i32, i32) {
    %c0_i32 = arith.constant 0 : i32
    %c0_i32_0 = arith.constant 0 : i32
    %c0_i32_1 = arith.constant 0 : i32
    return %c0_i32, %c0_i32_0 : i32, i32
  }
}

</mosaic_0001>

<bundles_post_ra>
// kernel: tiny_vit_forward.3
= control target key start
LH: loop header
LB: loop body
LE: loop exit
PB: predicated region body
PF: predicated region fallthrough
CT: control target
= control target key end

     0   :  { %10 = vsyncpa [#allocation3], 0  ;;  %s611_s0 = inlined_call_operand.vmem [shape: f32[8,192], index: 0, kind: input, shape index: {}]   ;;  %s612_s1 = inlined_call_operand.hbm [shape: bf16[192,192], index: 1, kind: input, shape index: {}]   ;;  %s613_s2 = inlined_call_operand.hbm [shape: f32[1,192], index: 2, kind: input, shape index: {}]   ;;  %s614_s3 = inlined_call_operand.hbm [shape: f32[1,192], index: 3, kind: input, shape index: {}]   ;;  %s615_s4 = inlined_call_operand.hbm [shape: f32[5,192], index: 4, kind: input, shape index: {}]   ;;  %s616_s5 = inlined_call_operand.vmem [shape: f32[16,192], index: 5, kind: output, shape index: {}]  }
   0x1   :  { %11 = vsyncpa [#allocation5], 0 }
   0x2   :  { %12 = vsyncpa [#allocation8], 0  ;;  %s499_s18 = smov [#allocation4]   ;;  %s500_s20 = smov [#allocation2]  }
   0x3   :  { %s33_s19 = sshll.u32 %s499_s18, 4  ;;  %s20_s21 = sshll.u32 %s500_s20, 4  ;;  %s34_s19 = int_to_ptr.vmem [resolvable:$true] %s33_s19  ;;  %s535_s21 = int_to_ptr.vmem [resolvable:$true] %s20_s21 }
   0x4   :  { %s405_s24 = scalar_lea.hbm %s613_s2, 32 }
   0x5   :  { %p406_p0 = scmp.ne.s32.totalorder %s613_s2, %s405_s24  ;;  %p409_p1 = scmp.lt.u32.totalorder %s405_s24, %s613_s2 }
   0x7   :  { %p411_p2 = pnand %p409_p1, %p406_p0 }
   0x9   :  { %414 = shalt.err (!%p411_p2)
}
   0xa   :  { %s415_s29 = scalar_lea.vmem %s34_s19, 32  ;;  %p420_p4 = scmp.lt.s32.totalorder %s34_s19, %s34_s19 }
   0xb   :  { %p416_p3 = scmp.ne.s32.totalorder %s34_s19, %s415_s29  ;;  %p421_p5 = scmp.lt.s32.totalorder %s415_s29, %s415_s29 }
   0xd   :  { %p422_p6 = por %p421_p5, %p420_p4 }
   0xf   :  { %p423_p7 = pnand %p422_p6, %p416_p3 }
  0x11   :  { %426 = shalt.err (!%p423_p7)
}
  0x12   :  { %36 = dma.hbm_to_vmem [thread:$0]  %s613_s2, 32, %s34_s19, [#allocation5]  }
  0x13   :  { %s427_s9 = scalar_lea.hbm %s612_s1, 3072 }
  0x14   :  { %p428_p8 = scmp.ne.s32.totalorder %s612_s1, %s427_s9  ;;  %p431_p9 = scmp.lt.u32.totalorder %s427_s9, %s612_s1 }
  0x16   :  { %p433_p10 = pnand %p431_p9, %p428_p8 }
  0x18   :  { %436 = shalt.err (!%p433_p10)
}
  0x19   :  { %s437_s14 = scalar_lea.vmem %s535_s21, 3072  ;;  %p442_p12 = scmp.lt.s32.totalorder %s535_s21, %s535_s21 }
  0x1a   :  { %p438_p11 = scmp.ne.s32.totalorder %s535_s21, %s437_s14  ;;  %p443_p13 = scmp.lt.s32.totalorder %s437_s14, %s437_s14 }
  0x1c   :  { %p444_p0 = por %p443_p13, %p442_p12 }
  0x1e   :  { %p445_p1 = pnand %p444_p0, %p438_p11 }
  0x20   :  { %448 = shalt.err (!%p445_p1)
}
  0x21   :  { %s501_s2 = smov 128   ;;  %s502_s15 = smov 8  }
  0x22   :  { %26 = dma.hbm_to_vmem [thread:$0]  %s612_s1, 3072, %s535_s21, [#allocation3], %s501_s2, %s501_s2, %s502_s15  }
  0x23   :  { %s503_s18 = smov [#allocation6]   ;;  %s504_s20 = smov [#allocation7]  }
  0x24   :  { %s43_s19 = sshll.u32 %s503_s18, 4  ;;  %s53_s22 = sshll.u32 %s504_s20, 4  ;;  %s44_s19 = int_to_ptr.vmem [resolvable:$true] %s43_s19  ;;  %s54_s22 = int_to_ptr.vmem [resolvable:$true] %s53_s22 }
  0x25   :  { %s449_s25 = scalar_lea.hbm %s614_s3, 32 }
  0x26   :  { %p450_p2 = scmp.ne.s32.totalorder %s614_s3, %s449_s25  ;;  %p453_p3 = scmp.lt.u32.totalorder %s449_s25, %s614_s3 }
  0x28   :  { %p455_p4 = pnand %p453_p3, %p450_p2 }
  0x2a   :  { %458 = shalt.err (!%p455_p4)
}
  0x2b   :  { %s459_s1 = scalar_lea.vmem %s44_s19, 32  ;;  %p464_p6 = scmp.lt.s32.totalorder %s44_s19, %s44_s19 }
  0x2c   :  { %p460_p5 = scmp.ne.s32.totalorder %s44_s19, %s459_s1  ;;  %p465_p7 = scmp.lt.s32.totalorder %s459_s1, %s459_s1 }
  0x2e   :  { %p466_p8 = por %p465_p7, %p464_p6 }
  0x30   :  { %p467_p9 = pnand %p466_p8, %p460_p5 }
  0x32   :  { %470 = shalt.err (!%p467_p9)
}
  0x33   :  { %46 = dma.hbm_to_vmem [thread:$0]  %s614_s3, 32, %s44_s19, [#allocation5]  }
  0x34   :  { %s471_s8 = scalar_lea.hbm %s615_s4, 256 }
  0x35   :  { %p472_p10 = scmp.ne.s32.totalorder %s615_s4, %s471_s8  ;;  %p475_p11 = scmp.lt.u32.totalorder %s471_s8, %s615_s4 }
  0x37   :  { %p477_p12 = pnand %p475_p11, %p472_p10 }
  0x39   :  { %480 = shalt.err (!%p477_p12)
}
  0x3a   :  { %s481_s13 = scalar_lea.vmem %s54_s22, 256  ;;  %p486_p0 = scmp.lt.s32.totalorder %s54_s22, %s54_s22 }
  0x3b   :  { %p482_p13 = scmp.ne.s32.totalorder %s54_s22, %s481_s13  ;;  %p487_p1 = scmp.lt.s32.totalorder %s481_s13, %s481_s13 }
  0x3d   :  { %p488_p2 = por %p487_p1, %p486_p0 }
  0x3f   :  { %p489_p3 = pnand %p488_p2, %p482_p13 }
  0x41   :  { %492 = shalt.err (!%p489_p3)
}
  0x42   :  { %56 = dma.hbm_to_vmem [thread:$0]  %s615_s4, 256, %s54_s22, [#allocation8]  }
  0x43   :  { %493 = dma.done.wait [#allocation3], 3072  }
  0x44   :  { %494 = vsyncadd [#allocation3], 4294964224 }
  0x45   :  { %495 = dma.done.wait [#allocation5], 64  }
  0x46   :  { %496 = vsyncadd [#allocation5], 4294967232 }
  0x47   :  { %497 = dma.done.wait [#allocation8], 256  }
  0x48   :  { %498 = vsyncadd [#allocation8], 4294967040  ;;  %v369_v0 = vld [vmem:[#allocation2 + $0x4] ss:$8 sps:$4 sm:$0xff]   ;;  %v371_v1 = vld [vmem:[#allocation2] ss:$8 sps:$4 sm:$0xff]   ;;  %v100_v28 = vlaneseq }
  0x49   :  { %234 = vmatprep.subr.bf16.mxu0 %v369_v0  ;;  %v372_v2 = vld [vmem:[#allocation2 + $0x14] ss:$8 sps:$4 sm:$0xff]   ;;  %v374_v3 = vld [vmem:[#allocation2 + $0x10] ss:$8 sps:$4 sm:$0xff]   ;;  %v375_v4 = vld [vmem:[#allocation2 + $0x24] ss:$8 sps:$4 sm:$0xff]  }
  0x4a   :  { %235 = vmatpush1.bf16.msra.mxu0 %v371_v1  ;;  %v377_v5 = vld [vmem:[#allocation2 + $0x20] ss:$8 sps:$4 sm:$0xff]   ;;  %v378_v6 = vld [vmem:[#allocation2 + $0x34] ss:$8 sps:$4 sm:$0xff]   ;;  %v380_v7 = vld [vmem:[#allocation2 + $0x30] ss:$8 sps:$4 sm:$0xff]  }
  0x4b   :  { %236 = vmatprep.subr.bf16.mxu0 %v372_v2  ;;  %v381_v8 = vld [vmem:[#allocation2 + $0x44] ss:$8 sps:$4 sm:$0xff]   ;;  %v383_v9 = vld [vmem:[#allocation2 + $0x40] ss:$8 sps:$4 sm:$0xff]   ;;  %v384_v10 = vld [vmem:[#allocation2 + $0x54] ss:$8 sps:$4 sm:$0xff]  }
  0x4c   :  { %v71_v11 = vld [vmem:[%s611_s0 + $0x8] sm:$0xff]  ;;  %vm230_vm0 = vcmask 523264   ;;  %v386_v13 = vld [vmem:[#allocation2 + $0x50] ss:$8 sps:$4 sm:$0xff]   ;;  %v390_v16 = vld [vmem:[#allocation2 + $0x74] ss:$8 sps:$4 sm:$0xff]  }
  0x4d   :  { %v73_v12 = vpack.c.bf16 %v71_v11, %v71_v11  ;;  %v387_v14 = vld [vmem:[#allocation2 + $0x64] ss:$8 sps:$4 sm:$0xff]   ;;  %v389_v15 = vld [vmem:[#allocation2 + $0x60] ss:$8 sps:$4 sm:$0xff]   ;;  %v392_v17 = vld [vmem:[#allocation2 + $0x70] ss:$8 sps:$4 sm:$0xff]  }
  0x4e   :  { %237 = vmatpush1.bf16.msra.mxu0 %v374_v3  ;;  %v393_v18 = vld [vmem:[#allocation2 + $0x84] ss:$8 sps:$4 sm:$0xff]   ;;  %v395_v19 = vld [vmem:[#allocation2 + $0x80] ss:$8 sps:$4 sm:$0xff]   ;;  %v396_v20 = vld [vmem:[#allocation2 + $0x94] ss:$8 sps:$4 sm:$0xff]  }
  0x4f   :  { %238 = vmatprep.subr.bf16.mxu0 %v375_v4  ;;  %362 = vmatprep.mubr.msk.bf16.mxu0 %vm230_vm0, %v73_v12  ;;  %v398_v21 = vld [vmem:[#allocation2 + $0x90] ss:$8 sps:$4 sm:$0xff]   ;;  %v399_v22 = vld [vmem:[#allocation2 + $0xa4] ss:$8 sps:$4 sm:$0xff]   ;;  %v401_v23 = vld [vmem:[#allocation2 + $0xa0] ss:$8 sps:$4 sm:$0xff]  }
  0x50   :  { %v402_v24 = vld [vmem:[#allocation2 + $0xb4] ss:$8 sps:$4 sm:$0xff]   ;;  %v404_v25 = vld [vmem:[#allocation2 + $0xb0] ss:$8 sps:$4 sm:$0xff]   ;;  %v70_v26 = vld [vmem:[%s611_s0] sm:$0xff]  ;;  %v101_v29 = vshrl.u32 %v100_v28, 7 }
  0x51   :  { %v72_v27 = vpack.c.bf16 %v70_v26, %v70_v26  ;;  %v98_v31 = vld [vmem:[#allocation4] sm:$0x3]  ;;  %v278_v33 = vld [vmem:[#allocation7] sm:$0x1e]  ;;  %v275_v34 = vld [vmem:[#allocation6] sm:$0x3] }
  0x52   :  { %239 = vmatpush1.bf16.msra.mxu0 %v377_v5  ;;  %v102_v30 = vsub.s32 0, %v101_v29  ;;  %v106_v32 = vsub.s32 1, %v101_v29  ;;  %v276_v35 = vld [vmem:[#allocation7] ss:$8 sm:$0x3]  ;;  %v282_v40 = vrot.slane %v278_v33, 1 }
  0x53   :  { %240 = vmatprep.subr.bf16.mxu0 %v378_v6  ;;  %v279_v37 = vld [vmem:[#allocation7 + $0x8] sm:$0x1e]  ;;  %v277_v39 = vadd.f32 %v276_v35, %v275_v34  ;;  %v288_v41 = vrot.slane %v278_v33, 5  ;;  %vm317_vm1 = vcmask 1040384   ;;  %vm320_vm2 = vcmask 1044480  }
  0x54   :  { %v103_v36 = vrot.slane %v98_v31, %v102_v30  ;;  %v107_v38 = vrot.slane %v98_v31, %v106_v32  ;;  %v283_v43 = vrot.slane %v279_v37, 1  ;;  %v289_v44 = vrot.slane %v279_v37, 5 }
  0x55   :  { %v298_v51 = vrot.slane %v277_v39, %v102_v30  ;;  %v302_v55 = vrot.slane %v277_v39, %v106_v32 }
  0x56   :  { %241 = vmatpush1.bf16.msra.mxu0 %v380_v7 }
  0x57   :  { %242 = vmatprep.subr.bf16.mxu0 %v381_v8 }
  0x5a   :  { %243 = vmatpush1.bf16.msra.mxu0 %v383_v9 }
  0x5b   :  { %244 = vmatprep.subr.bf16.mxu0 %v384_v10 }
  0x5e   :  { %245 = vmatpush1.bf16.msra.mxu0 %v386_v13 }
  0x5f   :  { %246 = vmatprep.subr.bf16.mxu0 %v387_v14 }
  0x62   :  { %247 = vmatpush1.bf16.msra.mxu0 %v389_v15 }
  0x63   :  { %248 = vmatprep.subr.bf16.mxu0 %v390_v16 }
  0x66   :  { %249 = vmatpush1.bf16.msra.mxu0 %v392_v17 }
  0x67   :  { %250 = vmatprep.subr.bf16.mxu0 %v393_v18 }
  0x6a   :  { %251 = vmatpush1.bf16.msra.mxu0 %v395_v19 }
  0x6b   :  { %252 = vmatprep.subr.bf16.mxu0 %v396_v20 }
  0x6e   :  { %253 = vmatpush1.bf16.msra.mxu0 %v398_v21 }
  0x6f   :  { %254 = vmatprep.subr.bf16.mxu0 %v399_v22 }
  0x72   :  { %255 = vmatpush1.bf16.msra.mxu0 %v401_v23 }
  0x73   :  { %256 = vmatprep.subr.bf16.mxu0 %v402_v24 }
  0x76   :  { %257 = vmatpush1.bf16.msra.mxu0 %v404_v25 }
  0x79   :  { %267 = vmatmul.mubr.bf16.vlgmr.msra.gmra.mrb[0].mxu0 %v72_v27 }
 0x14c   :  { %v268_v42 = vpop.f32.mrb[0].mxu0 }
 0x14d   :  { %v269_v45 = vadd.f32 %v268_v42, %v103_v36  ;;  %v270_v46 = vpop.f32.mrb[1].mxu0 }
 0x14e   :  { %v271_v47 = vadd.f32 %v270_v46, %v107_v38  ;;  %v272_v48 = vpop.f32.mrb[2].mxu0 }
 0x14f   :  { %v286_v49 = vadd.f32 %v282_v40, %v269_v45  ;;  %v292_v50 = vadd.f32 %v288_v41, %v269_v45  ;;  %v273_v52 = vpop.f32.mrb[3].mxu0 }
 0x150   :  { %v287_v53 = vadd.f32 %v283_v43, %v271_v47  ;;  %v293_v54 = vadd.f32 %v289_v44, %v271_v47 }
 0x151   :  { %v307_v56 = vrot.slane %v286_v49, 7  ;;  %v313_v57 = vrot.slane %v292_v50, 3 }
 0x152   :  { %v308_v58 = vrot.slane %v287_v53, 7  ;;  %v314_v59 = vrot.slane %v293_v54, 3 }
 0x153   :  { %v318_v60 = vsel %vm317_vm1, %v298_v51, %v307_v56  ;;  %v323_v61 = vsel %vm317_vm1, %v298_v51, %v313_v57 }
 0x154   :  { %v321_v62 = vsel %vm320_vm2, %v318_v60, 0.0  ;;  %v325_v63 = vsel %vm320_vm2, %v323_v61, 0.0  ;;  %v319_v0 = vsel %vm317_vm1, %v302_v55, %v308_v58  ;;  %v324_v1 = vsel %vm317_vm1, %v302_v55, %v314_v59 }
 0x155   :  { %327 = vst [vmem:[%s616_s5] sm:$0xff] %v321_v62  ;;  %329 = vst [vmem:[%s616_s5 + $0x10] sm:$0xff] %v325_v63  ;;  %v322_v2 = vsel %vm320_vm2, %v319_v0, 0.0  ;;  %v326_v3 = vsel %vm320_vm2, %v324_v1, 0.0 }
 0x156   :  { %328 = vst.msk [vmem:[%s616_s5 + $0x8] sm:$0xff] %vm230_vm0, %v322_v2  ;;  %330 = vst.msk [vmem:[%s616_s5 + $0x18] sm:$0xff] %vm230_vm0, %v326_v3 }
 0x157   :  { %335 = vsyncpa [#allocation3], 1 }
 0x158   :  { %336 = vsyncpa [#allocation5], 1 }
 0x159   :  { %337 = vsyncpa [#allocation8], 1 }

// kernel: tiny_vit_forward.5
= control target key start
LH: loop header
LB: loop body
LE: loop exit
PB: predicated region body
PF: predicated region fallthrough
CT: control target
= control target key end

     0   :  { %v29_v0 = vlaneseq  ;;  %v355_v1 = vmov 1983009808   ;;  %vm36_vm0 = vcmask 1041408   ;;  %vm38_vm1 = vcmask 517120   ;;  %s466_s0 = inlined_call_operand.vmem [shape: f32[2,192], index: 0, kind: input, shape index: {}]   ;;  %s467_s1 = inlined_call_operand.vmem [shape: f32[1,192], index: 1, kind: input, shape index: {}]   ;;  %s468_s2 = inlined_call_operand.vmem [shape: f32[1,192], index: 2, kind: input, shape index: {}]   ;;  %s469_s3 = inlined_call_operand.vmem [shape: bf16[192,10], index: 3, kind: input, shape index: {}]   ;;  %s470_s4 = inlined_call_operand.vmem [shape: f32[1,10], index: 4, kind: input, shape index: {}]   ;;  %s471_s5 = inlined_call_operand.hbm [shape: f32[2,10], index: 5, kind: output, shape index: {}]  }
   0x1   :  { %v27_v2 = vunpack.c.l.s4 %v355_v1  ;;  %v22_v3 = vld [vmem:[%s466_s0] sm:$0xf] }
   0x2   :  { %v392_v4 = vshrl.u32 %v29_v0, 7 }
   0x3   :  { %v28_v5 = vunpack.c.0.s8 %v27_v2 }
   0x5   :  { %v395_v6 = vsub.s32 %v28_v5, %v392_v4 }
   0x7   :  { %v32_v7 = vrot.slane %v22_v3, %v395_v6 }
   0x9   :  { %v33_v8 = vcombine.high %v32_v7, %v32_v7  ;;  %v37_v9 = vsel %vm36_vm0, %v32_v7, 0.0 }
   0xa   :  { %10 = vsyncpa [#allocation3], 0  ;;  %v317_v12 = vld [vmem:[%s469_s3] sm:$0xff]   ;;  %v356_v13 = vmov 0   ;;  %v318_v14 = vld [vmem:[%s469_s3 + $0x8] sm:$0xff]   ;;  %v88_v42 = vsub.s32 0, %v392_v4 }
   0xb   :  { %v39_v10 = vsel %vm38_vm1, %v33_v8, 0.0  ;;  %243 = vmatprep.subr.bf16.mxu0 %v356_v13  ;;  %v319_v15 = vld [vmem:[%s469_s3 + $0x10] sm:$0xff]   ;;  %v320_v16 = vld [vmem:[%s469_s3 + $0x18] sm:$0xff]   ;;  %v321_v17 = vld [vmem:[%s469_s3 + $0x20] sm:$0xff]   ;;  %v357_v18 = vmov 269488144  }
   0xc   :  { %v40_v11 = vadd.f32 %v39_v10, %v37_v9  ;;  %244 = vmatpush1.bf16.msra.mxu0 %v317_v12  ;;  %v47_v19 = vunpack.c.l.s4 %v357_v18  ;;  %v322_v32 = vld [vmem:[%s469_s3 + $0x28] sm:$0xff]   ;;  %v323_v33 = vld [vmem:[%s469_s3 + $0x30] sm:$0xff]   ;;  %v324_v34 = vld [vmem:[%s469_s3 + $0x38] sm:$0xff]   ;;  %v92_v43 = vsub.s32 1, %v392_v4  ;;  %vm239_vm2 = vcmask 523264  }
   0xd   :  { %245 = vmatprep.subr.bf16.mxu0 %v356_v13  ;;  %v325_v35 = vld [vmem:[%s469_s3 + $0x40] sm:$0xff]   ;;  %v326_v36 = vld [vmem:[%s469_s3 + $0x48] sm:$0xff]   ;;  %v327_v37 = vld [vmem:[%s469_s3 + $0x50] sm:$0xff]   ;;  %vm283_vm3 = vcmask 74752  }
   0xe   :  { %41 = vadd.xlane.f32.xlu0 %v40_v11  ;;  %v48_v20 = vunpack.c.0.s8 %v47_v19  ;;  %v328_v38 = vld [vmem:[%s469_s3 + $0x58] sm:$0xff]   ;;  %v23_v44 = vld [vmem:[%s467_s1] sm:$0x3]  ;;  %s358_s3 = smov [#allocation2]  }
   0xf   :  { %v24_v45 = vld [vmem:[%s468_s2] sm:$0x3]  ;;  %v89_v46 = vrot.slane %v23_v44, %v88_v42  ;;  %v93_v47 = vrot.slane %v23_v44, %v92_v43  ;;  %s291_s0 = sshll.u32 %s358_s3, 4  ;;  %s292_s0 = int_to_ptr.vmem [resolvable:$true] %s291_s0 }
  0x10   :  { %246 = vmatpush1.bf16.msra.mxu0 %v318_v14  ;;  %v51_v21 = vsub.s32 %v48_v20, %v392_v4  ;;  %v108_v48 = vrot.slane %v24_v45, %v88_v42  ;;  %v112_v49 = vrot.slane %v24_v45, %v92_v43  ;;  %v299_v63 = vld [vmem:[%s470_s4] ss:$0 sm:$0xff]  ;;  %s331_s22 = scalar_lea.vmem %s292_s0, 32  ;;  %p336_p1 = scmp.lt.s32.totalorder %s292_s0, %s292_s0 }
  0x11   :  { %247 = vmatprep.subr.bf16.mxu0 %v356_v13  ;;  %v94_v50 = vcombine.low %v89_v46, %v93_v47  ;;  %p332_p0 = scmp.ne.s32.totalorder %s292_s0, %s331_s22  ;;  %p337_p2 = scmp.lt.s32.totalorder %s331_s22, %s331_s22 }
  0x12   :  { %v113_v51 = vcombine.low %v108_v48, %v112_v49 }
  0x13   :  { %v101_v54 = vrot.slane %v94_v50, %v395_v6  ;;  %p338_p3 = por %p337_p2, %p336_p1 }
  0x14   :  { %248 = vmatpush1.bf16.msra.mxu0 %v319_v15  ;;  %v120_v56 = vrot.slane %v113_v51, %v395_v6 }
  0x15   :  { %249 = vmatprep.subr.bf16.mxu0 %v356_v13  ;;  %p339_p4 = pnand %p338_p3, %p332_p0 }
  0x18   :  { %250 = vmatpush1.bf16.msra.mxu0 %v320_v16 }
  0x19   :  { %251 = vmatprep.subr.bf16.mxu0 %v356_v13 }
  0x1c   :  { %252 = vmatpush1.bf16.msra.mxu0 %v321_v17 }
  0x1d   :  { %253 = vmatprep.subr.bf16.mxu0 %v356_v13 }
  0x20   :  { %254 = vmatpush1.bf16.msra.mxu0 %v322_v32 }
  0x21   :  { %255 = vmatprep.subr.bf16.mxu0 %v356_v13 }
  0x24   :  { %256 = vmatpush1.bf16.msra.mxu0 %v323_v33 }
  0x25   :  { %257 = vmatprep.subr.bf16.mxu0 %v356_v13 }
  0x28   :  { %258 = vmatpush1.bf16.msra.mxu0 %v324_v34 }
  0x29   :  { %259 = vmatprep.subr.bf16.mxu0 %v356_v13 }
  0x2c   :  { %260 = vmatpush1.bf16.msra.mxu0 %v325_v35 }
  0x2d   :  { %261 = vmatprep.subr.bf16.mxu0 %v356_v13 }
  0x30   :  { %262 = vmatpush1.bf16.msra.mxu0 %v326_v36 }
  0x31   :  { %263 = vmatprep.subr.bf16.mxu0 %v356_v13 }
  0x34   :  { %264 = vmatpush1.bf16.msra.mxu0 %v327_v37 }
  0x35   :  { %265 = vmatprep.subr.bf16.mxu0 %v356_v13 }
  0x38   :  { %266 = vmatpush1.bf16.msra.mxu0 %v328_v38 }
  0x9b   :  { %v42_v22 = vpop.xlane.xlu0 %41 }
  0x9c   :  { %v44_v23 = vmul.f32 0.0052083335, %v42_v22 }
  0x9e   :  { %v52_v24 = vrot.slane %v44_v23, %v51_v21 }
  0xa0   :  { %v54_v25 = vsub.f32 %v22_v3, %v52_v24 }
  0xa2   :  { %v55_v26 = vmul.f32 %v54_v25, %v54_v25 }
  0xa4   :  { %v63_v27 = vrot.slane %v55_v26, %v395_v6 }
  0xa6   :  { %v64_v28 = vcombine.high %v63_v27, %v63_v27  ;;  %v67_v29 = vsel %vm36_vm0, %v63_v27, 0.0 }
  0xa8   :  { %v68_v30 = vsel %vm38_vm1, %v64_v28, 0.0 }
  0xa9   :  { %v69_v31 = vadd.f32 %v68_v30, %v67_v29 }
  0xab   :  { %70 = vadd.xlane.f32.xlu0 %v69_v31 }
 0x138   :  { %v71_v39 = vpop.xlane.xlu0 %70 }
 0x139   :  { %v72_v40 = vmul.f32 0.0052083335, %v71_v39 }
 0x13b   :  { %v73_v41 = vadd.f32 1e-06, %v72_v40 }
 0x13d   :  { %329 = vrsqrt.f32 %v73_v41 }
 0x147   :  { %v330_v52 = vpop.eup %329 }
 0x148   :  { %v82_v53 = vrot.slane %v330_v52, %v51_v21 }
 0x14a   :  { %v84_v55 = vmul.f32 %v82_v53, %v54_v25 }
 0x14c   :  { %v103_v57 = vmul.f32 %v101_v54, %v84_v55 }
 0x14e   :  { %v122_v58 = vadd.f32 %v120_v56, %v103_v57 }
 0x150   :  { %v130_v59 = vrot.slane %v122_v58, %v395_v6 }
 0x152   :  { %v131_v60 = vcombine.high %v130_v59, %v130_v59  ;;  %v134_v62 = vpack.c.bf16 %v130_v59, %v130_v59 }
 0x154   :  { %v135_v61 = vpack.c.bf16 %v131_v60, %v131_v60 }
 0x156   :  { %312 = vmatprep.mubr.msk.bf16.mxu0 %vm239_vm2, %v135_v61 }
 0x157   :  { %276 = vmatmul.mubr.bf16.vlgmr.msra.gmra.mrb[0].mxu0 %v134_v62 }
 0x22a   :  { %v277_v0 = vpop.f32.mrb[0].mxu0 }
 0x22b   :  { %v278_v1 = vadd.f32 %v299_v63, %v277_v0  ;;  %v279_v2 = vpop.f32.mrb[1].mxu0 }
 0x22c   :  { %v280_v3 = vpop.f32.mrb[2].mxu0 }
 0x22d   :  { %v281_v4 = vpop.f32.mrb[3].mxu0  ;;  %284 = vst.msk [vmem:[#allocation2] sm:$0x3] %vm283_vm3, %v278_v1 }
 0x22e   :  { %342 = shalt.err (!%p339_p4)
}
 0x22f   :  { %s343_s4 = scalar_lea.hbm %s471_s5, 32 }
 0x230   :  { %p344_p5 = scmp.ne.s32.totalorder %s471_s5, %s343_s4  ;;  %p347_p6 = scmp.lt.u32.totalorder %s343_s4, %s471_s5 }
 0x232   :  { %p349_p7 = pnand %p347_p6, %p344_p5 }
 0x234   :  { %352 = shalt.err (!%p349_p7)
}
 0x235   :  { %294 = dma.vmem_to_hbm [thread:$0]  %s292_s0, 32, %s471_s5, [#allocation3]  }
 0x236   :  { %353 = dma.done.wait [#allocation3], 32  }
 0x237   :  { %354 = vsyncadd [#allocation3], 4294967264 }
 0x238   :  { %298 = vsyncpa [#allocation3], 1 }

// kernel: tiny_vit_forward.4
= control target key start
LH: loop header
LB: loop body
LE: loop exit
PB: predicated region body
PF: predicated region fallthrough
CT: control target
= control target key end

     0   :  { %s5005_s25 = smov 0   ;;  %s5680_s0 = inlined_call_operand.vmem [shape: f32[16,192], index: 0, kind: input, shape index: {}]   ;;  %s5681_s1 = inlined_call_operand.vmem [shape: f32[12,1,192], index: 1, kind: input, shape index: {}]   ;;  %s5682_s2 = inlined_call_operand.vmem [shape: f32[12,1,192], index: 2, kind: input, shape index: {}]   ;;  %s5683_s3 = inlined_call_operand.vmem [shape: bf16[12,192,576], index: 3, kind: input, shape index: {}]   ;;  %s5684_s4 = inlined_call_operand.vmem [shape: f32[12,1,576], index: 4, kind: input, shape index: {}]   ;;  %s5685_s5 = inlined_call_operand.vmem [shape: bf16[12,192,192], index: 5, kind: input, shape index: {}]   ;;  %s5686_s6 = inlined_call_operand.vmem [shape: f32[12,1,192], index: 6, kind: input, shape index: {}]   ;;  %s5687_s7 = inlined_call_operand.vmem [shape: f32[12,1,192], index: 7, kind: input, shape index: {}]   ;;  %s5688_s8 = inlined_call_operand.vmem [shape: f32[12,1,192], index: 8, kind: input, shape index: {}]   ;;  %s5689_s9 = inlined_call_operand.vmem [shape: bf16[12,192,768], index: 9, kind: input, shape index: {}]   ;;  %s5690_s10 = inlined_call_operand.vmem [shape: f32[12,1,768], index: 10, kind: input, shape index: {}]   ;;  %s5691_s11 = inlined_call_operand.vmem [shape: bf16[12,768,192], index: 11, kind: input, shape index: {}]   ;;  %s5692_s12 = inlined_call_operand.vmem [shape: f32[12,1,192], index: 12, kind: input, shape index: {}]   ;;  %s5693_s13 = inlined_call_operand.vmem [shape: f32[16,192], index: 13, kind: output, shape index: {}]  }
   0x1   :  { %5698 = sst [smem:[#allocation3_spill]] %s5680_s0 }
   0x2   :  { %5699 = sst [smem:[#allocation4_spill]] %s5683_s3 }
   0x3   :  { %5700 = sst [smem:[#allocation5_spill]] %s5684_s4 }
   0x4   :  { %5701 = sst [smem:[#allocation6_spill]] %s5691_s11 }
   0x5   :  { %5702 = sst [smem:[#allocation7_spill]] %s5693_s13 }
   0x6 LB: > { %5703 = sst [smem:[#allocation2_spill]] %s4929_s25  ;;  %s4078_s26 = sadd.s32 4294967295, %s4929_s25   ;;  %s4929_s25 = sphi %s5005_s25, %s23_s25  }
   0x7   : > { %p4081_p0 = scmp.ge.s32.totalorder %s4929_s25, 1  ;;  %p484_p1 = scmp.lt.s32.totalorder %s4929_s25, 13 }
   0x9   : > { %p485_p2 = pnand %p4081_p0, %p484_p1 }
   0xa   : > { %p570_p3 = scmp.lt.s32.totalorder (!%p485_p2), %s4078_s26, 11  ;;  %s5704_s3 = sld [smem:[#allocation4_spill]] (!%p485_p2) }
   0xb   : > { %488 = sbr.rel (%p485_p2) target bundleno = 4145 (0x1031), region = 72  ;;  %s5705_s4 = sld [smem:[#allocation5_spill]] (!%p485_p2) }
   0xc   : > { %s5706_s20 = sld [smem:[#allocation6_spill]] (!%p485_p2)  ;;  %p4092_p4 = scmp.ne.s32.totalorder (!%p485_p2), %s4078_s26, 0 }
  0x12   : > { %s571_s27 = scalar_select %p570_p3, %s4078_s26, 11 }
  0x13   : > { %s5707_s0 = sld [smem:[#allocation3_spill]] (!%p4092_p4)  ;;  %vm632_vm0 = vcmask (!%p4092_p4), 523264   ;;  %s5708_s18 = sld [smem:[#allocation7_spill]] (!%p4092_p4) }
  0x14   : > { %s5013_s28 = sshll.u32 %s571_s27, 1  ;;  %s4468_s29 = smul.u32 480, %s571_s27 }
  0x15   : > { %s4469_s22 = smul.u32 5, %s571_s27 }
  0x16   : > { %s5026_s21 = scalar_lea.vmem %s5704_s3, %s4468_s29  ;;  %s4470_s23 = smul.u32 192, %s571_s27 }
  0x17   : > { %s5035_s30 = scalar_lea.vmem %s5705_s4, %s4469_s22  ;;  %s4471_s25 = smul.u32 576, %s571_s27 }
  0x18   : > { %s5044_s29 = scalar_lea.vmem %s5685_s5, %s4470_s23  ;;  %s4472_s11 = smul.u32 6, %s571_s27 }
  0x19   : > { %s5057_s15 = scalar_lea.vmem %s5689_s9, %s4471_s25  ;;  %s4473_s14 = smul.u32 768, %s571_s27  ;;  %v627_v0 = vld [vmem:[%s5707_s0] sm:$0xff] (!%p4092_p4)  ;;  %v628_v1 = vld [vmem:[%s5707_s0 + $0x8] sm:$0xff] (!%p4092_p4)  ;;  %v629_v2 = vld [vmem:[%s5707_s0 + $0x10] sm:$0xff] (!%p4092_p4) }
  0x1a   : > { %s5062_s23 = scalar_lea.vmem %s5690_s10, %s4472_s11  ;;  %626 = sbr.rel (%p4092_p4) target bundleno = 33 (0x21), region = 76  ;;  %631 = vst [vmem:[%s5708_s18] sm:$0xff] (!%p4092_p4), %v627_v0  ;;  %633 = vst.msk [vmem:[%s5708_s18 + $0x8] sm:$0xff] (!%p4092_p4), %vm632_vm0, %v628_v1  ;;  %v630_v3 = vld [vmem:[%s5707_s0 + $0x18] sm:$0xff] (!%p4092_p4) }
  0x1b   : > { %s5067_s3 = scalar_lea.vmem %s5706_s20, %s4473_s14  ;;  %634 = vst [vmem:[%s5708_s18 + $0x10] sm:$0xff] (!%p4092_p4), %v629_v2  ;;  %635 = vst.msk [vmem:[%s5708_s18 + $0x18] sm:$0xff] (!%p4092_p4), %vm632_vm0, %v630_v3 }
  0x21 PF: > { %s5709_s16 = sld [smem:[#allocation7_spill]]  ;;  %vm642_vm1 = vcmask 523264   ;;  %v4491_v12 = vld [vmem:[%s5026_s21 + $0x4] ss:$20 sps:$4 sm:$0xff]   ;;  %v4493_v13 = vld [vmem:[%s5026_s21] ss:$20 sps:$4 sm:$0xff]   ;;  %s5710_s13 = scalar_lea.vmem %s5681_s1, %s5013_s28 }
  0x22   : > { %v4931_v14 = vmov 0   ;;  %v4494_v15 = vld [vmem:[%s5026_s21 + $0x10] ss:$20 sps:$4 sm:$0xff]   ;;  %v4495_v16 = vld [vmem:[%s5026_s21 + $0x2c] ss:$20 sps:$4 sm:$0xff]   ;;  %1126 = vmatprep.subr.bf16.mxu1 %v4491_v12  ;;  %s5711_s25 = scalar_lea.vmem %s5682_s2, %s5013_s28  ;;  %vm4933_vm2 = vmmov 0   ;;  %s5712_s27 = scalar_lea.vmem %s5686_s6, %s5013_s28 }
  0x23   : > { %1212 = vmatprep.subr.bf16.mxu0 %v4931_v14  ;;  %1127 = vmatpush1.bf16.msra.mxu1 %v4493_v13  ;;  %v4497_v17 = vld [vmem:[%s5026_s21 + $0x28] ss:$20 sps:$4 sm:$0xff]   ;;  %v4498_v18 = vld [vmem:[%s5026_s21 + $0x38] ss:$20 sps:$4 sm:$0xff]   ;;  %v4501_v20 = vld [vmem:[%s5026_s21 + $0x50] ss:$20 sps:$4 sm:$0xff]   ;;  %s5713_s4 = scalar_lea.vmem %s5687_s7, %s5013_s28 }
  0x24   : > { %1213 = vmatpush1.bf16.msra.mxu0 %v4494_v15  ;;  %1128 = vmatprep.subr.bf16.mxu1 %v4495_v16  ;;  %v4499_v19 = vld [vmem:[%s5026_s21 + $0x54] ss:$20 sps:$4 sm:$0xff]   ;;  %v4503_v22 = vld [vmem:[%s5026_s21 + $0x7c] ss:$20 sps:$4 sm:$0xff]   ;;  %v4505_v23 = vld [vmem:[%s5026_s21 + $0x78] ss:$20 sps:$4 sm:$0xff]  }
  0x25   : > { %1214 = vmatprep.subr.bf16.mxu0 %v4931_v14  ;;  %v4502_v21 = vld [vmem:[%s5026_s21 + $0x60] ss:$20 sps:$4 sm:$0xff]   ;;  %v4506_v24 = vld [vmem:[%s5026_s21 + $0x88] ss:$20 sps:$4 sm:$0xff]   ;;  %v4507_v25 = vld [vmem:[%s5026_s21 + $0xa4] ss:$20 sps:$4 sm:$0xff]  }
  0x26   : > { %v4509_v26 = vld [vmem:[%s5026_s21 + $0xa0] ss:$20 sps:$4 sm:$0xff]   ;;  %v4510_v27 = vld [vmem:[%s5026_s21 + $0xb0] ss:$20 sps:$4 sm:$0xff]   ;;  %v4513_v45 = vld [vmem:[%s5026_s21 + $0xc8] ss:$20 sps:$4 sm:$0xff]  }
  0x27   : > { %v636_v4 = vld [vmem:[%s5709_s16] sm:$0xff]  ;;  %v637_v5 = vld [vmem:[%s5709_s16 + $0x8] sm:$0xff]  ;;  %v638_v6 = vld [vmem:[%s5709_s16 + $0x10] sm:$0xff]  ;;  %1129 = vmatpush1.bf16.msra.mxu1 %v4497_v17  ;;  %vm1336_vm4 = vcmask 64512  }
  0x28   : > { %v643_v7 = vsel %vm642_vm1, %v637_v5, 0.0  ;;  %v639_v8 = vld [vmem:[%s5709_s16 + $0x18] sm:$0xff]  ;;  %1215 = vmatpush1.bf16.msra.mxu0 %v4498_v18  ;;  %1130 = vmatprep.subr.bf16.mxu1 %v4499_v19  ;;  %v4511_v28 = vld [vmem:[%s5026_s21 + $0xcc] ss:$20 sps:$4 sm:$0xff]   ;;  %v4515_v47 = vld [vmem:[%s5026_s21 + $0xf4] ss:$20 sps:$4 sm:$0xff]  }
  0x29   : > { %v644_v9 = vadd.f32 %v643_v7, %v636_v4  ;;  %v647_v10 = vsel %vm642_vm1, %v639_v8, 0.0  ;;  %1216 = vmatprep.subr.bf16.mxu0 %v4931_v14  ;;  %v4514_v46 = vld [vmem:[%s5026_s21 + $0xd8] ss:$20 sps:$4 sm:$0xff]   ;;  %v4517_v48 = vld [vmem:[%s5026_s21 + $0xf0] ss:$20 sps:$4 sm:$0xff]  }
  0x2a   : > { %v648_v11 = vadd.f32 %v647_v10, %v638_v6  ;;  %v4518_v49 = vld [vmem:[%s5026_s21 + $0x100] ss:$20 sps:$4 sm:$0xff]   ;;  %v4519_v50 = vld [vmem:[%s5026_s21 + $0x11c] ss:$20 sps:$4 sm:$0xff]   ;;  %v4521_v51 = vld [vmem:[%s5026_s21 + $0x118] ss:$20 sps:$4 sm:$0xff]  }
  0x2b   : > { %645 = vadd.xlane.f32.xlu0 %v644_v9  ;;  %1131 = vmatpush1.bf16.msra.mxu1 %v4501_v20  ;;  %v4522_v52 = vld [vmem:[%s5026_s21 + $0x128] ss:$20 sps:$4 sm:$0xff]   ;;  %v4523_v53 = vld [vmem:[%s5026_s21 + $0x144] ss:$20 sps:$4 sm:$0xff]   ;;  %v4525_v54 = vld [vmem:[%s5026_s21 + $0x140] ss:$20 sps:$4 sm:$0xff]  }
  0x2c   : > { %1217 = vmatpush1.bf16.msra.mxu0 %v4502_v21  ;;  %1132 = vmatprep.subr.bf16.mxu1 %v4503_v22  ;;  %v4526_v55 = vld [vmem:[%s5026_s21 + $0x150] ss:$20 sps:$4 sm:$0xff]   ;;  %v4527_v56 = vld [vmem:[%s5026_s21 + $0x16c] ss:$20 sps:$4 sm:$0xff]   ;;  %v4529_v57 = vld [vmem:[%s5026_s21 + $0x168] ss:$20 sps:$4 sm:$0xff]  }
  0x2d   : > { %1218 = vmatprep.subr.bf16.mxu0 %v4931_v14  ;;  %v4530_v58 = vld [vmem:[%s5026_s21 + $0x178] ss:$20 sps:$4 sm:$0xff]   ;;  %v4531_v59 = vld [vmem:[%s5026_s21 + $0x194] ss:$20 sps:$4 sm:$0xff]   ;;  %v4533_v60 = vld [vmem:[%s5026_s21 + $0x190] ss:$20 sps:$4 sm:$0xff]  }
  0x2e   : > { %v4534_v61 = vld [vmem:[%s5026_s21 + $0x1a0] ss:$20 sps:$4 sm:$0xff]   ;;  %v4535_v62 = vld [vmem:[%s5026_s21 + $0x1bc] ss:$20 sps:$4 sm:$0xff]   ;;  %v4537_v63 = vld [vmem:[%s5026_s21 + $0x1b8] ss:$20 sps:$4 sm:$0xff]  }
  0x2f   : > { %649 = vadd.xlane.f32.xlu0 %v648_v11  ;;  %1133 = vmatpush1.bf16.msra.mxu1 %v4505_v23  ;;  %v4538_v0 = vld [vmem:[%s5026_s21 + $0x1c8] ss:$20 sps:$4 sm:$0xff]   ;;  %v4541_v1 = vld [vmem:[%s5026_s21 + $0xc] ss:$20 sps:$4 sm:$0xff]  }
  0x30   : > { %1219 = vmatpush1.bf16.msra.mxu0 %v4506_v24  ;;  %1134 = vmatprep.subr.bf16.mxu1 %v4507_v25  ;;  %v640_v12 = vld [vmem:[%s5710_s13] sm:$0x3] }
  0x31   : > { %1220 = vmatprep.subr.bf16.mxu0 %v4931_v14 }
  0x33   : > { %1135 = vmatpush1.bf16.msra.mxu1 %v4509_v26 }
  0x34   : > { %1221 = vmatpush1.bf16.msra.mxu0 %v4510_v27  ;;  %1136 = vmatprep.subr.bf16.mxu1 %v4511_v28 }
  0x35   : > { %1222 = vmatprep.subr.bf16.mxu0 %v4931_v14 }
  0x37   : > { %1137 = vmatpush1.bf16.msra.mxu1 %v4513_v45  ;;  %v4559_v45 = vld [vmem:[%s5026_s21 + $0xfc] ss:$20 sps:$4 sm:$0xff]  }
  0x38   : > { %1223 = vmatpush1.bf16.msra.mxu0 %v4514_v46  ;;  %1138 = vmatprep.subr.bf16.mxu1 %v4515_v47  ;;  %v4557_v46 = vld [vmem:[%s5026_s21 + $0xf8] ss:$20 sps:$4 sm:$0xff]  }
  0x39   : > { %1224 = vmatprep.subr.bf16.mxu0 %v4931_v14  ;;  %v4562_v47 = vld [vmem:[%s5026_s21 + $0x124] ss:$20 sps:$4 sm:$0xff]  }
  0x3b   : > { %1139 = vmatpush1.bf16.msra.mxu1 %v4517_v48  ;;  %v4560_v48 = vld [vmem:[%s5026_s21 + $0x120] ss:$20 sps:$4 sm:$0xff]  }
  0x3c   : > { %1225 = vmatpush1.bf16.msra.mxu0 %v4518_v49  ;;  %1140 = vmatprep.subr.bf16.mxu1 %v4519_v50  ;;  %v4565_v49 = vld [vmem:[%s5026_s21 + $0x14c] ss:$20 sps:$4 sm:$0xff]   ;;  %v4563_v50 = vld [vmem:[%s5026_s21 + $0x148] ss:$20 sps:$4 sm:$0xff]  }
  0x3d   : > { %1226 = vmatprep.subr.bf16.mxu0 %v4931_v14 }
  0x3f   : > { %1141 = vmatpush1.bf16.msra.mxu1 %v4521_v51  ;;  %v4568_v51 = vld [vmem:[%s5026_s21 + $0x174] ss:$20 sps:$4 sm:$0xff]  }
  0x40   : > { %1227 = vmatpush1.bf16.msra.mxu0 %v4522_v52  ;;  %1142 = vmatprep.subr.bf16.mxu1 %v4523_v53  ;;  %v4566_v52 = vld [vmem:[%s5026_s21 + $0x170] ss:$20 sps:$4 sm:$0xff]  }
  0x41   : > { %1228 = vmatprep.subr.bf16.mxu0 %v4931_v14  ;;  %v4571_v53 = vld [vmem:[%s5026_s21 + $0x19c] ss:$20 sps:$4 sm:$0xff]  }
  0x43   : > { %1143 = vmatpush1.bf16.msra.mxu1 %v4525_v54  ;;  %v4569_v54 = vld [vmem:[%s5026_s21 + $0x198] ss:$20 sps:$4 sm:$0xff]  }
  0x44   : > { %1229 = vmatpush1.bf16.msra.mxu0 %v4526_v55  ;;  %1144 = vmatprep.subr.bf16.mxu1 %v4527_v56  ;;  %v4574_v55 = vld [vmem:[%s5026_s21 + $0x1c4] ss:$20 sps:$4 sm:$0xff]   ;;  %v4572_v56 = vld [vmem:[%s5026_s21 + $0x1c0] ss:$20 sps:$4 sm:$0xff]  }
  0x45   : > { %1230 = vmatprep.subr.bf16.mxu0 %v4931_v14 }
  0x47   : > { %1145 = vmatpush1.bf16.msra.mxu1 %v4529_v57  ;;  %v4932_v57 = vmov 0.0  }
  0x48   : > { %1231 = vmatpush1.bf16.msra.mxu0 %v4530_v58  ;;  %1146 = vmatprep.subr.bf16.mxu1 %v4531_v59  ;;  %v784_v59 = vld [vmem:[%s5035_s30] sm:$0x1f]  ;;  %s5714_s30 = scalar_lea.vmem %s5688_s8, %s5013_s28 }
  0x49   : > { %1232 = vmatprep.subr.bf16.mxu0 %v4931_v14 }
  0x4b   : > { %1147 = vmatpush1.bf16.msra.mxu1 %v4533_v60 }
  0x4c   : > { %1233 = vmatpush1.bf16.msra.mxu0 %v4534_v61  ;;  %1148 = vmatprep.subr.bf16.mxu1 %v4535_v62 }
  0x4d   : > { %1234 = vmatprep.subr.bf16.mxu0 %v4931_v14  ;;  %v641_v14 = vld [vmem:[%s5711_s25] sm:$0x3] }
  0x4f   : > { %1149 = vmatpush1.bf16.msra.mxu1 %v4537_v63 }
  0x50   : > { %1235 = vmatpush1.bf16.msra.mxu0 %v4538_v0  ;;  %1169 = vmatprep.subr.bf16.mxu1 %v4541_v1 }
  0x51   : > { %4396 = vmatprep.subr.mxu0 %v4932_v57 }
  0xb8   : > { %v646_v29 = vpop.xlane.xlu0 %645 }
  0xb9   : > { %v652_v30 = vmul.f32 0.0052083335, %v646_v29 }
  0xbb   : > { %v5129_v31 = vsub.f32 %v636_v4, %v652_v30  ;;  %v5131_v32 = vsub.f32 %v637_v5, %v652_v30 }
  0xbc   : > { %v650_v33 = vpop.xlane.xlu0 %649 }
  0xbd   : > { %v653_v34 = vmul.f32 0.0052083335, %v650_v33  ;;  %v658_v35 = vmul.f32 %v5129_v31, %v5129_v31  ;;  %v659_v36 = vmul.f32 %v5131_v32, %v5131_v32  ;;  %v4539_v33 = vld [vmem:[%s5026_s21 + $0x8] ss:$20 sps:$4 sm:$0xff]  }
  0xbf   : > { %v5137_v37 = vsub.f32 %v638_v6, %v653_v34  ;;  %v5139_v38 = vsub.f32 %v639_v8, %v653_v34  ;;  %v662_v39 = vsel %vm642_vm1, %v659_v36, 0.0  ;;  %v681_v6 = vlaneseq  ;;  %v4542_v36 = vld [vmem:[%s5026_s21 + $0x30] ss:$20 sps:$4 sm:$0xff]  }
  0xc0   : > { %v663_v40 = vadd.f32 %v662_v39, %v658_v35  ;;  %v4544_v35 = vld [vmem:[%s5026_s21 + $0x34] ss:$20 sps:$4 sm:$0xff]   ;;  %v4550_v39 = vld [vmem:[%s5026_s21 + $0x84] ss:$20 sps:$4 sm:$0xff]  }
  0xc1   : > { %v660_v41 = vmul.f32 %v5137_v37, %v5137_v37  ;;  %v661_v42 = vmul.f32 %v5139_v38, %v5139_v38  ;;  %v5175_v9 = vshrl.u32 %v681_v6, 7 }
  0xc2   : > { %664 = vadd.xlane.f32.xlu1 %v663_v40  ;;  %v4548_v40 = vld [vmem:[%s5026_s21 + $0x80] ss:$20 sps:$4 sm:$0xff]  }
  0xc3   : > { %v666_v43 = vsel %vm642_vm1, %v661_v42, 0.0  ;;  %v5178_v10 = vsub.s32 1, %v5175_v9  ;;  %v5181_v11 = vsub.s32 0, %v5175_v9  ;;  %v4551_v42 = vld [vmem:[%s5026_s21 + $0xa8] ss:$20 sps:$4 sm:$0xff]   ;;  %v804_v58 = vsub.s32 4, %v5175_v9 }
  0xc4   : > { %v667_v44 = vadd.f32 %v666_v43, %v660_v41  ;;  %v4553_v41 = vld [vmem:[%s5026_s21 + $0xac] ss:$20 sps:$4 sm:$0xff]   ;;  %v4556_v43 = vld [vmem:[%s5026_s21 + $0xd4] ss:$20 sps:$4 sm:$0xff]  }
  0xc5   : > { %v688_v16 = vrot.slane %v640_v12, %v5178_v10  ;;  %v684_v18 = vrot.slane %v640_v12, %v5181_v11  ;;  %v703_v20 = vrot.slane %v641_v14, %v5178_v10  ;;  %v699_v21 = vrot.slane %v641_v14, %v5181_v11 }
  0xc6   : > { %668 = vadd.xlane.f32.xlu1 %v667_v44  ;;  %v4554_v44 = vld [vmem:[%s5026_s21 + $0xd0] ss:$20 sps:$4 sm:$0xff]   ;;  %v805_v62 = vrot.slane %v784_v59, %v804_v58  ;;  %v793_v1 = vrot.slane %v784_v59, %v5178_v10  ;;  %v796_v12 = vsub.s32 2, %v5175_v9 }
 0x14f   : > { %v665_v2 = vpop.xlane.xlu1 %664 }
 0x150   : > { %v670_v3 = vmul.f32 0.0052083335, %v665_v2 }
 0x152   : > { %v672_v4 = vadd.f32 1e-06, %v670_v3 }
 0x153   : > { %v669_v5 = vpop.xlane.xlu1 %668 }
 0x154   : > { %4863 = vrsqrt.f32 %v672_v4  ;;  %v671_v7 = vmul.f32 0.0052083335, %v669_v5 }
 0x156   : > { %v673_v8 = vadd.f32 1e-06, %v671_v7 }
 0x158   : > { %4865 = vrsqrt.f32 %v673_v8 }
 0x15e   : > { %v4864_v13 = vpop.eup %4863 }
 0x15f   : > { %v677_v15 = vmul.f32 %v4864_v13, %v5131_v32  ;;  %v676_v17 = vmul.f32 %v4864_v13, %v5129_v31  ;;  %v797_v13 = vrot.slane %v784_v59, %v796_v12 }
 0x161   : > { %v692_v23 = vmul.f32 %v688_v16, %v677_v15  ;;  %v691_v25 = vmul.f32 %v684_v18, %v676_v17 }
 0x162   : > { %v4866_v19 = vpop.eup %4865 }
 0x163   : > { %v679_v22 = vmul.f32 %v4866_v19, %v5139_v38  ;;  %v678_v24 = vmul.f32 %v4866_v19, %v5137_v37  ;;  %v707_v28 = vadd.f32 %v703_v20, %v692_v23  ;;  %v706_v30 = vadd.f32 %v699_v21, %v691_v25  ;;  %v4547_v37 = vld [vmem:[%s5026_s21 + $0x5c] ss:$20 sps:$4 sm:$0xff]   ;;  %v4545_v38 = vld [vmem:[%s5026_s21 + $0x58] ss:$20 sps:$4 sm:$0xff]   ;;  %s4934_s21 = smov 64  }
 0x165   : > { %v694_v26 = vmul.f32 %v688_v16, %v679_v22  ;;  %v693_v27 = vmul.f32 %v684_v18, %v678_v24  ;;  %v5258_v24 = vand.u32 127, %v681_v6 }
 0x167   : > { %v709_v29 = vadd.f32 %v703_v20, %v694_v26  ;;  %v708_v31 = vadd.f32 %v699_v21, %v693_v27  ;;  %vm1255_vm3 = vcmp.lt.s32.totalorder %v5258_v24, 5 }
 0x169   : > { %v711_v32 = vpack.c.bf16 %v709_v29, %v707_v28  ;;  %v710_v34 = vpack.c.bf16 %v708_v31, %v706_v30 }
 0x16b   : > { %4153 = vmatprep.mubr.msk.bf16.mxu1 %vm642_vm1, %v711_v32  ;;  %4155 = vmatprep.mubr.msk.bf16.mxu0 %vm642_vm1, %v711_v32 }
 0x16c   : > { %1159 = vmatmul.mubr.bf16.vlgmr.msra.gmra.mrb[0].mxu1 %v710_v34  ;;  %1245 = vmatmul.mubr.bf16.vlgmr.msra.gmra.mrb[0].mxu0 %v710_v34 }
 0x16d   : > { %1170 = vmatpush1.bf16.msra.mxu1 %v4539_v33  ;;  %4154 = vmatprep.mubr.msk.bf16.mxu1 %vm642_vm1, %v711_v32 }
 0x16e   : > { %1171 = vmatprep.subr.bf16.mxu1 %v4544_v35  ;;  %4398 = vmatprep.mubr.msk.f32.mxu0 %vm4933_vm2, %v4932_v57  ;;  %v800_v35 = vsub.s32 3, %v5175_v9 }
 0x171   : > { %1172 = vmatpush1.bf16.msra.mxu1 %v4542_v36 }
 0x172   : > { %1173 = vmatprep.subr.bf16.mxu1 %v4547_v37 }
 0x175   : > { %1174 = vmatpush1.bf16.msra.mxu1 %v4545_v38  ;;  %v801_v38 = vrot.slane %v784_v59, %v800_v35 }
 0x176   : > { %1175 = vmatprep.subr.bf16.mxu1 %v4550_v39 }
 0x179   : > { %1176 = vmatpush1.bf16.msra.mxu1 %v4548_v40 }
 0x17a   : > { %1177 = vmatprep.subr.bf16.mxu1 %v4553_v41 }
 0x17d   : > { %1178 = vmatpush1.bf16.msra.mxu1 %v4551_v42 }
 0x17e   : > { %1179 = vmatprep.subr.bf16.mxu1 %v4556_v43 }
 0x181   : > { %1180 = vmatpush1.bf16.msra.mxu1 %v4554_v44 }
 0x182   : > { %1181 = vmatprep.subr.bf16.mxu1 %v4559_v45 }
 0x185   : > { %1182 = vmatpush1.bf16.msra.mxu1 %v4557_v46 }
 0x186   : > { %1183 = vmatprep.subr.bf16.mxu1 %v4562_v47 }
 0x189   : > { %1184 = vmatpush1.bf16.msra.mxu1 %v4560_v48 }
 0x18a   : > { %1185 = vmatprep.subr.bf16.mxu1 %v4565_v49 }
 0x18d   : > { %1186 = vmatpush1.bf16.msra.mxu1 %v4563_v50 }
 0x18e   : > { %1187 = vmatprep.subr.bf16.mxu1 %v4568_v51 }
 0x191   : > { %1188 = vmatpush1.bf16.msra.mxu1 %v4566_v52 }
 0x192   : > { %1189 = vmatprep.subr.bf16.mxu1 %v4571_v53 }
 0x195   : > { %1190 = vmatpush1.bf16.msra.mxu1 %v4569_v54 }
 0x196   : > { %1191 = vmatprep.subr.bf16.mxu1 %v4574_v55 }
 0x199   : > { %1192 = vmatpush1.bf16.msra.mxu1 %v4572_v56 }
 0x19a   : > { %4416 = vmatprep.subr.mxu1 %v4932_v57 }
 0x19c   : > { %1202 = vmatmul.mubr.bf16.vlgmr.msra.gmra.mrb[4].mxu1 %v710_v34  ;;  %v789_v34 = vrot.slane %v784_v59, %v5181_v11 }
 0x19d   : > { %4418 = vmatprep.mubr.msk.f32.mxu1 %vm4933_vm2, %v4932_v57 }
 0x23f   : > { %v1160_v60 = vpop.f32.mrb[0].mxu1  ;;  %v1246_v61 = vpop.f32.mrb[0].mxu0 }
 0x240   : > { %v1162_v63 = vpop.f32.mrb[1].mxu1  ;;  %v1248_v0 = vpop.f32.mrb[1].mxu0  ;;  %v1247_v23 = vadd.f32 %v1246_v61, %v805_v62  ;;  %v1161_v37 = vadd.f32 %v1160_v60, %v789_v34 }
 0x241   : > { %v1164_v2 = vpop.f32.mrb[2].mxu1  ;;  %v1249_v3 = vpop.f32.mrb[2].mxu0  ;;  %v1163_v20 = vadd.f32 %v1162_v63, %v793_v1 }
 0x242   : > { %v5234_v4 = vadd.f32 %v1249_v3, %v805_v62  ;;  %v1166_v5 = vpop.f32.mrb[3].mxu1  ;;  %v1251_v7 = vpop.f32.mrb[3].mxu0  ;;  %v1256_v40 = vmul.f32 0.125, %v1161_v37  ;;  %v1165_v43 = vadd.f32 %v1164_v2, %v789_v34 }
 0x243   : > { %v5236_v8 = vadd.f32 %v1166_v5, %v793_v1  ;;  %v1587_v22 = vmul.f32 0.125, %v1163_v20 }
 0x244   : > { %v1755_v45 = vmul.f32 0.125, %v1165_v43 }
 0x26f   : > { %v1203_v14 = vpop.f32.mrb[4].mxu1 }
 0x270   : > { %v5245_v15 = vadd.f32 %v1203_v14, %v797_v13  ;;  %v1205_v16 = vpop.f32.mrb[5].mxu1 }
 0x271   : > { %v1207_v17 = vpop.f32.mrb[6].mxu1  ;;  %v5274_v42 = vadd.f32 %v1205_v16, %v801_v38 }
 0x272   : > { %v5247_v18 = vadd.f32 %v1207_v17, %v797_v13  ;;  %v1209_v19 = vpop.f32.mrb[7].mxu1  ;;  %1588 = vrot.lane.b32.xlu0 %v5245_v15, %s4934_s21 }
 0x273   : > { %v1210_v46 = vadd.f32 %v1209_v19, %v801_v38 }
 0x2e4   : > { %v1589_v21 = vpop.permute.xlu0 %1588 }
 0x2e5   : > { %4417 = vmatpush3.xpose.msk.msra.mxu1 %vm642_vm1, %v1589_v21 }
 0x2e6   : > { %4421 = vmatprep.subr.mxu1 %v4932_v57 }
 0x2e8   : > { %4419 = vmatmul.mubr.msk.f32.vlgmr.msra.gmra.mrb[8].mxu1 %vm642_vm1, %v1587_v22 }
 0x2e9   : > { %4422 = vmatpush3.msra.mxu1 %v1247_v23  ;;  %4423 = vmatprep.mubr.msk.f32.mxu1 %vm4933_vm2, %v4932_v57 }
 0x2ea   : > { %4426 = vmatprep.subr.mxu1 %v4932_v57 }
 0x3bb   : > { %v1661_v25 = vpop.f32.mrb[8].mxu1 }
 0x3bc   : > { %v1665_v26 = vsel %vm1255_vm3, %v1661_v25, -1e+30  ;;  %v4420_v27 = vpop.f32.mrb[9].mxu1 }
 0x3bd   : > { %v1666_v28 = vsel %vm1336_vm4, %v1665_v26, -inf }
 0x3be   : > { %1667 = vmax.xlane.f32.xlu1 %v1666_v28 }
 0x44b   : > { %v1668_v29 = vpop.xlane.xlu1 %1667 }
 0x44c   : > { %v1669_v30 = vsub.f32 %v1665_v26, %v1668_v29 }
 0x44e   : > { %v1670_v31 = vmul.f32 1.442695, %v1669_v30 }
 0x450   : > { %4867 = vpow2.f32 %v1670_v31 }
 0x45a   : > { %v4868_v32 = vpop.eup %4867 }
 0x45b   : > { %v1672_v33 = vsel %vm1336_vm4, %v4868_v32, 0.0 }
 0x45c   : > { %1673 = vadd.xlane.f32.xlu1 %v1672_v33 }
 0x46d   : > { %1757 = vrot.lane.b32.xlu1 %v5236_v8, %s4934_s21 }
 0x471   : > { %1258 = vrot.lane.b32.xlu1 %v1163_v20, %s4934_s21 }
 0x4e9   : > { %v1674_v6 = vpop.xlane.xlu1 %1673 }
 0x4ea   : > { %4869 = vrcp.f32 %v1674_v6 }
 0x4ed   : > { %v1758_v36 = vpop.permute.xlu1 %1757 }
 0x4f1   : > { %v1259_v39 = vpop.permute.xlu1 %1258 }
 0x4f2   : > { %4397 = vmatpush3.xpose.msk.msra.mxu0 %vm642_vm1, %v1259_v39 }
 0x4f3   : > { %4401 = vmatprep.subr.mxu0 %v4932_v57 }
 0x4f4   : > { %v4870_v41 = vpop.eup %4869 }
 0x4f5   : > { %v1676_v44 = vmul.f32 %v4870_v41, %v4868_v32  ;;  %4399 = vmatmul.mubr.msk.f32.vlgmr.msra.gmra.mrb[4].mxu0 %vm642_vm1, %v1256_v40 }
 0x4f6   : > { %4402 = vmatpush3.msra.mxu0 %v5274_v42  ;;  %4403 = vmatprep.mubr.msk.f32.mxu0 %vm4933_vm2, %v4932_v57 }
 0x4f7   : > { %4424 = vmatmul.mubr.msk.f32.vlgmr.msra.gmra.mrb[10].mxu1 %vm1336_vm4, %v1676_v44  ;;  %4406 = vmatprep.subr.mxu0 %v4932_v57 }
 0x4f8   : > { %4427 = vmatpush3.xpose.msk.msra.mxu1 %vm642_vm1, %v1758_v36  ;;  %4428 = vmatprep.mubr.msk.f32.mxu1 %vm4933_vm2, %v4932_v57 }
 0x4f9   : > { %4431 = vmatprep.subr.mxu1 %v4932_v57 }
 0x4fb   : > { %4429 = vmatmul.mubr.msk.f32.vlgmr.msra.gmra.mrb[12].mxu1 %vm642_vm1, %v1755_v45 }
 0x4fc   : > { %4432 = vmatpush3.msra.mxu1 %v1210_v46  ;;  %4433 = vmatprep.mubr.msk.f32.mxu1 %vm4933_vm2, %v4932_v57 }
 0x4fd   : > { %4436 = vmatprep.subr.mxu1 %v4932_v57 }
 0x5c8   : > { %v1331_v47 = vpop.f32.mrb[4].mxu0 }
 0x5c9   : > { %v4400_v48 = vpop.f32.mrb[5].mxu0  ;;  %v1335_v62 = vsel %vm1255_vm3, %v1331_v47, -1e+30 }
 0x5ca   : > { %v5290_v49 = vpop.f32.mrb[10].mxu1  ;;  %v1337_v63 = vsel %vm1336_vm4, %v1335_v62, -inf }
 0x5cb   : > { %v4425_v50 = vpop.f32.mrb[11].mxu1 }
 0x5ce   : > { %v1830_v51 = vpop.f32.mrb[12].mxu1 }
 0x5cf   : > { %v1834_v52 = vsel %vm1255_vm3, %v1830_v51, -1e+30  ;;  %v4430_v53 = vpop.f32.mrb[13].mxu1 }
 0x5d0   : > { %v1835_v54 = vsel %vm1336_vm4, %v1834_v52, -inf }
 0x5d1   : > { %1836 = vmax.xlane.f32.xlu0 %v1835_v54 }
 0x5e7   : > { %1919 = vrot.lane.b32.xlu0 %v1755_v45, %s4934_s21 }
 0x5eb   : > { %1421 = vrot.lane.b32.xlu0 %v1256_v40, %s4934_s21 }
 0x5ef   : > { %2009 = vrot.lane.b32.xlu0 %v1210_v46, %s4934_s21 }
 0x65e   : > { %v1837_v55 = vpop.xlane.xlu0 %1836 }
 0x65f   : > { %v1838_v56 = vsub.f32 %v1834_v52, %v1837_v55 }
 0x661   : > { %v1839_v59 = vmul.f32 1.442695, %v1838_v56 }
 0x662   : > { %v1920_v1 = vpop.permute.xlu0 %1919 }
 0x663   : > { %4871 = vpow2.f32 %v1839_v59 }
 0x666   : > { %v1422_v3 = vpop.permute.xlu0 %1421 }
 0x66a   : > { %v2010_v7 = vpop.permute.xlu0 %2009 }
 0x66d   : > { %v4872_v60 = vpop.eup %4871 }
 0x66e   : > { %v1841_v61 = vsel %vm1336_vm4, %v4872_v60, 0.0 }
 0x66f   : > { %1842 = vadd.xlane.f32.xlu1 %v1841_v61 }
 0x673   : > { %1338 = vmax.xlane.f32.xlu1 %v1337_v63 }
 0x6fc   : > { %v1843_v0 = vpop.xlane.xlu1 %1842 }
 0x6fd   : > { %4873 = vrcp.f32 %v1843_v0  ;;  %v4577_v0 = vld [vmem:[%s5044_s29 + $0x4] ss:$8 sps:$4 sm:$0xff]  }
 0x700   : > { %v1339_v13 = vpop.xlane.xlu1 %1338 }
 0x701   : > { %v1340_v14 = vsub.f32 %v1335_v62, %v1339_v13  ;;  %v4583_v13 = vld [vmem:[%s5044_s29 + $0x24] ss:$8 sps:$4 sm:$0xff]  }
 0x703   : > { %v1341_v16 = vmul.f32 1.442695, %v1340_v14  ;;  %v4581_v14 = vld [vmem:[%s5044_s29 + $0x20] ss:$8 sps:$4 sm:$0xff]  }
 0x705   : > { %4875 = vpow2.f32 %v1341_v16  ;;  %v4584_v16 = vld [vmem:[%s5044_s29 + $0x30] ss:$8 sps:$4 sm:$0xff]  }
 0x707   : > { %v4874_v2 = vpop.eup %4873 }
 0x708   : > { %v1845_v5 = vmul.f32 %v4874_v2, %v4872_v60  ;;  %v4578_v2 = vld [vmem:[%s5044_s29 + $0x10] ss:$8 sps:$4 sm:$0xff]  }
 0x70a   : > { %4434 = vmatmul.mubr.msk.f32.vlgmr.msra.gmra.mrb[14].mxu1 %vm1336_vm4, %v1845_v5 }
 0x70b   : > { %4437 = vmatpush3.xpose.msk.msra.mxu1 %vm642_vm1, %v5247_v18  ;;  %4438 = vmatprep.mubr.msk.f32.mxu1 %vm4933_vm2, %v4932_v57 }
 0x70c   : > { %4441 = vmatprep.subr.mxu1 %v4932_v57 }
 0x70e   : > { %4439 = vmatmul.mubr.msk.f32.vlgmr.msra.gmra.mrb[16].mxu1 %vm642_vm1, %v1920_v1  ;;  %v4580_v1 = vld [vmem:[%s5044_s29 + $0x14] ss:$8 sps:$4 sm:$0xff]  }
 0x70f   : > { %4442 = vmatpush3.msra.mxu1 %v2010_v7  ;;  %4443 = vmatprep.mubr.msk.f32.mxu1 %vm4933_vm2, %v4932_v57  ;;  %v4876_v25 = vpop.eup %4875 }
 0x710   : > { %4446 = vmatprep.subr.mxu1 %v4932_v57  ;;  %v1343_v26 = vsel %vm1336_vm4, %v4876_v25, 0.0 }
 0x7dd   : > { %v5312_v17 = vpop.f32.mrb[14].mxu1 }
 0x7de   : > { %v4435_v19 = vpop.f32.mrb[15].mxu1 }
 0x7df   : > { %v4586_v19 = vld [vmem:[%s5044_s29 + $0x34] ss:$8 sps:$4 sm:$0xff]  }
 0x7e1   : > { %v1992_v20 = vpop.f32.mrb[16].mxu1 }
 0x7e2   : > { %v1996_v21 = vsel %vm1255_vm3, %v1992_v20, -1e+30  ;;  %v4440_v22 = vpop.f32.mrb[17].mxu1  ;;  %v4589_v20 = vld [vmem:[%s5044_s29 + $0x44] ss:$8 sps:$4 sm:$0xff]  }
 0x7e3   : > { %v1997_v23 = vsel %vm1336_vm4, %v1996_v21, -inf  ;;  %v4592_v22 = vld [vmem:[%s5044_s29 + $0x54] ss:$8 sps:$4 sm:$0xff]  }
 0x7e4   : > { %1998 = vmax.xlane.f32.xlu1 %v1997_v23 }
 0x7e8   : > { %1344 = vadd.xlane.f32.xlu1 %v1343_v26 }
 0x871   : > { %v1999_v27 = vpop.xlane.xlu1 %1998 }
 0x872   : > { %v2000_v28 = vsub.f32 %v1996_v21, %v1999_v27  ;;  %v4587_v21 = vld [vmem:[%s5044_s29 + $0x40] ss:$8 sps:$4 sm:$0xff]  }
 0x874   : > { %v2001_v29 = vmul.f32 1.442695, %v2000_v28  ;;  %v4595_v28 = vld [vmem:[%s5044_s29 + $0x64] ss:$8 sps:$4 sm:$0xff]  }
 0x875   : > { %v1345_v30 = vpop.xlane.xlu1 %1344 }
 0x876   : > { %4877 = vpow2.f32 %v2001_v29  ;;  %v4593_v29 = vld [vmem:[%s5044_s29 + $0x60] ss:$8 sps:$4 sm:$0xff]  }
 0x877   : > { %4879 = vrcp.f32 %v1345_v30  ;;  %v4598_v30 = vld [vmem:[%s5044_s29 + $0x74] ss:$8 sps:$4 sm:$0xff]  }
 0x880   : > { %v4878_v31 = vpop.eup %4877 }
 0x881   : > { %v4880_v32 = vpop.eup %4879  ;;  %v2003_v33 = vsel %vm1336_vm4, %v4878_v31, 0.0 }
 0x882   : > { %v1347_v6 = vmul.f32 %v4880_v32, %v4876_v25  ;;  %2004 = vadd.xlane.f32.xlu1 %v2003_v33  ;;  %v4590_v25 = vld [vmem:[%s5044_s29 + $0x50] ss:$8 sps:$4 sm:$0xff]   ;;  %v4601_v32 = vld [vmem:[%s5044_s29 + $0x84] ss:$8 sps:$4 sm:$0xff]   ;;  %v4599_v33 = vld [vmem:[%s5044_s29 + $0x80] ss:$8 sps:$4 sm:$0xff]  }
 0x884   : > { %4404 = vmatmul.mubr.msk.f32.vlgmr.msra.gmra.mrb[6].mxu0 %vm1336_vm4, %v1347_v6  ;;  %v4604_v6 = vld [vmem:[%s5044_s29 + $0x94] ss:$8 sps:$4 sm:$0xff]  }
 0x885   : > { %4407 = vmatpush3.xpose.msk.msra.mxu0 %vm642_vm1, %v5245_v15  ;;  %4408 = vmatprep.mubr.msk.f32.mxu0 %vm4933_vm2, %v4932_v57  ;;  %v2085_v15 = vmul.f32 0.125, %v5236_v8 }
 0x886   : > { %4411 = vmatprep.subr.mxu0 %v4932_v57 }
 0x888   : > { %4409 = vmatmul.mubr.msk.f32.vlgmr.msra.gmra.mrb[8].mxu0 %vm642_vm1, %v1422_v3 }
 0x889   : > { %4413 = vmatprep.mubr.msk.f32.mxu0 %vm4933_vm2, %v4932_v57 }
 0x893   : > { %2086 = vrot.lane.b32.xlu1 %v5247_v18, %s4934_s21 }
 0x90f   : > { %v2005_v34 = vpop.xlane.xlu1 %2004 }
 0x910   : > { %4881 = vrcp.f32 %v2005_v34  ;;  %v4602_v34 = vld [vmem:[%s5044_s29 + $0x90] ss:$8 sps:$4 sm:$0xff]  }
 0x913   : > { %v2087_v38 = vpop.permute.xlu1 %2086 }
 0x91a   : > { %v4882_v36 = vpop.eup %4881 }
 0x91b   : > { %v2007_v37 = vmul.f32 %v4882_v36, %v4878_v31  ;;  %v4596_v31 = vld [vmem:[%s5044_s29 + $0x70] ss:$8 sps:$4 sm:$0xff]   ;;  %v4607_v36 = vld [vmem:[%s5044_s29 + $0xa4] ss:$8 sps:$4 sm:$0xff]  }
 0x91d   : > { %4444 = vmatmul.mubr.msk.f32.vlgmr.msra.gmra.mrb[18].mxu1 %vm1336_vm4, %v2007_v37  ;;  %v4605_v37 = vld [vmem:[%s5044_s29 + $0xa0] ss:$8 sps:$4 sm:$0xff]  }
 0x91e   : > { %4447 = vmatpush3.xpose.msk.msra.mxu1 %vm642_vm1, %v2087_v38  ;;  %4448 = vmatprep.mubr.msk.f32.mxu1 %vm4933_vm2, %v4932_v57  ;;  %v4610_v38 = vld [vmem:[%s5044_s29 + $0xb4] ss:$8 sps:$4 sm:$0xff]  }
 0x91f   : > { %4451 = vmatprep.subr.mxu1 %v4932_v57 }
 0x921   : > { %4449 = vmatmul.mubr.msk.f32.vlgmr.msra.gmra.mrb[20].mxu1 %vm642_vm1, %v2085_v15  ;;  %v4608_v15 = vld [vmem:[%s5044_s29 + $0xb0] ss:$8 sps:$4 sm:$0xff]  }
 0x922   : > { %4452 = vmatpush3.msra.mxu1 %v5234_v4  ;;  %4453 = vmatprep.mubr.msk.f32.mxu1 %vm4933_vm2, %v4932_v57 }
 0x957   : > { %v5340_v18 = vpop.f32.mrb[6].mxu0 }
 0x958   : > { %v4405_v39 = vpop.f32.mrb[7].mxu0 }
 0x95b   : > { %v1494_v40 = vpop.f32.mrb[8].mxu0 }
 0x95c   : > { %v1498_v41 = vsel %vm1255_vm3, %v1494_v40, -1e+30  ;;  %v4410_v43 = vpop.f32.mrb[9].mxu0 }
 0x95d   : > { %v1499_v44 = vsel %vm1336_vm4, %v1498_v41, -inf }
 0x95e   : > { %1500 = vmax.xlane.f32.xlu0 %v1499_v44 }
 0x9eb   : > { %v1501_v8 = vpop.xlane.xlu0 %1500 }
 0x9ec   : > { %v1502_v45 = vsub.f32 %v1498_v41, %v1501_v8 }
 0x9ee   : > { %v1503_v46 = vmul.f32 1.442695, %v1502_v45 }
 0x9f0   : > { %4883 = vpow2.f32 %v1503_v46  ;;  %v2081_v47 = vpop.f32.mrb[18].mxu1 }
 0x9f1   : > { %v4445_v4 = vpop.f32.mrb[19].mxu1 }
 0x9f2   : > { %v2279_v4 = vld [vmem:[%s5712_s27] sm:$0x3] }
 0x9f4   : > { %v2159_v48 = vpop.f32.mrb[20].mxu1 }
 0x9f5   : > { %v2163_v57 = vsel %vm1255_vm3, %v2159_v48, -1e+30  ;;  %v4450_v50 = vpop.f32.mrb[21].mxu1  ;;  %v2284_v48 = vrot.slane %v2279_v4, %v5181_v11 }
 0x9f6   : > { %v2164_v51 = vsel %vm1336_vm4, %v2163_v57, -inf }
 0x9f7   : > { %2165 = vmax.xlane.f32.xlu1 %v2164_v51 }
 0x9fa   : > { %v4884_v52 = vpop.eup %4883 }
 0x9fb   : > { %v1505_v53 = vsel %vm1336_vm4, %v4884_v52, 0.0 }
 0x9fc   : > { %1506 = vadd.xlane.f32.xlu0 %v1505_v53 }
 0xa12   : > { %1511 = vrot.lane.b32.xlu0 %v5274_v42, %s4934_s21  ;;  %v4575_v42 = vld [vmem:[%s5044_s29] ss:$8 sps:$4 sm:$0xff]   ;;  %s5715_s29 = scalar_lea.vmem %s5692_s12, %s5013_s28 }
 0xa84   : > { %v2166_v54 = vpop.xlane.xlu1 %2165 }
 0xa85   : > { %v2167_v55 = vsub.f32 %v2163_v57, %v2166_v54  ;;  %v4919_v54 = vld [vmem:[%s5709_s16 + $0x8] sm:$0xff] }
 0xa87   : > { %v2168_v56 = vmul.f32 1.442695, %v2167_v55 }
 0xa89   : > { %4885 = vpow2.f32 %v2168_v56  ;;  %v1507_v24 = vpop.xlane.xlu0 %1506 }
 0xa8a   : > { %4887 = vrcp.f32 %v1507_v24  ;;  %v4920_v24 = vld [vmem:[%s5709_s16] sm:$0xff] }
 0xa8d   : > { %v1512_v59 = vpop.permute.xlu0 %1511 }
 0xa8e   : > { %4412 = vmatpush3.msra.mxu0 %v1512_v59 }
 0xa8f   : > { %2414 = vmatprep.subr.bf16.mxu0 %v4577_v0 }
 0xa93   : > { %v4886_v60 = vpop.eup %4885 }
 0xa94   : > { %v4888_v61 = vpop.eup %4887  ;;  %v2170_v62 = vsel %vm1336_vm4, %v4886_v60, 0.0 }
 0xa95   : > { %v1509_v63 = vmul.f32 %v4888_v61, %v4884_v52  ;;  %2171 = vadd.xlane.f32.xlu1 %v2170_v62 }
 0xa97   : > { %4414 = vmatmul.mubr.msk.f32.vlgmr.msra.gmra.mrb[10].mxu0 %vm1336_vm4, %v1509_v63  ;;  %v4922_v63 = vld [vmem:[%s5709_s16 + $0x10] sm:$0xff] }
 0xa98   : > { %2415 = vmatpush1.bf16.msra.mxu0 %v4575_v42 }
 0xa99   : > { %2416 = vmatprep.subr.bf16.mxu0 %v4580_v1 }
 0xa9c   : > { %2417 = vmatpush1.bf16.msra.mxu0 %v4578_v2 }
 0xa9d   : > { %2418 = vmatprep.subr.bf16.mxu0 %v4583_v13  ;;  %v4616_v13 = vld [vmem:[%s5057_s15 + $0xc] ss:$24 sps:$4 sm:$0xff]  }
 0xaa0   : > { %2419 = vmatpush1.bf16.msra.mxu0 %v4581_v14  ;;  %v4619_v14 = vld [vmem:[%s5057_s15 + $0x34] ss:$24 sps:$4 sm:$0xff]  }
 0xaa1   : > { %2420 = vmatprep.subr.bf16.mxu0 %v4586_v19  ;;  %v4617_v19 = vld [vmem:[%s5057_s15 + $0x30] ss:$24 sps:$4 sm:$0xff]  }
 0xaa4   : > { %2421 = vmatpush1.bf16.msra.mxu0 %v4584_v16  ;;  %v4622_v16 = vld [vmem:[%s5057_s15 + $0x3c] ss:$24 sps:$4 sm:$0xff]  }
 0xaa5   : > { %2422 = vmatprep.subr.bf16.mxu0 %v4589_v20  ;;  %v4620_v20 = vld [vmem:[%s5057_s15 + $0x38] ss:$24 sps:$4 sm:$0xff]  }
 0xaa8   : > { %2423 = vmatpush1.bf16.msra.mxu0 %v4587_v21  ;;  %v4625_v21 = vld [vmem:[%s5057_s15 + $0x64] ss:$24 sps:$4 sm:$0xff]  }
 0xaa9   : > { %2424 = vmatprep.subr.bf16.mxu0 %v4592_v22  ;;  %v4628_v22 = vld [vmem:[%s5057_s15 + $0x6c] ss:$24 sps:$4 sm:$0xff]  }
 0xaac   : > { %2425 = vmatpush1.bf16.msra.mxu0 %v4590_v25  ;;  %v4626_v25 = vld [vmem:[%s5057_s15 + $0x68] ss:$24 sps:$4 sm:$0xff]  }
 0xaad   : > { %2426 = vmatprep.subr.bf16.mxu0 %v4595_v28  ;;  %v4629_v28 = vld [vmem:[%s5057_s15 + $0x90] ss:$24 sps:$4 sm:$0xff]  }
 0xab0   : > { %2427 = vmatpush1.bf16.msra.mxu0 %v4593_v29  ;;  %v4632_v29 = vld [vmem:[%s5057_s15 + $0x98] ss:$24 sps:$4 sm:$0xff]  }
 0xab1   : > { %2428 = vmatprep.subr.bf16.mxu0 %v4598_v30  ;;  %v4637_v30 = vld [vmem:[%s5057_s15 + $0xc4] ss:$24 sps:$4 sm:$0xff]  }
 0xab4   : > { %2429 = vmatpush1.bf16.msra.mxu0 %v4596_v31  ;;  %v4640_v31 = vld [vmem:[%s5057_s15 + $0xcc] ss:$24 sps:$4 sm:$0xff]  }
 0xab5   : > { %2430 = vmatprep.subr.bf16.mxu0 %v4601_v32  ;;  %v4635_v32 = vld [vmem:[%s5057_s15 + $0xc0] ss:$24 sps:$4 sm:$0xff]  }
 0xab8   : > { %2431 = vmatpush1.bf16.msra.mxu0 %v4599_v33  ;;  %v4638_v33 = vld [vmem:[%s5057_s15 + $0xc8] ss:$24 sps:$4 sm:$0xff]  }
 0xab9   : > { %2432 = vmatprep.subr.bf16.mxu0 %v4604_v6  ;;  %v4643_v6 = vld [vmem:[%s5057_s15 + $0xf4] ss:$24 sps:$4 sm:$0xff]  }
 0xabc   : > { %2433 = vmatpush1.bf16.msra.mxu0 %v4602_v34  ;;  %v4641_v34 = vld [vmem:[%s5057_s15 + $0xf0] ss:$24 sps:$4 sm:$0xff]  }
 0xabd   : > { %2434 = vmatprep.subr.bf16.mxu0 %v4607_v36 }
 0xac0   : > { %2435 = vmatpush1.bf16.msra.mxu0 %v4605_v37 }
 0xac1   : > { %2436 = vmatprep.subr.bf16.mxu0 %v4610_v38 }
 0xac4   : > { %2437 = vmatpush1.bf16.msra.mxu0 %v4608_v15 }
 0xac5   : > { %3041 = vmatprep.subr.bf16.mxu0 %v4616_v13  ;;  %v4673_v13 = vld [vmem:[%s5057_s15 + $0x1e4] ss:$24 sps:$4 sm:$0xff]  }
 0xb22   : > { %v2172_v3 = vpop.xlane.xlu1 %2171 }
 0xb23   : > { %4889 = vrcp.f32 %v2172_v3  ;;  %v4611_v3 = vld [vmem:[%s5057_s15] ss:$24 sps:$4 sm:$0xff]  }
 0xb2d   : > { %v4890_v5 = vpop.eup %4889 }
 0xb2e   : > { %v2174_v7 = vmul.f32 %v4890_v5, %v4886_v60  ;;  %v4921_v60 = vld [vmem:[%s5709_s16 + $0x18] sm:$0xff] }
 0xb2f   : > { %v4613_v5 = vld [vmem:[%s5057_s15 + $0x4] ss:$24 sps:$4 sm:$0xff]  }
 0xb30   : > { %4454 = vmatmul.mubr.msk.f32.vlgmr.msra.gmra.mrb[22].mxu1 %vm1336_vm4, %v2174_v7  ;;  %v4614_v7 = vld [vmem:[%s5057_s15 + $0x8] ss:$24 sps:$4 sm:$0xff]   ;;  %2998 = vmatprep.subr.bf16.mxu1 %v4613_v5  ;;  %v4668_v5 = vld [vmem:[%s5057_s15 + $0x1b8] ss:$24 sps:$4 sm:$0xff]  }
 0xb31   : > { %2999 = vmatpush1.bf16.msra.mxu1 %v4611_v3  ;;  %v4670_v3 = vld [vmem:[%s5057_s15 + $0x1bc] ss:$24 sps:$4 sm:$0xff]  }
 0xb32   : > { %3000 = vmatprep.subr.bf16.mxu1 %v4619_v14  ;;  %v4674_v14 = vld [vmem:[%s5057_s15 + $0x1e8] ss:$24 sps:$4 sm:$0xff]  }
 0xb35   : > { %3001 = vmatpush1.bf16.msra.mxu1 %v4617_v19  ;;  %v4679_v19 = vld [vmem:[%s5057_s15 + $0x214] ss:$24 sps:$4 sm:$0xff]  }
 0xb36   : > { %3002 = vmatprep.subr.bf16.mxu1 %v4625_v21  ;;  %v4677_v21 = vld [vmem:[%s5057_s15 + $0x210] ss:$24 sps:$4 sm:$0xff]  }
 0xb6a   : > { %v1583_v23 = vpop.f32.mrb[10].mxu0 }
 0xb6b   : > { %v4486_v26 = vpack.i.bf16 %v2081_v47, %v1583_v23  ;;  %v4415_v27 = vpop.f32.mrb[11].mxu0  ;;  %v4623_v23 = vld [vmem:[%s5057_s15 + $0x60] ss:$24 sps:$4 sm:$0xff]  }
 0xb6c   : > { %v4634_v27 = vld [vmem:[%s5057_s15 + $0x9c] ss:$24 sps:$4 sm:$0xff]   ;;  %3003 = vmatpush1.bf16.msra.mxu1 %v4623_v23 }
 0xb6d   : > { %4487 = vrot.lane.b32.xlu1 %v4486_v26, %s4934_s21  ;;  %v4631_v26 = vld [vmem:[%s5057_s15 + $0x94] ss:$24 sps:$4 sm:$0xff]  }
 0xb6e   : > { %3004 = vmatprep.subr.bf16.mxu1 %v4631_v26  ;;  %v4685_v23 = vld [vmem:[%s5057_s15 + $0x14] ss:$24 sps:$4 sm:$0xff]  }
 0xb70   : > { %3005 = vmatpush1.bf16.msra.mxu1 %v4629_v28 }
 0xb71   : > { %3006 = vmatprep.subr.bf16.mxu1 %v4637_v30 }
 0xb74   : > { %3007 = vmatpush1.bf16.msra.mxu1 %v4635_v32  ;;  %v2461_v32 = vld [vmem:[%s5713_s4] sm:$0x3] }
 0xb75   : > { %3008 = vmatprep.subr.bf16.mxu1 %v4643_v6 }
 0xb78   : > { %3009 = vmatpush1.bf16.msra.mxu1 %v4641_v34 }
 0xbdf   : > { %v4488_v39 = vpop.permute.xlu1 %4487 }
 0xbe0   : > { %v4490_v40 = vunpack.i.h.bf16 %v4488_v39  ;;  %v4489_v41 = vunpack.i.l.bf16 %v4488_v39 }
 0xbe2   : > { %v2252_v43 = vsel %vm642_vm1, %v5312_v17, %v4490_v40  ;;  %v1754_v44 = vsel %vm642_vm1, %v5340_v18, %v4489_v41  ;;  %v2288_v17 = vrot.slane %v2279_v4, %v5178_v10 }
 0xbe3   : > { %v2253_v8 = vpack.c.bf16 %v2252_v43, %v1754_v44 }
 0xc03   : > { %v2244_v45 = vpop.f32.mrb[22].mxu1 }
 0xc04   : > { %v2254_v46 = vpack.c.bf16 %v2244_v45, %v5290_v49  ;;  %v4455_v47 = vpop.f32.mrb[23].mxu1 }
 0xc06   : > { %4198 = vmatprep.mubr.msk.bf16.mxu0 %vm642_vm1, %v2254_v46 }
 0xc07   : > { %2447 = vmatmul.mubr.bf16.vlgmr.msra.gmra.mrb[12].mxu0 %v2253_v8 }
 0xc08   : > { %3042 = vmatpush1.bf16.msra.mxu0 %v4614_v7  ;;  %v4671_v7 = vld [vmem:[%s5057_s15 + $0x1e0] ss:$24 sps:$4 sm:$0xff]  }
 0xc09   : > { %3043 = vmatprep.subr.bf16.mxu0 %v4622_v16  ;;  %v4676_v16 = vld [vmem:[%s5057_s15 + $0x1ec] ss:$24 sps:$4 sm:$0xff]  }
 0xc0c   : > { %3044 = vmatpush1.bf16.msra.mxu0 %v4620_v20  ;;  %v4682_v20 = vld [vmem:[%s5057_s15 + $0x21c] ss:$24 sps:$4 sm:$0xff]  }
 0xc0d   : > { %3045 = vmatprep.subr.bf16.mxu0 %v4628_v22  ;;  %v4680_v22 = vld [vmem:[%s5057_s15 + $0x218] ss:$24 sps:$4 sm:$0xff]  }
 0xc10   : > { %3046 = vmatpush1.bf16.msra.mxu0 %v4626_v25  ;;  %v4721_v25 = vld [vmem:[%s5067_s3 + $0x104] ss:$8 sps:$4 sm:$0xff]  }
 0xc11   : > { %3047 = vmatprep.subr.bf16.mxu0 %v4634_v27 }
 0xc14   : > { %3048 = vmatpush1.bf16.msra.mxu0 %v4632_v29 }
 0xc15   : > { %3049 = vmatprep.subr.bf16.mxu0 %v4640_v31 }
 0xc18   : > { %3050 = vmatpush1.bf16.msra.mxu0 %v4638_v33 }
 0xcda   : > { %v2448_v57 = vpop.f32.mrb[12].mxu0 }
 0xcdb   : > { %v2449_v50 = vadd.f32 %v2448_v57, %v2284_v48  ;;  %v2450_v18 = vpop.f32.mrb[13].mxu0  ;;  %v4646_v57 = vld [vmem:[%s5057_s15 + $0xfc] ss:$24 sps:$4 sm:$0xff]  }
 0xcdc   : > { %v2451_v51 = vadd.f32 %v2450_v18, %v2288_v17  ;;  %v2452_v52 = vpop.f32.mrb[14].mxu0  ;;  %3051 = vmatprep.subr.bf16.mxu0 %v4646_v57  ;;  %v4649_v18 = vld [vmem:[%s5057_s15 + $0x124] ss:$24 sps:$4 sm:$0xff]  }
 0xcdd   : > { %v2453_v53 = vadd.f32 %v2452_v52, %v2284_v48  ;;  %v2454_v49 = vpop.f32.mrb[15].mxu0  ;;  %v5400_v59 = vadd.f32 %v4920_v24, %v2449_v50  ;;  %v4644_v50 = vld [vmem:[%s5057_s15 + $0xf8] ss:$24 sps:$4 sm:$0xff]   ;;  %v4652_v52 = vld [vmem:[%s5057_s15 + $0x12c] ss:$24 sps:$4 sm:$0xff]   ;;  %3010 = vmatprep.subr.bf16.mxu1 %v4649_v18 }
 0xcde   : > { %v5395_v55 = vadd.f32 %v4919_v54, %v2451_v51  ;;  %v2455_v56 = vadd.f32 %v2454_v49, %v2288_v17  ;;  %3052 = vmatpush1.bf16.msra.mxu0 %v4644_v50  ;;  %v4647_v51 = vld [vmem:[%s5057_s15 + $0x120] ss:$24 sps:$4 sm:$0xff]   ;;  %v4655_v49 = vld [vmem:[%s5057_s15 + $0x154] ss:$24 sps:$4 sm:$0xff]   ;;  %v4653_v54 = vld [vmem:[%s5057_s15 + $0x150] ss:$24 sps:$4 sm:$0xff]  }
 0xcdf   : > { %v5412_v42 = vadd.f32 %v4922_v63, %v2453_v53  ;;  %v4650_v53 = vld [vmem:[%s5057_s15 + $0x128] ss:$24 sps:$4 sm:$0xff]   ;;  %3011 = vmatpush1.bf16.msra.mxu1 %v4647_v51  ;;  %3053 = vmatprep.subr.bf16.mxu0 %v4652_v52  ;;  %v4656_v24 = vld [vmem:[%s5057_s15 + $0x158] ss:$24 sps:$4 sm:$0xff]   ;;  %v4664_v63 = vld [vmem:[%s5057_s15 + $0x18c] ss:$24 sps:$4 sm:$0xff]  }
 0xce0   : > { %v5405_v61 = vadd.f32 %v4921_v60, %v2455_v56  ;;  %v2463_v62 = vsel %vm642_vm1, %v5395_v55, 0.0  ;;  %v4658_v56 = vld [vmem:[%s5057_s15 + $0x15c] ss:$24 sps:$4 sm:$0xff]   ;;  %3012 = vmatprep.subr.bf16.mxu1 %v4655_v49  ;;  %v4683_v51 = vld [vmem:[%s5057_s15 + $0x10] ss:$24 sps:$4 sm:$0xff]  }
 0xce1   : > { %v2464_v0 = vadd.f32 %v2463_v62, %v5400_v59  ;;  %v4661_v60 = vld [vmem:[%s5057_s15 + $0x184] ss:$24 sps:$4 sm:$0xff]   ;;  %v4659_v62 = vld [vmem:[%s5057_s15 + $0x180] ss:$24 sps:$4 sm:$0xff]  }
 0xce2   : > { %v2467_v1 = vsel %vm642_vm1, %v5405_v61, 0.0  ;;  %3054 = vmatpush1.bf16.msra.mxu0 %v4650_v53  ;;  %v4719_v53 = vld [vmem:[%s5067_s3 + $0x100] ss:$8 sps:$4 sm:$0xff]  }
 0xce3   : > { %2465 = vadd.xlane.f32.xlu0 %v2464_v0  ;;  %v2468_v2 = vadd.f32 %v2467_v1, %v5412_v42  ;;  %3013 = vmatpush1.bf16.msra.mxu1 %v4653_v54  ;;  %v4662_v0 = vld [vmem:[%s5057_s15 + $0x188] ss:$24 sps:$4 sm:$0xff]   ;;  %v4667_v1 = vld [vmem:[%s5057_s15 + $0x1b4] ss:$24 sps:$4 sm:$0xff]  }
 0xce4   : > { %3055 = vmatprep.subr.bf16.mxu0 %v4658_v56  ;;  %3014 = vmatprep.subr.bf16.mxu1 %v4661_v60  ;;  %v4686_v49 = vld [vmem:[%s5057_s15 + $0x40] ss:$24 sps:$4 sm:$0xff]   ;;  %v4691_v54 = vld [vmem:[%s5057_s15 + $0x74] ss:$24 sps:$4 sm:$0xff]   ;;  %v4689_v60 = vld [vmem:[%s5057_s15 + $0x70] ss:$24 sps:$4 sm:$0xff]  }
 0xce5   : > { %2469 = vadd.xlane.f32.xlu1 %v2468_v2  ;;  %v4665_v2 = vld [vmem:[%s5057_s15 + $0x1b0] ss:$24 sps:$4 sm:$0xff]  }
 0xce6   : > { %3056 = vmatpush1.bf16.msra.mxu0 %v4656_v24  ;;  %v4725_v56 = vld [vmem:[%s5067_s3 + $0x110] ss:$8 sps:$4 sm:$0xff]   ;;  %v4733_v24 = vld [vmem:[%s5067_s3 + $0x124] ss:$8 sps:$4 sm:$0xff]  }
 0xce7   : > { %3015 = vmatpush1.bf16.msra.mxu1 %v4659_v62  ;;  %3057 = vmatprep.subr.bf16.mxu0 %v4664_v63  ;;  %v4694_v62 = vld [vmem:[%s5057_s15 + $0xa4] ss:$24 sps:$4 sm:$0xff]   ;;  %v4731_v63 = vld [vmem:[%s5067_s3 + $0x120] ss:$8 sps:$4 sm:$0xff]  }
 0xce8   : > { %3016 = vmatprep.subr.bf16.mxu1 %v4667_v1  ;;  %v4692_v1 = vld [vmem:[%s5057_s15 + $0xa0] ss:$24 sps:$4 sm:$0xff]  }
 0xcea   : > { %3058 = vmatpush1.bf16.msra.mxu0 %v4662_v0  ;;  %v4739_v0 = vld [vmem:[%s5067_s3 + $0x134] ss:$8 sps:$4 sm:$0xff]  }
 0xceb   : > { %3017 = vmatpush1.bf16.msra.mxu1 %v4665_v2  ;;  %3059 = vmatprep.subr.bf16.mxu0 %v4670_v3  ;;  %v4697_v2 = vld [vmem:[%s5057_s15 + $0xd4] ss:$24 sps:$4 sm:$0xff]   ;;  %v4737_v3 = vld [vmem:[%s5067_s3 + $0x130] ss:$8 sps:$4 sm:$0xff]  }
 0xcec   : > { %3018 = vmatprep.subr.bf16.mxu1 %v4673_v13  ;;  %v4700_v13 = vld [vmem:[%s5057_s15 + $0x104] ss:$24 sps:$4 sm:$0xff]  }
 0xcee   : > { %3060 = vmatpush1.bf16.msra.mxu0 %v4668_v5  ;;  %v4745_v5 = vld [vmem:[%s5067_s3 + $0x144] ss:$8 sps:$4 sm:$0xff]  }
 0xcef   : > { %3019 = vmatpush1.bf16.msra.mxu1 %v4671_v7  ;;  %3061 = vmatprep.subr.bf16.mxu0 %v4676_v16  ;;  %v4695_v7 = vld [vmem:[%s5057_s15 + $0xd0] ss:$24 sps:$4 sm:$0xff]   ;;  %v4751_v16 = vld [vmem:[%s5067_s3 + $0x154] ss:$8 sps:$4 sm:$0xff]  }
 0xcf0   : > { %3020 = vmatprep.subr.bf16.mxu1 %v4679_v19  ;;  %v4698_v19 = vld [vmem:[%s5057_s15 + $0x100] ss:$24 sps:$4 sm:$0xff]  }
 0xcf2   : > { %3062 = vmatpush1.bf16.msra.mxu0 %v4674_v14  ;;  %v4743_v14 = vld [vmem:[%s5067_s3 + $0x140] ss:$8 sps:$4 sm:$0xff]  }
 0xcf3   : > { %3063 = vmatprep.subr.bf16.mxu0 %v4682_v20  ;;  %3021 = vmatpush1.bf16.msra.mxu1 %v4677_v21  ;;  %v4703_v20 = vld [vmem:[%s5057_s15 + $0x134] ss:$24 sps:$4 sm:$0xff]   ;;  %v4749_v21 = vld [vmem:[%s5067_s3 + $0x150] ss:$8 sps:$4 sm:$0xff]  }
 0xcf4   : > { %3084 = vmatprep.subr.bf16.mxu1 %v4685_v23  ;;  %v4701_v23 = vld [vmem:[%s5057_s15 + $0x130] ss:$24 sps:$4 sm:$0xff]  }
 0xcf6   : > { %3064 = vmatpush1.bf16.msra.mxu0 %v4680_v22  ;;  %v4757_v22 = vld [vmem:[%s5067_s3 + $0x164] ss:$8 sps:$4 sm:$0xff]  }
 0xcf7   : > { %3824 = vmatprep.subr.bf16.mxu0 %v4721_v25  ;;  %v4706_v25 = vld [vmem:[%s5057_s15 + $0x164] ss:$24 sps:$4 sm:$0xff]  }
 0xd70   : > { %v2466_v36 = vpop.xlane.xlu0 %2465 }
 0xd71   : > { %v2471_v37 = vmul.f32 0.0052083335, %v2466_v36  ;;  %v2462_v36 = vld [vmem:[%s5714_s30] sm:$0x3] }
 0xd72   : > { %v2470_v38 = vpop.xlane.xlu1 %2469 }
 0xd73   : > { %v5441_v15 = vsub.f32 %v5400_v59, %v2471_v37  ;;  %v5444_v39 = vsub.f32 %v5395_v55, %v2471_v37  ;;  %v2472_v40 = vmul.f32 0.0052083335, %v2470_v38  ;;  %v2507_v37 = vrot.slane %v2461_v32, %v5178_v10 }
 0xd74   : > { %v2503_v38 = vrot.slane %v2461_v32, %v5181_v11  ;;  %v4707_v32 = vld [vmem:[%s5057_s15 + $0x190] ss:$24 sps:$4 sm:$0xff]  }
 0xd75   : > { %v5447_v41 = vsub.f32 %v5412_v42, %v2472_v40  ;;  %v5450_v43 = vsub.f32 %v5405_v61, %v2472_v40  ;;  %v2477_v44 = vmul.f32 %v5441_v15, %v5441_v15  ;;  %v2478_v8 = vmul.f32 %v5444_v39, %v5444_v39 }
 0xd77   : > { %v2480_v45 = vmul.f32 %v5450_v43, %v5450_v43  ;;  %v2481_v46 = vsel %vm642_vm1, %v2478_v8, 0.0  ;;  %v2479_v4 = vmul.f32 %v5447_v41, %v5447_v41  ;;  %v2518_v8 = vrot.slane %v2462_v36, %v5181_v11 }
 0xd78   : > { %v2482_v47 = vadd.f32 %v2481_v46, %v2477_v44  ;;  %v2522_v44 = vrot.slane %v2462_v36, %v5178_v10  ;;  %v4710_v36 = vld [vmem:[%s5057_s15 + $0x1c0] ss:$24 sps:$4 sm:$0xff]  }
 0xd79   : > { %v2485_v48 = vsel %vm642_vm1, %v2480_v45, 0.0 }
 0xd7a   : > { %2483 = vadd.xlane.f32.xlu0 %v2482_v47  ;;  %v2486_v17 = vadd.f32 %v2485_v48, %v2479_v4 }
 0xd7e   : > { %2487 = vadd.xlane.f32.xlu0 %v2486_v17 }
 0xe07   : > { %v2484_v26 = vpop.xlane.xlu0 %2483 }
 0xe08   : > { %v2489_v27 = vmul.f32 0.0052083335, %v2484_v26  ;;  %v4755_v26 = vld [vmem:[%s5067_s3 + $0x160] ss:$8 sps:$4 sm:$0xff]  }
 0xe0a   : > { %v2491_v28 = vadd.f32 1e-06, %v2489_v27  ;;  %v4763_v27 = vld [vmem:[%s5067_s3 + $0x174] ss:$8 sps:$4 sm:$0xff]  }
 0xe0b   : > { %v2488_v29 = vpop.xlane.xlu0 %2487 }
 0xe0c   : > { %4891 = vrsqrt.f32 %v2491_v28  ;;  %v2490_v30 = vmul.f32 0.0052083335, %v2488_v29  ;;  %v4704_v28 = vld [vmem:[%s5057_s15 + $0x160] ss:$24 sps:$4 sm:$0xff]   ;;  %v4709_v29 = vld [vmem:[%s5057_s15 + $0x194] ss:$24 sps:$4 sm:$0xff]  }
 0xe0e   : > { %v2492_v31 = vadd.f32 1e-06, %v2490_v30  ;;  %v4761_v30 = vld [vmem:[%s5067_s3 + $0x170] ss:$8 sps:$4 sm:$0xff]  }
 0xe10   : > { %4893 = vrsqrt.f32 %v2492_v31  ;;  %v4769_v31 = vld [vmem:[%s5067_s3 + $0x184] ss:$8 sps:$4 sm:$0xff]  }
 0xe16   : > { %v4892_v33 = vpop.eup %4891 }
 0xe17   : > { %v2495_v6 = vmul.f32 %v4892_v33, %v5441_v15  ;;  %v2496_v34 = vmul.f32 %v4892_v33, %v5444_v39  ;;  %v4712_v33 = vld [vmem:[%s5057_s15 + $0x1c4] ss:$24 sps:$4 sm:$0xff]  }
 0xe19   : > { %v2511_v45 = vmul.f32 %v2507_v37, %v2496_v34  ;;  %v2510_v46 = vmul.f32 %v2503_v38, %v2495_v6  ;;  %v4767_v6 = vld [vmem:[%s5067_s3 + $0x180] ss:$8 sps:$4 sm:$0xff]   ;;  %v4775_v34 = vld [vmem:[%s5067_s3 + $0x194] ss:$8 sps:$4 sm:$0xff]  }
 0xe1a   : > { %v4894_v40 = vpop.eup %4893 }
 0xe1b   : > { %v2497_v15 = vmul.f32 %v4894_v40, %v5447_v41  ;;  %v2498_v39 = vmul.f32 %v4894_v40, %v5450_v43  ;;  %v2526_v48 = vadd.f32 %v2522_v44, %v2511_v45  ;;  %v2525_v57 = vadd.f32 %v2518_v8, %v2510_v46  ;;  %v4688_v41 = vld [vmem:[%s5057_s15 + $0x44] ss:$24 sps:$4 sm:$0xff]   ;;  %v4713_v40 = vld [vmem:[%s5057_s15 + $0x1f0] ss:$24 sps:$4 sm:$0xff]  }
 0xe1c   : > { %v4727_v43 = vld [vmem:[%s5067_s3 + $0x114] ss:$8 sps:$4 sm:$0xff]   ;;  %v4728_v46 = vld [vmem:[%s5067_s3 + $0x10] ss:$8 sps:$4 sm:$0xff]  }
 0xe1d   : > { %v2513_v47 = vmul.f32 %v2507_v37, %v2498_v39  ;;  %v2512_v4 = vmul.f32 %v2503_v38, %v2497_v15  ;;  %v4715_v37 = vld [vmem:[%s5057_s15 + $0x1f4] ss:$24 sps:$4 sm:$0xff]   ;;  %v4773_v38 = vld [vmem:[%s5067_s3 + $0x190] ss:$8 sps:$4 sm:$0xff]   ;;  %v4722_v39 = vld [vmem:[%s5067_s3] ss:$8 sps:$4 sm:$0xff]  }
 0xe1e   : > { %v4724_v15 = vld [vmem:[%s5067_s3 + $0x4] ss:$8 sps:$4 sm:$0xff]   ;;  %v4730_v45 = vld [vmem:[%s5067_s3 + $0x14] ss:$8 sps:$4 sm:$0xff]  }
 0xe1f   : > { %v2528_v17 = vadd.f32 %v2522_v44, %v2513_v47  ;;  %v2527_v50 = vadd.f32 %v2518_v8, %v2512_v4  ;;  %v4718_v44 = vld [vmem:[%s5057_s15 + $0x224] ss:$24 sps:$4 sm:$0xff]   ;;  %v4716_v8 = vld [vmem:[%s5057_s15 + $0x220] ss:$24 sps:$4 sm:$0xff]  }
 0xe20   : > { %v4736_v47 = vld [vmem:[%s5067_s3 + $0x24] ss:$8 sps:$4 sm:$0xff]   ;;  %v4734_v4 = vld [vmem:[%s5067_s3 + $0x20] ss:$8 sps:$4 sm:$0xff]  }
 0xe21   : > { %v2530_v18 = vpack.c.bf16 %v2528_v17, %v2526_v48  ;;  %v5509_v52 = vpack.c.bf16 %v2527_v50, %v2525_v57  ;;  %v4742_v48 = vld [vmem:[%s5067_s3 + $0x34] ss:$8 sps:$4 sm:$0xff]   ;;  %v4740_v17 = vld [vmem:[%s5067_s3 + $0x30] ss:$8 sps:$4 sm:$0xff]   ;;  %v4748_v57 = vld [vmem:[%s5067_s3 + $0x44] ss:$8 sps:$4 sm:$0xff]  }
 0xe22   : > { %v4746_v50 = vld [vmem:[%s5067_s3 + $0x40] ss:$8 sps:$4 sm:$0xff]  }
 0xe23   : > { %4271 = vmatprep.mubr.msk.bf16.mxu1 %vm642_vm1, %v2530_v18  ;;  %4272 = vmatprep.mubr.msk.bf16.mxu0 %vm642_vm1, %v2530_v18 }
 0xe24   : > { %3031 = vmatmul.mubr.bf16.vlgmr.msra.gmra.mrb[24].mxu1 %v5509_v52  ;;  %3074 = vmatmul.mubr.bf16.vlgmr.msra.gmra.mrb[16].mxu0 %v5509_v52 }
 0xe25   : > { %3085 = vmatpush1.bf16.msra.mxu1 %v4683_v51  ;;  %4273 = vmatprep.mubr.msk.bf16.mxu1 %vm642_vm1, %v2530_v18  ;;  %v4754_v18 = vld [vmem:[%s5067_s3 + $0x54] ss:$8 sps:$4 sm:$0xff]   ;;  %v4752_v51 = vld [vmem:[%s5067_s3 + $0x50] ss:$8 sps:$4 sm:$0xff]  }
 0xe26   : > { %3086 = vmatprep.subr.bf16.mxu1 %v4688_v41  ;;  %3825 = vmatpush1.bf16.msra.mxu0 %v4719_v53  ;;  %v4758_v41 = vld [vmem:[%s5067_s3 + $0x60] ss:$8 sps:$4 sm:$0xff]   ;;  %v4766_v53 = vld [vmem:[%s5067_s3 + $0x74] ss:$8 sps:$4 sm:$0xff]  }
 0xe27   : > { %3826 = vmatprep.subr.bf16.mxu0 %v4727_v43  ;;  %v4764_v43 = vld [vmem:[%s5067_s3 + $0x70] ss:$8 sps:$4 sm:$0xff]  }
 0xe29   : > { %3087 = vmatpush1.bf16.msra.mxu1 %v4686_v49  ;;  %v4772_v49 = vld [vmem:[%s5067_s3 + $0x84] ss:$8 sps:$4 sm:$0xff]  }
 0xe2a   : > { %3088 = vmatprep.subr.bf16.mxu1 %v4691_v54  ;;  %3827 = vmatpush1.bf16.msra.mxu0 %v4725_v56  ;;  %v4770_v54 = vld [vmem:[%s5067_s3 + $0x80] ss:$8 sps:$4 sm:$0xff]   ;;  %v4778_v56 = vld [vmem:[%s5067_s3 + $0x94] ss:$8 sps:$4 sm:$0xff]  }
 0xe2b   : > { %3828 = vmatprep.subr.bf16.mxu0 %v4733_v24  ;;  %v4776_v24 = vld [vmem:[%s5067_s3 + $0x90] ss:$8 sps:$4 sm:$0xff]  }
 0xe2d   : > { %3089 = vmatpush1.bf16.msra.mxu1 %v4689_v60  ;;  %v4781_v60 = vld [vmem:[%s5067_s3 + $0x1a4] ss:$8 sps:$4 sm:$0xff]  }
 0xe2e   : > { %3090 = vmatprep.subr.bf16.mxu1 %v4694_v62  ;;  %3829 = vmatpush1.bf16.msra.mxu0 %v4731_v63  ;;  %v4779_v62 = vld [vmem:[%s5067_s3 + $0x1a0] ss:$8 sps:$4 sm:$0xff]   ;;  %v4784_v63 = vld [vmem:[%s5067_s3 + $0xa4] ss:$8 sps:$4 sm:$0xff]  }
 0xe2f   : > { %3830 = vmatprep.subr.bf16.mxu0 %v4739_v0  ;;  %v4782_v0 = vld [vmem:[%s5067_s3 + $0xa0] ss:$8 sps:$4 sm:$0xff]  }
 0xe31   : > { %3091 = vmatpush1.bf16.msra.mxu1 %v4692_v1  ;;  %v4787_v1 = vld [vmem:[%s5067_s3 + $0x1b4] ss:$8 sps:$4 sm:$0xff]  }
 0xe32   : > { %3092 = vmatprep.subr.bf16.mxu1 %v4697_v2  ;;  %3831 = vmatpush1.bf16.msra.mxu0 %v4737_v3  ;;  %v4785_v2 = vld [vmem:[%s5067_s3 + $0x1b0] ss:$8 sps:$4 sm:$0xff]   ;;  %v4790_v3 = vld [vmem:[%s5067_s3 + $0xb4] ss:$8 sps:$4 sm:$0xff]  }
 0xe33   : > { %3832 = vmatprep.subr.bf16.mxu0 %v4745_v5  ;;  %v4788_v5 = vld [vmem:[%s5067_s3 + $0xb0] ss:$8 sps:$4 sm:$0xff]  }
 0xe35   : > { %3093 = vmatpush1.bf16.msra.mxu1 %v4695_v7  ;;  %v4793_v7 = vld [vmem:[%s5067_s3 + $0x1c4] ss:$8 sps:$4 sm:$0xff]  }
 0xe36   : > { %3094 = vmatprep.subr.bf16.mxu1 %v4700_v13  ;;  %3833 = vmatpush1.bf16.msra.mxu0 %v4743_v14  ;;  %v4791_v13 = vld [vmem:[%s5067_s3 + $0x1c0] ss:$8 sps:$4 sm:$0xff]   ;;  %v4796_v14 = vld [vmem:[%s5067_s3 + $0xc4] ss:$8 sps:$4 sm:$0xff]  }
 0xe37   : > { %3834 = vmatprep.subr.bf16.mxu0 %v4751_v16  ;;  %v4794_v16 = vld [vmem:[%s5067_s3 + $0xc0] ss:$8 sps:$4 sm:$0xff]  }
 0xe39   : > { %3095 = vmatpush1.bf16.msra.mxu1 %v4698_v19  ;;  %v4799_v19 = vld [vmem:[%s5067_s3 + $0x1d4] ss:$8 sps:$4 sm:$0xff]  }
 0xe3a   : > { %3096 = vmatprep.subr.bf16.mxu1 %v4703_v20  ;;  %3835 = vmatpush1.bf16.msra.mxu0 %v4749_v21  ;;  %v4797_v20 = vld [vmem:[%s5067_s3 + $0x1d0] ss:$8 sps:$4 sm:$0xff]   ;;  %v4802_v21 = vld [vmem:[%s5067_s3 + $0xd4] ss:$8 sps:$4 sm:$0xff]  }
 0xe3b   : > { %3836 = vmatprep.subr.bf16.mxu0 %v4757_v22  ;;  %v4800_v22 = vld [vmem:[%s5067_s3 + $0xd0] ss:$8 sps:$4 sm:$0xff]  }
 0xe3d   : > { %3097 = vmatpush1.bf16.msra.mxu1 %v4701_v23  ;;  %v4805_v23 = vld [vmem:[%s5067_s3 + $0x1e4] ss:$8 sps:$4 sm:$0xff]  }
 0xe3e   : > { %3098 = vmatprep.subr.bf16.mxu1 %v4706_v25  ;;  %3837 = vmatpush1.bf16.msra.mxu0 %v4755_v26  ;;  %v4803_v25 = vld [vmem:[%s5067_s3 + $0x1e0] ss:$8 sps:$4 sm:$0xff]   ;;  %v4808_v26 = vld [vmem:[%s5067_s3 + $0xe4] ss:$8 sps:$4 sm:$0xff]  }
 0xe3f   : > { %3838 = vmatprep.subr.bf16.mxu0 %v4763_v27  ;;  %v4806_v27 = vld [vmem:[%s5067_s3 + $0xe0] ss:$8 sps:$4 sm:$0xff]  }
 0xe41   : > { %3099 = vmatpush1.bf16.msra.mxu1 %v4704_v28  ;;  %v4811_v28 = vld [vmem:[%s5067_s3 + $0x1f4] ss:$8 sps:$4 sm:$0xff]  }
 0xe42   : > { %3100 = vmatprep.subr.bf16.mxu1 %v4709_v29  ;;  %3839 = vmatpush1.bf16.msra.mxu0 %v4761_v30  ;;  %v4809_v29 = vld [vmem:[%s5067_s3 + $0x1f0] ss:$8 sps:$4 sm:$0xff]   ;;  %v4814_v30 = vld [vmem:[%s5067_s3 + $0xf4] ss:$8 sps:$4 sm:$0xff]  }
 0xe43   : > { %3840 = vmatprep.subr.bf16.mxu0 %v4769_v31  ;;  %v4812_v31 = vld [vmem:[%s5067_s3 + $0xf0] ss:$8 sps:$4 sm:$0xff]  }
 0xe45   : > { %3101 = vmatpush1.bf16.msra.mxu1 %v4707_v32  ;;  %v4817_v32 = vld [vmem:[%s5067_s3 + $0x204] ss:$8 sps:$4 sm:$0xff]  }
 0xe46   : > { %3102 = vmatprep.subr.bf16.mxu1 %v4712_v33  ;;  %3841 = vmatpush1.bf16.msra.mxu0 %v4767_v6  ;;  %v5604_v33 = vld [vmem:[%s5062_s23] sm:$0x3f] }
 0xe47   : > { %3842 = vmatprep.subr.bf16.mxu0 %v4775_v34  ;;  %v2608_v6 = vrot.slane %v5604_v33, %v5181_v11  ;;  %v2616_v34 = vrot.slane %v5604_v33, %v796_v12 }
 0xe49   : > { %3103 = vmatpush1.bf16.msra.mxu1 %v4710_v36  ;;  %v2612_v36 = vrot.slane %v5604_v33, %v5178_v10 }
 0xe4a   : > { %3104 = vmatprep.subr.bf16.mxu1 %v4715_v37  ;;  %3843 = vmatpush1.bf16.msra.mxu0 %v4773_v38  ;;  %v2620_v37 = vrot.slane %v5604_v33, %v800_v35 }
 0xe4b   : > { %3844 = vmatprep.subr.bf16.mxu0 %v4781_v60 }
 0xe4d   : > { %3105 = vmatpush1.bf16.msra.mxu1 %v4713_v40 }
 0xe4e   : > { %3106 = vmatprep.subr.bf16.mxu1 %v4718_v44  ;;  %3845 = vmatpush1.bf16.msra.mxu0 %v4779_v62 }
 0xe4f   : > { %3846 = vmatprep.subr.bf16.mxu0 %v4787_v1 }
 0xe51   : > { %3107 = vmatpush1.bf16.msra.mxu1 %v4716_v8 }
 0xe52   : > { %3781 = vmatprep.subr.bf16.mxu1 %v4724_v15  ;;  %3847 = vmatpush1.bf16.msra.mxu0 %v4785_v2 }
 0xe53   : > { %3848 = vmatprep.subr.bf16.mxu0 %v4793_v7 }
 0xe54   : > { %3117 = vmatmul.mubr.bf16.vlgmr.msra.gmra.mrb[28].mxu1 %v5509_v52  ;;  %v4760_v52 = vld [vmem:[%s5067_s3 + $0x64] ss:$8 sps:$4 sm:$0xff]  }
 0xe55   : > { %3782 = vmatpush1.bf16.msra.mxu1 %v4722_v39 }
 0xe56   : > { %3783 = vmatprep.subr.bf16.mxu1 %v4730_v45  ;;  %3849 = vmatpush1.bf16.msra.mxu0 %v4791_v13 }
 0xe57   : > { %3850 = vmatprep.subr.bf16.mxu0 %v4799_v19 }
 0xe59   : > { %3784 = vmatpush1.bf16.msra.mxu1 %v4728_v46 }
 0xe5a   : > { %3785 = vmatprep.subr.bf16.mxu1 %v4736_v47  ;;  %3851 = vmatpush1.bf16.msra.mxu0 %v4797_v20 }
 0xe5b   : > { %3852 = vmatprep.subr.bf16.mxu0 %v4805_v23 }
 0xe5d   : > { %3786 = vmatpush1.bf16.msra.mxu1 %v4734_v4 }
 0xe5e   : > { %3787 = vmatprep.subr.bf16.mxu1 %v4742_v48  ;;  %3853 = vmatpush1.bf16.msra.mxu0 %v4803_v25 }
 0xe5f   : > { %3854 = vmatprep.subr.bf16.mxu0 %v4811_v28 }
 0xe61   : > { %3788 = vmatpush1.bf16.msra.mxu1 %v4740_v17 }
 0xe62   : > { %3789 = vmatprep.subr.bf16.mxu1 %v4748_v57  ;;  %3855 = vmatpush1.bf16.msra.mxu0 %v4809_v29 }
 0xe63   : > { %3867 = vmatprep.subr.bf16.mxu0 %v4817_v32 }
 0xe65   : > { %3790 = vmatpush1.bf16.msra.mxu1 %v4746_v50 }
 0xe66   : > { %3791 = vmatprep.subr.bf16.mxu1 %v4754_v18 }
 0xe69   : > { %3792 = vmatpush1.bf16.msra.mxu1 %v4752_v51 }
 0xe6a   : > { %3793 = vmatprep.subr.bf16.mxu1 %v4760_v52 }
 0xe6d   : > { %3794 = vmatpush1.bf16.msra.mxu1 %v4758_v41 }
 0xe6e   : > { %3795 = vmatprep.subr.bf16.mxu1 %v4766_v53 }
 0xe71   : > { %3796 = vmatpush1.bf16.msra.mxu1 %v4764_v43 }
 0xe72   : > { %3797 = vmatprep.subr.bf16.mxu1 %v4772_v49 }
 0xe75   : > { %3798 = vmatpush1.bf16.msra.mxu1 %v4770_v54 }
 0xe76   : > { %3799 = vmatprep.subr.bf16.mxu1 %v4778_v56 }
 0xe79   : > { %3800 = vmatpush1.bf16.msra.mxu1 %v4776_v24 }
 0xe7a   : > { %3801 = vmatprep.subr.bf16.mxu1 %v4784_v63 }
 0xe7d   : > { %3802 = vmatpush1.bf16.msra.mxu1 %v4782_v0 }
 0xe7e   : > { %3803 = vmatprep.subr.bf16.mxu1 %v4790_v3 }
 0xe81   : > { %3804 = vmatpush1.bf16.msra.mxu1 %v4788_v5 }
 0xe82   : > { %3805 = vmatprep.subr.bf16.mxu1 %v4796_v14 }
 0xe85   : > { %3806 = vmatpush1.bf16.msra.mxu1 %v4794_v16 }
 0xe86   : > { %3807 = vmatprep.subr.bf16.mxu1 %v4802_v21 }
 0xe89   : > { %3808 = vmatpush1.bf16.msra.mxu1 %v4800_v22 }
 0xe8a   : > { %3809 = vmatprep.subr.bf16.mxu1 %v4808_v26 }
 0xe8d   : > { %3810 = vmatpush1.bf16.msra.mxu1 %v4806_v27 }
 0xe8e   : > { %3811 = vmatprep.subr.bf16.mxu1 %v4814_v30 }
 0xe91   : > { %3812 = vmatpush1.bf16.msra.mxu1 %v4812_v31 }
 0xef7   : > { %v3032_v38 = vpop.f32.mrb[24].mxu1  ;;  %v3075_v40 = vpop.f32.mrb[16].mxu0 }
 0xef8   : > { %v3033_v44 = vadd.f32 %v3032_v38, %v2608_v6  ;;  %v3076_v8 = vadd.f32 %v3075_v40, %v2616_v34  ;;  %v3034_v15 = vpop.f32.mrb[25].mxu1  ;;  %v3077_v39 = vpop.f32.mrb[17].mxu0 }
 0xef9   : > { %v3035_v45 = vadd.f32 %v3034_v15, %v2612_v36  ;;  %v3078_v46 = vadd.f32 %v3077_v39, %v2620_v37  ;;  %v3036_v47 = vpop.f32.mrb[26].mxu1  ;;  %v3079_v4 = vpop.f32.mrb[18].mxu0  ;;  %v4815_v39 = vld [vmem:[%s5067_s3 + $0x200] ss:$8 sps:$4 sm:$0xff]  }
 0xefa   : > { %v3139_v48 = vmul.f32 0.70710677, %v3033_v44  ;;  %v3141_v17 = vmul.f32 0.70710677, %v3076_v8  ;;  %v3037_v50 = vadd.f32 %v3036_v47, %v2608_v6  ;;  %v3080_v18 = vadd.f32 %v3079_v4, %v2616_v34  ;;  %v3038_v51 = vpop.f32.mrb[27].mxu1  ;;  %v3081_v52 = vpop.f32.mrb[19].mxu0 }
 0xefb   : > { %v3140_v12 = vmul.f32 0.70710677, %v3035_v45  ;;  %v3142_v57 = vmul.f32 0.70710677, %v3078_v46  ;;  %v3039_v35 = vadd.f32 %v3038_v51, %v2612_v36  ;;  %v3082_v41 = vadd.f32 %v3081_v52, %v2620_v37  ;;  %v4823_v47 = vld [vmem:[%s5067_s3 + $0x224] ss:$8 sps:$4 sm:$0xff]  }
 0xefc   : > { %4895 = verf.f32 %v3139_v48  ;;  %v3145_v53 = vmul.f32 0.70710677, %v3037_v50  ;;  %v3147_v43 = vmul.f32 0.70710677, %v3080_v18  ;;  %v3127_v1 = vmul.f32 0.5, %v3033_v44 }
 0xefd   : > { %4897 = verf.f32 %v3141_v17  ;;  %v3146_v49 = vmul.f32 0.70710677, %v3039_v35  ;;  %v3148_v54 = vmul.f32 0.70710677, %v3082_v41  ;;  %v3129_v2 = vmul.f32 0.5, %v3076_v8 }
 0xefe   : > { %4899 = verf.f32 %v3140_v12  ;;  %v3128_v7 = vmul.f32 0.5, %v3035_v45  ;;  %v3133_v14 = vmul.f32 0.5, %v3037_v50  ;;  %v3130_v20 = vmul.f32 0.5, %v3078_v46  ;;  %v4820_v45 = vld [vmem:[%s5067_s3 + $0x214] ss:$8 sps:$4 sm:$0xff]  }
 0xeff   : > { %4901 = verf.f32 %v3142_v57  ;;  %v3135_v22 = vmul.f32 0.5, %v3080_v18  ;;  %v3134_v28 = vmul.f32 0.5, %v3039_v35  ;;  %v3136_v32 = vmul.f32 0.5, %v3082_v41  ;;  %v4818_v46 = vld [vmem:[%s5067_s3 + $0x210] ss:$8 sps:$4 sm:$0xff]  }
 0xf00   : > { %4903 = verf.f32 %v3145_v53  ;;  %v4821_v4 = vld [vmem:[%s5067_s3 + $0x220] ss:$8 sps:$4 sm:$0xff]   ;;  %v4826_v48 = vld [vmem:[%s5067_s3 + $0x234] ss:$8 sps:$4 sm:$0xff]   ;;  %v4824_v17 = vld [vmem:[%s5067_s3 + $0x230] ss:$8 sps:$4 sm:$0xff]   ;;  %v2624_v51 = vrot.slane %v5604_v33, %v804_v58 }
 0xf01   : > { %4905 = verf.f32 %v3147_v43  ;;  %v4829_v12 = vld [vmem:[%s5067_s3 + $0x244] ss:$8 sps:$4 sm:$0xff]   ;;  %v2627_v57 = vsub.s32 5, %v5175_v9  ;;  %v4827_v50 = vld [vmem:[%s5067_s3 + $0x240] ss:$8 sps:$4 sm:$0xff]  }
 0xf02   : > { %4907 = verf.f32 %v3146_v49  ;;  %v4832_v18 = vld [vmem:[%s5067_s3 + $0x254] ss:$8 sps:$4 sm:$0xff]   ;;  %v4830_v35 = vld [vmem:[%s5067_s3 + $0x250] ss:$8 sps:$4 sm:$0xff]   ;;  %v4835_v53 = vld [vmem:[%s5067_s3 + $0x264] ss:$8 sps:$4 sm:$0xff]  }
 0xf03   : > { %4909 = verf.f32 %v3148_v54  ;;  %v2628_v52 = vrot.slane %v5604_v33, %v2627_v57  ;;  %v4833_v9 = vld [vmem:[%s5067_s3 + $0x260] ss:$8 sps:$4 sm:$0xff]  }
 0xf06   : > { %v4896_v56 = vpop.eup %4895 }
 0xf07   : > { %v4898_v24 = vpop.eup %4897  ;;  %v3163_v63 = vadd.f32 1.0, %v4896_v56 }
 0xf08   : > { %v4900_v60 = vpop.eup %4899  ;;  %v3165_v3 = vadd.f32 1.0, %v4898_v24 }
 0xf09   : > { %v4902_v62 = vpop.eup %4901  ;;  %v3164_v13 = vadd.f32 1.0, %v4900_v60  ;;  %v3175_v26 = vmul.f32 %v3163_v63, %v3127_v1  ;;  %v4838_v63 = vld [vmem:[%s5067_s3 + $0x274] ss:$8 sps:$4 sm:$0xff]  }
 0xf0a   : > { %v4904_v0 = vpop.eup %4903  ;;  %v3166_v21 = vadd.f32 1.0, %v4902_v62  ;;  %v3177_v30 = vmul.f32 %v3165_v3, %v3129_v2  ;;  %v4836_v2 = vld [vmem:[%s5067_s3 + $0x270] ss:$8 sps:$4 sm:$0xff]   ;;  %v4841_v3 = vld [vmem:[%s5067_s3 + $0x284] ss:$8 sps:$4 sm:$0xff]  }
 0xf0b   : > { %v4906_v5 = vpop.eup %4905  ;;  %v3169_v16 = vadd.f32 1.0, %v4904_v0  ;;  %v3176_v34 = vmul.f32 %v3164_v13, %v3128_v7  ;;  %v4844_v7 = vld [vmem:[%s5067_s3 + $0x294] ss:$8 sps:$4 sm:$0xff]  }
 0xf0c   : > { %v4908_v19 = vpop.eup %4907  ;;  %v3171_v23 = vadd.f32 1.0, %v4906_v5  ;;  %v3178_v38 = vmul.f32 %v3166_v21, %v3130_v20  ;;  %v4839_v5 = vld [vmem:[%s5067_s3 + $0x280] ss:$8 sps:$4 sm:$0xff]   ;;  %v4847_v20 = vld [vmem:[%s5067_s3 + $0x2a4] ss:$8 sps:$4 sm:$0xff]  }
 0xf0d   : > { %v4910_v25 = vpop.eup %4909  ;;  %v3181_v27 = vmul.f32 %v3169_v16, %v3133_v14  ;;  %v3170_v29 = vadd.f32 1.0, %v4908_v19  ;;  %v4842_v14 = vld [vmem:[%s5067_s3 + $0x290] ss:$8 sps:$4 sm:$0xff]  }
 0xf0e   : > { %v3183_v31 = vmul.f32 %v3171_v23, %v3135_v22  ;;  %v3172_v6 = vadd.f32 1.0, %v4910_v25 }
 0xf0f   : > { %v3187_v36 = vpack.c.bf16 %v3181_v27, %v3175_v26  ;;  %v3182_v37 = vmul.f32 %v3170_v29, %v3134_v28 }
 0xf10   : > { %v3189_v40 = vpack.c.bf16 %v3183_v31, %v3177_v30  ;;  %v3184_v44 = vmul.f32 %v3172_v6, %v3136_v32  ;;  %v4845_v31 = vld [vmem:[%s5067_s3 + $0x2a0] ss:$8 sps:$4 sm:$0xff]  }
 0xf11   : > { %v3188_v8 = vpack.c.bf16 %v3182_v37, %v3176_v34  ;;  %v4850_v34 = vld [vmem:[%s5067_s3 + $0x2b4] ss:$8 sps:$4 sm:$0xff]  }
 0xf12   : > { %v3190_v15 = vpack.c.bf16 %v3184_v44, %v3178_v38 }
 0xf13   : > { %3813 = vmatprep.mubr.bf16.mxu1 %v3188_v8  ;;  %v4853_v8 = vld [vmem:[%s5067_s3 + $0x2c4] ss:$8 sps:$4 sm:$0xff]  }
 0xf14   : > { %3856 = vmatprep.mubr.bf16.mxu0 %v3190_v15  ;;  %3814 = vmatmul.mubr.bf16.vlgmr.msra.gmra.mrb[32].mxu1 %v3187_v36  ;;  %v4851_v15 = vld [vmem:[%s5067_s3 + $0x2c0] ss:$8 sps:$4 sm:$0xff]  }
 0xf15   : > { %3857 = vmatmul.mubr.bf16.vlgmr.msra.gmra.mrb[20].mxu0 %v3189_v40  ;;  %v4848_v40 = vld [vmem:[%s5067_s3 + $0x2b0] ss:$8 sps:$4 sm:$0xff]  }
 0xf16   : > { %3868 = vmatpush1.bf16.msra.mxu0 %v4815_v39  ;;  %v4856_v39 = vld [vmem:[%s5067_s3 + $0x2d4] ss:$8 sps:$4 sm:$0xff]  }
 0xf17   : > { %3869 = vmatprep.subr.bf16.mxu0 %v4820_v45  ;;  %v4854_v45 = vld [vmem:[%s5067_s3 + $0x2d0] ss:$8 sps:$4 sm:$0xff]  }
 0xf1a   : > { %3870 = vmatpush1.bf16.msra.mxu0 %v4818_v46  ;;  %v4859_v46 = vld [vmem:[%s5067_s3 + $0x2e4] ss:$8 sps:$4 sm:$0xff]  }
 0xf1b   : > { %3871 = vmatprep.subr.bf16.mxu0 %v4823_v47  ;;  %v4857_v47 = vld [vmem:[%s5067_s3 + $0x2e0] ss:$8 sps:$4 sm:$0xff]  }
 0xf1e   : > { %3872 = vmatpush1.bf16.msra.mxu0 %v4821_v4  ;;  %v4862_v4 = vld [vmem:[%s5067_s3 + $0x2f4] ss:$8 sps:$4 sm:$0xff]  }
 0xf1f   : > { %3873 = vmatprep.subr.bf16.mxu0 %v4826_v48  ;;  %v4860_v48 = vld [vmem:[%s5067_s3 + $0x2f0] ss:$8 sps:$4 sm:$0xff]  }
 0xf22   : > { %3874 = vmatpush1.bf16.msra.mxu0 %v4824_v17 }
 0xf23   : > { %3875 = vmatprep.subr.bf16.mxu0 %v4829_v12 }
 0xf26   : > { %3876 = vmatpush1.bf16.msra.mxu0 %v4827_v50 }
 0xf27   : > { %3877 = vmatprep.subr.bf16.mxu0 %v4832_v18  ;;  %v3118_v41 = vpop.f32.mrb[28].mxu1  ;;  %v3289_v18 = vld [vmem:[%s5715_s29] sm:$0x3] }
 0xf28   : > { %v3119_v43 = vadd.f32 %v3118_v41, %v2624_v51  ;;  %v3120_v49 = vpop.f32.mrb[29].mxu1 }
 0xf29   : > { %v3121_v54 = vadd.f32 %v3120_v49, %v2628_v52  ;;  %v3122_v56 = vpop.f32.mrb[30].mxu1 }
 0xf2a   : > { %3878 = vmatpush1.bf16.msra.mxu0 %v4830_v35  ;;  %v3143_v24 = vmul.f32 0.70710677, %v3119_v43  ;;  %v3123_v60 = vadd.f32 %v3122_v56, %v2624_v51  ;;  %v3124_v62 = vpop.f32.mrb[31].mxu1  ;;  %v3131_v25 = vmul.f32 0.5, %v3119_v43  ;;  %v3294_v51 = vrot.slane %v3289_v18, %v5181_v11 }
 0xf2b   : > { %v3144_v58 = vmul.f32 0.70710677, %v3121_v54  ;;  %3879 = vmatprep.subr.bf16.mxu0 %v4835_v53  ;;  %v3125_v33 = vadd.f32 %v3124_v62, %v2628_v52  ;;  %v3132_v28 = vmul.f32 0.5, %v3121_v54  ;;  %v3298_v52 = vrot.slane %v3289_v18, %v5178_v10 }
 0xf2c   : > { %4911 = verf.f32 %v3143_v24  ;;  %v3149_v0 = vmul.f32 0.70710677, %v3123_v60  ;;  %v3137_v26 = vmul.f32 0.5, %v3123_v60 }
 0xf2d   : > { %4913 = verf.f32 %v3144_v58  ;;  %v3150_v1 = vmul.f32 0.70710677, %v3125_v33  ;;  %v3138_v29 = vmul.f32 0.5, %v3125_v33 }
 0xf2e   : > { %4915 = verf.f32 %v3149_v0  ;;  %3880 = vmatpush1.bf16.msra.mxu0 %v4833_v9 }
 0xf2f   : > { %4917 = verf.f32 %v3150_v1  ;;  %3881 = vmatprep.subr.bf16.mxu0 %v4838_v63 }
 0xf32   : > { %3882 = vmatpush1.bf16.msra.mxu0 %v4836_v2 }
 0xf33   : > { %3883 = vmatprep.subr.bf16.mxu0 %v4841_v3 }
 0xf36   : > { %v4912_v13 = vpop.eup %4911  ;;  %3884 = vmatpush1.bf16.msra.mxu0 %v4839_v5 }
 0xf37   : > { %v4914_v16 = vpop.eup %4913  ;;  %v3167_v19 = vadd.f32 1.0, %v4912_v13  ;;  %3885 = vmatprep.subr.bf16.mxu0 %v4844_v7 }
 0xf38   : > { %v4916_v21 = vpop.eup %4915  ;;  %v3168_v22 = vadd.f32 1.0, %v4914_v16 }
 0xf39   : > { %v4918_v23 = vpop.eup %4917  ;;  %v3173_v27 = vadd.f32 1.0, %v4916_v21  ;;  %v3179_v32 = vmul.f32 %v3167_v19, %v3131_v25 }
 0xf3a   : > { %v3174_v30 = vadd.f32 1.0, %v4918_v23  ;;  %3886 = vmatpush1.bf16.msra.mxu0 %v4842_v14  ;;  %v3180_v36 = vmul.f32 %v3168_v22, %v3132_v28 }
 0xf3b   : > { %v3185_v6 = vmul.f32 %v3173_v27, %v3137_v26  ;;  %3887 = vmatprep.subr.bf16.mxu0 %v4847_v20 }
 0xf3c   : > { %v3186_v37 = vmul.f32 %v3174_v30, %v3138_v29 }
 0xf3d   : > { %v3191_v38 = vpack.c.bf16 %v3185_v6, %v3179_v32 }
 0xf3e   : > { %3888 = vmatpush1.bf16.msra.mxu0 %v4845_v31  ;;  %v3192_v44 = vpack.c.bf16 %v3186_v37, %v3180_v36 }
 0xf3f   : > { %3889 = vmatprep.subr.bf16.mxu0 %v4850_v34 }
 0xf40   : > { %3899 = vmatprep.mubr.bf16.mxu0 %v3192_v44 }
 0xf42   : > { %3890 = vmatpush1.bf16.msra.mxu0 %v4848_v40 }
 0xf43   : > { %3891 = vmatprep.subr.bf16.mxu0 %v4853_v8 }
 0xf46   : > { %3892 = vmatpush1.bf16.msra.mxu0 %v4851_v15 }
 0xf47   : > { %3893 = vmatprep.subr.bf16.mxu0 %v4856_v39 }
 0xf4a   : > { %3894 = vmatpush1.bf16.msra.mxu0 %v4854_v45 }
 0xf4b   : > { %3895 = vmatprep.subr.bf16.mxu0 %v4859_v46 }
 0xf4e   : > { %3896 = vmatpush1.bf16.msra.mxu0 %v4857_v47 }
 0xf4f   : > { %3897 = vmatprep.subr.bf16.mxu0 %v4862_v4 }
 0xf52   : > { %3898 = vmatpush1.bf16.msra.mxu0 %v4860_v48 }
 0xf55   : > { %3900 = vmatmul.mubr.bf16.vlgmr.msra.gmra.mrb[20].mxu0 %v3191_v38 }
 0xfe7   : > { %v3815_v17 = vpop.f32.mrb[32].mxu1 }
 0xfe8   : > { %v3817_v12 = vpop.f32.mrb[33].mxu1  ;;  %v3816_v35 = vadd.f32 %v3815_v17, %v3294_v51 }
 0xfe9   : > { %v3819_v57 = vpop.f32.mrb[34].mxu1  ;;  %v3818_v41 = vadd.f32 %v3817_v12, %v3298_v52 }
 0xfea   : > { %v3821_v50 = vpop.f32.mrb[35].mxu1  ;;  %v3820_v43 = vadd.f32 %v3819_v57, %v3294_v51 }
 0xfeb   : > { %v3822_v56 = vadd.f32 %v3821_v50, %v3298_v52 }
0x1028   : > { %v3901_v53 = vpop.f32.mrb[20].mxu0 }
0x1029   : > { %v4457_v49 = vadd.f32 %v3901_v53, %v3816_v35  ;;  %v3903_v54 = vpop.f32.mrb[21].mxu0 }
0x102a   : > { %v4459_v24 = vadd.f32 %v3903_v54, %v3818_v41  ;;  %v3905_v60 = vpop.f32.mrb[22].mxu0 }
0x102b   : > { %v3910_v9 = vadd.f32 %v4457_v49, %v5400_v59  ;;  %v4461_v62 = vadd.f32 %v3905_v60, %v3820_v43  ;;  %v3907_v58 = vpop.f32.mrb[23].mxu0 }
0x102c   : > { %v3911_v33 = vadd.f32 %v4459_v24, %v5395_v55  ;;  %v4463_v63 = vadd.f32 %v3907_v58, %v3822_v56 }
0x102d   : > { %3914 = vst [vmem:[%s5709_s16] sm:$0xff] %v3910_v9  ;;  %v3912_v10 = vadd.f32 %v4461_v62, %v5412_v42 }
0x102e   : > { %3915 = vst.msk [vmem:[%s5709_s16 + $0x8] sm:$0xff] %vm642_vm1, %v3911_v33  ;;  %v3913_v11 = vadd.f32 %v4463_v63, %v5405_v61 }
0x102f   : > { %3916 = vst [vmem:[%s5709_s16 + $0x10] sm:$0xff] %v3912_v10 }
0x1030   : > { %3917 = vst.msk [vmem:[%s5709_s16 + $0x18] sm:$0xff] %vm642_vm1, %v3913_v11 }
0x1031 PF: > { %s5716_s17 = sld [smem:[#allocation2_spill]] }
0x1037   : > { %s23_s25 = sadd.s32 1, %s5716_s17  }
0x1038   : > { %p20_p5 = scmp.ge.s32.totalorder %s23_s25, 14  }
0x103a   :  { %22 = sbr.rel (!%p20_p5) target bundleno = 6 (0x6), region = 135 }

</bundles_post_ra>
